<compile_context>
chip_gen: v7x
topology: tpu7x:2x2x1
jax: 0.10.0
libtpu: 0.0.40
codegen_flags: <defaults>
</compile_context>

<pallas_src>
import functools

import jax
import jax.numpy as jnp
from jax import lax
from jax.experimental import pallas as pl
from jax.experimental.pallas import tpu as pltpu

EPS = 1e-5


# ------------------------------ Pallas kernel ------------------------------ #
def _basic_block_kernel(xp_ref, wmask_ref, w1_ref, b1_ref, w2_ref, b2_ref,
                        o_ref, h1p_ref, *, H, W):
    """Fused BasicBlock forward for one batch sample.

    xp_ref   : (1, L, Cin)   flat-padded input rows, L = H*W + 2*(W+1)
    wmask_ref: (3, HW, 1)    w-boundary validity masks per kw tap (f32 0/1)
    w1_ref   : (9, Cin, P)   conv1 weights (BN1 scale folded), tap-major
    b1_ref   : (1, P)        BN1 folded bias
    w2_ref   : (9, P, P)     conv2 weights (BN2 scale folded), tap-major
    b2_ref   : (1, P)        BN2 folded bias
    o_ref    : (1, HW, P)    output rows
    h1p_ref  : (L, P)        VMEM scratch: flat-padded h1
    """
    HW = H * W
    PAD = W + 1

    def conv3x3(read_tap, w_ref):
        acc = None
        for kh in range(3):
            for kw in range(3):
                tap = read_tap(kh * W + kw)            # (HW, Cin) window
                if kw != 1:                            # dw = kw-1 -> mask w wrap
                    tap = tap * wmask_ref[kw]
                contrib = jnp.dot(tap, w_ref[kh * 3 + kw],
                                  preferred_element_type=jnp.float32)
                acc = contrib if acc is None else acc + contrib
        return acc

    x_tap = lambda off: xp_ref[0, pl.ds(off, HW), :]

    # conv1 (3x3, pad=1) + bn1 (scale folded) + relu
    h1 = jnp.maximum(conv3x3(x_tap, w1_ref) + b1_ref[...], 0.0)

    # Stage flat-padded h1 in VMEM scratch (zero pads, h1 in the middle).
    h1p_ref[...] = jnp.zeros_like(h1p_ref)
    h1p_ref[pl.ds(PAD, HW), :] = h1

    h1_tap = lambda off: h1p_ref[pl.ds(off, HW), :]

    # conv2 (3x3, pad=1) + bn2 (scale folded) + identity shortcut + relu
    shortcut = xp_ref[0, pl.ds(PAD, HW), :]            # center tap == original x
    y = conv3x3(h1_tap, w2_ref) + b2_ref[...] + shortcut
    o_ref[0] = jnp.maximum(y, 0.0).astype(o_ref.dtype)


# ------------------------------- JAX wrapper -------------------------------- #
def _fold_bn(gamma, beta, mean, var):
    s = gamma / jnp.sqrt(var + EPS)
    return s, beta - mean * s


@jax.jit
def basic_block_forward(x_nchw, p):
    """Pallas implementation of BasicBlock.forward (stride=1, identity shortcut)."""
    N, Cin, H, W = x_nchw.shape
    HW, PAD = H * W, W + 1
    L = HW + 2 * PAD
    planes = p["conv1_w"].shape[0]
    outplanes = p["conv2_w"].shape[0]
    assert outplanes == Cin, "identity shortcut requires outplanes == inplanes"

    # NCHW -> (N, H*W, C) rows, flat spatial axis zero-padded by W+1 on each side.
    x_rows = jnp.transpose(x_nchw, (0, 2, 3, 1)).reshape(N, HW, Cin)
    xp = jnp.pad(x_rows, ((0, 0), (PAD, PAD), (0, 0)))

    # Per-column validity masks for the dw=-1 / dw=+1 taps (kw = 0 / 2).
    wpos = jnp.arange(HW, dtype=jnp.int32) % W
    wmask = jnp.stack(
        [(wpos >= 1).astype(jnp.float32),
         jnp.ones((HW,), jnp.float32),
         (wpos <= W - 2).astype(jnp.float32)], axis=0).reshape(3, HW, 1)

    # Fold eval-mode BN scale into conv weights; keep bias as a cheap epilogue add.
    s1, b1 = _fold_bn(p["bn1_g"], p["bn1_b"], p["bn1_m"], p["bn1_v"])
    s2, b2 = _fold_bn(p["bn2_g"], p["bn2_b"], p["bn2_m"], p["bn2_v"])
    w1t = jnp.transpose(p["conv1_w"] * s1[:, None, None, None],
                        (2, 3, 1, 0)).reshape(9, Cin, planes)
    w2t = jnp.transpose(p["conv2_w"] * s2[:, None, None, None],
                        (2, 3, 1, 0)).reshape(9, planes, outplanes)

    out_rows = pl.pallas_call(
        functools.partial(_basic_block_kernel, H=H, W=W),
        out_shape=jax.ShapeDtypeStruct((N, HW, outplanes), jnp.float32),
        grid=(N,),
        in_specs=[
            pl.BlockSpec((1, L, Cin), lambda n: (n, 0, 0)),
            pl.BlockSpec((3, HW, 1), lambda n: (0, 0, 0)),
            pl.BlockSpec((9, Cin, planes), lambda n: (0, 0, 0)),
            pl.BlockSpec((1, planes), lambda n: (0, 0)),
            pl.BlockSpec((9, planes, outplanes), lambda n: (0, 0, 0)),
            pl.BlockSpec((1, outplanes), lambda n: (0, 0)),
        ],
        out_specs=pl.BlockSpec((1, HW, outplanes), lambda n: (n, 0, 0)),
        scratch_shapes=[pltpu.VMEM((L, planes), jnp.float32)],
        compiler_params=pltpu.CompilerParams(dimension_semantics=("parallel",)),
    )(xp, wmask, w1t, b1.reshape(1, planes), w2t, b2.reshape(1, outplanes))

    return jnp.transpose(out_rows.reshape(N, H, W, outplanes), (0, 3, 1, 2))


# --------------------------- pure-JAX reference ----------------------------- #
def _bn_nchw(y, g, b, m, v):
    s = g / jnp.sqrt(v + EPS)
    return y * s[None, :, None, None] + (b - m * s)[None, :, None, None]


@jax.jit
def reference_forward(x, p):
    dn = ("NCHW", "OIHW", "NCHW")
    h = lax.conv_general_dilated(x, p["conv1_w"], (1, 1), ((1, 1), (1, 1)),
                                 dimension_numbers=dn)
    h = jax.nn.relu(_bn_nchw(h, p["bn1_g"], p["bn1_b"], p["bn1_m"], p["bn1_v"]))
    h = lax.conv_general_dilated(h, p["conv2_w"], (1, 1), ((1, 1), (1, 1)),
                                 dimension_numbers=dn)
    h = _bn_nchw(h, p["bn2_g"], p["bn2_b"], p["bn2_m"], p["bn2_v"])
    return jax.nn.relu(h + x)


# ---------------------------------- main ------------------------------------ #
def _make_params(key, inplanes, planes):
    outplanes = planes * 1                      # BasicBlock.expansion = 1
    ks = jax.random.split(key, 10)

    def bn(kg, kb, km, kv, c):
        return (jax.random.uniform(kg, (c,), jnp.float32, 0.5, 1.5),
                0.1 * jax.random.normal(kb, (c,), jnp.float32),
                0.1 * jax.random.normal(km, (c,), jnp.float32),
                jax.random.uniform(kv, (c,), jnp.float32, 0.5, 1.5))

    p = {}
    p["conv1_w"] = 0.2 * jax.random.normal(ks[0], (planes, inplanes, 3, 3), jnp.float32)
    p["conv2_w"] = 0.2 * jax.random.normal(ks[1], (outplanes, planes, 3, 3), jnp.float32)
    p["bn1_g"], p["bn1_b"], p["bn1_m"], p["bn1_v"] = bn(ks[2], ks[3], ks[4], ks[5], planes)
    p["bn2_g"], p["bn2_b"], p["bn2_m"], p["bn2_v"] = bn(ks[6], ks[7], ks[8], ks[9], outplanes)
    return p


if __name__ == "__main__":
    key = jax.random.PRNGKey(0)
    k_x, k_p = jax.random.split(key)

    inplanes = planes = 32                     # outplanes == inplanes -> identity shortcut
    N, H, W = 2, 16, 16
    x = jax.random.normal(k_x, (N, inplanes, H, W), jnp.float32)
    params = _make_params(k_p, inplanes, planes)

    out = jax.block_until_ready(basic_block_forward(x, params))
    ref = jax.block_until_ready(reference_forward(x, params))

    assert out.shape == ref.shape == (N, planes, H, W), (out.shape, ref.shape)
    max_err = float(jnp.max(jnp.abs(out - ref)))
    if max_err > 2e-3:
        raise AssertionError(f"Pallas output mismatch vs reference, max_err={max_err}")

    print("KERNEL_OK")
</pallas_src>

<mosaic_0001>
module attributes {stable_mosaic.version = 11 : i64} {
  func.func @_basic_block_kernel(%arg0: i32, %arg1: memref<1x290x32xf32, #tpu.memory_space<vmem>>, %arg2: memref<3x256x1xf32, #tpu.memory_space<vmem>>, %arg3: memref<9x32x32xf32, #tpu.memory_space<vmem>>, %arg4: memref<1x32xf32, #tpu.memory_space<vmem>>, %arg5: memref<9x32x32xf32, #tpu.memory_space<vmem>>, %arg6: memref<1x32xf32, #tpu.memory_space<vmem>>, %arg7: memref<1x256x32xf32, #tpu.memory_space<vmem>>, %arg8: memref<290x32xf32, #tpu.memory_space<vmem>>) attributes {dimension_semantics = [#tpu.dimension_semantics<parallel>], iteration_bounds = array<i64: 2>, scalar_prefetch = 0 : i64, scratch_operands = 1 : i64, tpu.core_type = #tpu.core_type<tc>, window_params = [{transform_indices = @transform_0, window_bounds = array<i64: 1, 290, 32>}, {pipeline_mode = #tpu.pipeline_mode<synchronous>, transform_indices = @transform_1, window_bounds = array<i64: 3, 256, 1>}, {pipeline_mode = #tpu.pipeline_mode<synchronous>, transform_indices = @transform_2, window_bounds = array<i64: 9, 32, 32>}, {pipeline_mode = #tpu.pipeline_mode<synchronous>, transform_indices = @transform_3, window_bounds = array<i64: 1, 32>}, {pipeline_mode = #tpu.pipeline_mode<synchronous>, transform_indices = @transform_4, window_bounds = array<i64: 9, 32, 32>}, {pipeline_mode = #tpu.pipeline_mode<synchronous>, transform_indices = @transform_5, window_bounds = array<i64: 1, 32>}, {transform_indices = @transform_6, window_bounds = array<i64: 1, 256, 32>}]} {
    %c0 = arith.constant 0 : index
    %c0_0 = arith.constant 0 : index
    %c0_1 = arith.constant 0 : index
    %0 = vector.load %arg1[%c0, %c0_0, %c0_1] : memref<1x290x32xf32, #tpu.memory_space<vmem>>, vector<1x256x32xf32>
    %1 = vector.shape_cast %0 : vector<1x256x32xf32> to vector<256x32xf32>
    %c0_2 = arith.constant 0 : index
    %c0_3 = arith.constant 0 : index
    %c0_4 = arith.constant 0 : index
    %2 = vector.load %arg2[%c0_2, %c0_3, %c0_4] : memref<3x256x1xf32, #tpu.memory_space<vmem>>, vector<1x256x1xf32>
    %3 = vector.shape_cast %2 : vector<1x256x1xf32> to vector<256x1xf32>
    %4 = vector.broadcast %3 : vector<256x1xf32> to vector<256x32xf32>
    %5 = arith.mulf %1, %4 : vector<256x32xf32>
    %c0_5 = arith.constant 0 : index
    %c0_6 = arith.constant 0 : index
    %c0_7 = arith.constant 0 : index
    %6 = vector.load %arg3[%c0_5, %c0_6, %c0_7] : memref<9x32x32xf32, #tpu.memory_space<vmem>>, vector<1x32x32xf32>
    %7 = vector.shape_cast %6 : vector<1x32x32xf32> to vector<32x32xf32>
    %cst = arith.constant dense<0.000000e+00> : vector<256x32xf32>
    %8 = tpu.matmul %5, %7, %cst {dimension_numbers = #tpu.dot_dimension_numbers<[1], [0], [0], [1], [0, 0, 1, 1], [], []>} : vector<256x32xf32>, vector<32x32xf32>, vector<256x32xf32> -> vector<256x32xf32>
    %c0_8 = arith.constant 0 : index
    %c1 = arith.constant 1 : index
    %c0_9 = arith.constant 0 : index
    %9 = vector.load %arg1[%c0_8, %c1, %c0_9] : memref<1x290x32xf32, #tpu.memory_space<vmem>>, vector<1x256x32xf32>
    %10 = vector.shape_cast %9 : vector<1x256x32xf32> to vector<256x32xf32>
    %c1_10 = arith.constant 1 : index
    %c0_11 = arith.constant 0 : index
    %c0_12 = arith.constant 0 : index
    %11 = vector.load %arg3[%c1_10, %c0_11, %c0_12] : memref<9x32x32xf32, #tpu.memory_space<vmem>>, vector<1x32x32xf32>
    %12 = vector.shape_cast %11 : vector<1x32x32xf32> to vector<32x32xf32>
    %cst_13 = arith.constant dense<0.000000e+00> : vector<256x32xf32>
    %13 = tpu.matmul %10, %12, %cst_13 {dimension_numbers = #tpu.dot_dimension_numbers<[1], [0], [0], [1], [0, 0, 1, 1], [], []>} : vector<256x32xf32>, vector<32x32xf32>, vector<256x32xf32> -> vector<256x32xf32>
    %14 = arith.addf %8, %13 : vector<256x32xf32>
    %c0_14 = arith.constant 0 : index
    %c2 = arith.constant 2 : index
    %c0_15 = arith.constant 0 : index
    %15 = vector.load %arg1[%c0_14, %c2, %c0_15] : memref<1x290x32xf32, #tpu.memory_space<vmem>>, vector<1x256x32xf32>
    %16 = vector.shape_cast %15 : vector<1x256x32xf32> to vector<256x32xf32>
    %c2_16 = arith.constant 2 : index
    %c0_17 = arith.constant 0 : index
    %c0_18 = arith.constant 0 : index
    %17 = vector.load %arg2[%c2_16, %c0_17, %c0_18] : memref<3x256x1xf32, #tpu.memory_space<vmem>>, vector<1x256x1xf32>
    %18 = vector.shape_cast %17 : vector<1x256x1xf32> to vector<256x1xf32>
    %19 = vector.broadcast %18 : vector<256x1xf32> to vector<256x32xf32>
    %20 = arith.mulf %16, %19 : vector<256x32xf32>
    %c2_19 = arith.constant 2 : index
    %c0_20 = arith.constant 0 : index
    %c0_21 = arith.constant 0 : index
    %21 = vector.load %arg3[%c2_19, %c0_20, %c0_21] : memref<9x32x32xf32, #tpu.memory_space<vmem>>, vector<1x32x32xf32>
    %22 = vector.shape_cast %21 : vector<1x32x32xf32> to vector<32x32xf32>
    %cst_22 = arith.constant dense<0.000000e+00> : vector<256x32xf32>
    %23 = tpu.matmul %20, %22, %cst_22 {dimension_numbers = #tpu.dot_dimension_numbers<[1], [0], [0], [1], [0, 0, 1, 1], [], []>} : vector<256x32xf32>, vector<32x32xf32>, vector<256x32xf32> -> vector<256x32xf32>
    %24 = arith.addf %14, %23 : vector<256x32xf32>
    %c0_23 = arith.constant 0 : index
    %c16 = arith.constant 16 : index
    %c0_24 = arith.constant 0 : index
    %25 = vector.load %arg1[%c0_23, %c16, %c0_24] : memref<1x290x32xf32, #tpu.memory_space<vmem>>, vector<1x256x32xf32>
    %26 = vector.shape_cast %25 : vector<1x256x32xf32> to vector<256x32xf32>
    %c0_25 = arith.constant 0 : index
    %c0_26 = arith.constant 0 : index
    %c0_27 = arith.constant 0 : index
    %27 = vector.load %arg2[%c0_25, %c0_26, %c0_27] : memref<3x256x1xf32, #tpu.memory_space<vmem>>, vector<1x256x1xf32>
    %28 = vector.shape_cast %27 : vector<1x256x1xf32> to vector<256x1xf32>
    %29 = vector.broadcast %28 : vector<256x1xf32> to vector<256x32xf32>
    %30 = arith.mulf %26, %29 : vector<256x32xf32>
    %c3 = arith.constant 3 : index
    %c0_28 = arith.constant 0 : index
    %c0_29 = arith.constant 0 : index
    %31 = vector.load %arg3[%c3, %c0_28, %c0_29] : memref<9x32x32xf32, #tpu.memory_space<vmem>>, vector<1x32x32xf32>
    %32 = vector.shape_cast %31 : vector<1x32x32xf32> to vector<32x32xf32>
    %cst_30 = arith.constant dense<0.000000e+00> : vector<256x32xf32>
    %33 = tpu.matmul %30, %32, %cst_30 {dimension_numbers = #tpu.dot_dimension_numbers<[1], [0], [0], [1], [0, 0, 1, 1], [], []>} : vector<256x32xf32>, vector<32x32xf32>, vector<256x32xf32> -> vector<256x32xf32>
    %34 = arith.addf %24, %33 : vector<256x32xf32>
    %c0_31 = arith.constant 0 : index
    %c17 = arith.constant 17 : index
    %c0_32 = arith.constant 0 : index
    %35 = vector.load %arg1[%c0_31, %c17, %c0_32] : memref<1x290x32xf32, #tpu.memory_space<vmem>>, vector<1x256x32xf32>
    %36 = vector.shape_cast %35 : vector<1x256x32xf32> to vector<256x32xf32>
    %c4 = arith.constant 4 : index
    %c0_33 = arith.constant 0 : index
    %c0_34 = arith.constant 0 : index
    %37 = vector.load %arg3[%c4, %c0_33, %c0_34] : memref<9x32x32xf32, #tpu.memory_space<vmem>>, vector<1x32x32xf32>
    %38 = vector.shape_cast %37 : vector<1x32x32xf32> to vector<32x32xf32>
    %cst_35 = arith.constant dense<0.000000e+00> : vector<256x32xf32>
    %39 = tpu.matmul %36, %38, %cst_35 {dimension_numbers = #tpu.dot_dimension_numbers<[1], [0], [0], [1], [0, 0, 1, 1], [], []>} : vector<256x32xf32>, vector<32x32xf32>, vector<256x32xf32> -> vector<256x32xf32>
    %40 = arith.addf %34, %39 : vector<256x32xf32>
    %c0_36 = arith.constant 0 : index
    %c18 = arith.constant 18 : index
    %c0_37 = arith.constant 0 : index
    %41 = vector.load %arg1[%c0_36, %c18, %c0_37] : memref<1x290x32xf32, #tpu.memory_space<vmem>>, vector<1x256x32xf32>
    %42 = vector.shape_cast %41 : vector<1x256x32xf32> to vector<256x32xf32>
    %c2_38 = arith.constant 2 : index
    %c0_39 = arith.constant 0 : index
    %c0_40 = arith.constant 0 : index
    %43 = vector.load %arg2[%c2_38, %c0_39, %c0_40] : memref<3x256x1xf32, #tpu.memory_space<vmem>>, vector<1x256x1xf32>
    %44 = vector.shape_cast %43 : vector<1x256x1xf32> to vector<256x1xf32>
    %45 = vector.broadcast %44 : vector<256x1xf32> to vector<256x32xf32>
    %46 = arith.mulf %42, %45 : vector<256x32xf32>
    %c5 = arith.constant 5 : index
    %c0_41 = arith.constant 0 : index
    %c0_42 = arith.constant 0 : index
    %47 = vector.load %arg3[%c5, %c0_41, %c0_42] : memref<9x32x32xf32, #tpu.memory_space<vmem>>, vector<1x32x32xf32>
    %48 = vector.shape_cast %47 : vector<1x32x32xf32> to vector<32x32xf32>
    %cst_43 = arith.constant dense<0.000000e+00> : vector<256x32xf32>
    %49 = tpu.matmul %46, %48, %cst_43 {dimension_numbers = #tpu.dot_dimension_numbers<[1], [0], [0], [1], [0, 0, 1, 1], [], []>} : vector<256x32xf32>, vector<32x32xf32>, vector<256x32xf32> -> vector<256x32xf32>
    %50 = arith.addf %40, %49 : vector<256x32xf32>
    %c0_44 = arith.constant 0 : index
    %c32 = arith.constant 32 : index
    %c0_45 = arith.constant 0 : index
    %51 = vector.load %arg1[%c0_44, %c32, %c0_45] : memref<1x290x32xf32, #tpu.memory_space<vmem>>, vector<1x256x32xf32>
    %52 = vector.shape_cast %51 : vector<1x256x32xf32> to vector<256x32xf32>
    %c0_46 = arith.constant 0 : index
    %c0_47 = arith.constant 0 : index
    %c0_48 = arith.constant 0 : index
    %53 = vector.load %arg2[%c0_46, %c0_47, %c0_48] : memref<3x256x1xf32, #tpu.memory_space<vmem>>, vector<1x256x1xf32>
    %54 = vector.shape_cast %53 : vector<1x256x1xf32> to vector<256x1xf32>
    %55 = vector.broadcast %54 : vector<256x1xf32> to vector<256x32xf32>
    %56 = arith.mulf %52, %55 : vector<256x32xf32>
    %c6 = arith.constant 6 : index
    %c0_49 = arith.constant 0 : index
    %c0_50 = arith.constant 0 : index
    %57 = vector.load %arg3[%c6, %c0_49, %c0_50] : memref<9x32x32xf32, #tpu.memory_space<vmem>>, vector<1x32x32xf32>
    %58 = vector.shape_cast %57 : vector<1x32x32xf32> to vector<32x32xf32>
    %cst_51 = arith.constant dense<0.000000e+00> : vector<256x32xf32>
    %59 = tpu.matmul %56, %58, %cst_51 {dimension_numbers = #tpu.dot_dimension_numbers<[1], [0], [0], [1], [0, 0, 1, 1], [], []>} : vector<256x32xf32>, vector<32x32xf32>, vector<256x32xf32> -> vector<256x32xf32>
    %60 = arith.addf %50, %59 : vector<256x32xf32>
    %c0_52 = arith.constant 0 : index
    %c33 = arith.constant 33 : index
    %c0_53 = arith.constant 0 : index
    %61 = vector.load %arg1[%c0_52, %c33, %c0_53] : memref<1x290x32xf32, #tpu.memory_space<vmem>>, vector<1x256x32xf32>
    %62 = vector.shape_cast %61 : vector<1x256x32xf32> to vector<256x32xf32>
    %c7 = arith.constant 7 : index
    %c0_54 = arith.constant 0 : index
    %c0_55 = arith.constant 0 : index
    %63 = vector.load %arg3[%c7, %c0_54, %c0_55] : memref<9x32x32xf32, #tpu.memory_space<vmem>>, vector<1x32x32xf32>
    %64 = vector.shape_cast %63 : vector<1x32x32xf32> to vector<32x32xf32>
    %cst_56 = arith.constant dense<0.000000e+00> : vector<256x32xf32>
    %65 = tpu.matmul %62, %64, %cst_56 {dimension_numbers = #tpu.dot_dimension_numbers<[1], [0], [0], [1], [0, 0, 1, 1], [], []>} : vector<256x32xf32>, vector<32x32xf32>, vector<256x32xf32> -> vector<256x32xf32>
    %66 = arith.addf %60, %65 : vector<256x32xf32>
    %c0_57 = arith.constant 0 : index
    %c34 = arith.constant 34 : index
    %c0_58 = arith.constant 0 : index
    %67 = vector.load %arg1[%c0_57, %c34, %c0_58] : memref<1x290x32xf32, #tpu.memory_space<vmem>>, vector<1x256x32xf32>
    %68 = vector.shape_cast %67 : vector<1x256x32xf32> to vector<256x32xf32>
    %c2_59 = arith.constant 2 : index
    %c0_60 = arith.constant 0 : index
    %c0_61 = arith.constant 0 : index
    %69 = vector.load %arg2[%c2_59, %c0_60, %c0_61] : memref<3x256x1xf32, #tpu.memory_space<vmem>>, vector<1x256x1xf32>
    %70 = vector.shape_cast %69 : vector<1x256x1xf32> to vector<256x1xf32>
    %71 = vector.broadcast %70 : vector<256x1xf32> to vector<256x32xf32>
    %72 = arith.mulf %68, %71 : vector<256x32xf32>
    %c8 = arith.constant 8 : index
    %c0_62 = arith.constant 0 : index
    %c0_63 = arith.constant 0 : index
    %73 = vector.load %arg3[%c8, %c0_62, %c0_63] : memref<9x32x32xf32, #tpu.memory_space<vmem>>, vector<1x32x32xf32>
    %74 = vector.shape_cast %73 : vector<1x32x32xf32> to vector<32x32xf32>
    %cst_64 = arith.constant dense<0.000000e+00> : vector<256x32xf32>
    %75 = tpu.matmul %72, %74, %cst_64 {dimension_numbers = #tpu.dot_dimension_numbers<[1], [0], [0], [1], [0, 0, 1, 1], [], []>} : vector<256x32xf32>, vector<32x32xf32>, vector<256x32xf32> -> vector<256x32xf32>
    %76 = arith.addf %66, %75 : vector<256x32xf32>
    %c0_65 = arith.constant 0 : index
    %c0_66 = arith.constant 0 : index
    %77 = vector.load %arg4[%c0_65, %c0_66] : memref<1x32xf32, #tpu.memory_space<vmem>>, vector<1x32xf32>
    %78 = vector.broadcast %77 : vector<1x32xf32> to vector<256x32xf32>
    %79 = arith.addf %76, %78 : vector<256x32xf32>
    %cst_67 = arith.constant 0.000000e+00 : f32
    %80 = vector.broadcast %cst_67 : f32 to vector<256x32xf32>
    %81 = arith.maximumf %79, %80 : vector<256x32xf32>
    %cst_68 = arith.constant 0.000000e+00 : f32
    %82 = vector.broadcast %cst_68 : f32 to vector<290x32xf32>
    %c0_69 = arith.constant 0 : index
    %c0_70 = arith.constant 0 : index
    %83 = vector.load %arg8[%c0_69, %c0_70] : memref<290x32xf32, #tpu.memory_space<vmem>>, vector<290x32xf32>
    tpu.vector_store %arg8[%c0_69, %c0_70], %82 {strides = array<i32>} : memref<290x32xf32, #tpu.memory_space<vmem>>, vector<290x32xf32>,
    %c17_71 = arith.constant 17 : index
    %c0_72 = arith.constant 0 : index
    %84 = vector.load %arg8[%c17_71, %c0_72] : memref<290x32xf32, #tpu.memory_space<vmem>>, vector<256x32xf32>
    tpu.vector_store %arg8[%c17_71, %c0_72], %81 {strides = array<i32>} : memref<290x32xf32, #tpu.memory_space<vmem>>, vector<256x32xf32>,
    %c0_73 = arith.constant 0 : index
    %c17_74 = arith.constant 17 : index
    %c0_75 = arith.constant 0 : index
    %85 = vector.load %arg1[%c0_73, %c17_74, %c0_75] : memref<1x290x32xf32, #tpu.memory_space<vmem>>, vector<1x256x32xf32>
    %86 = vector.shape_cast %85 : vector<1x256x32xf32> to vector<256x32xf32>
    %c0_76 = arith.constant 0 : index
    %c0_77 = arith.constant 0 : index
    %87 = vector.load %arg8[%c0_76, %c0_77] : memref<290x32xf32, #tpu.memory_space<vmem>>, vector<256x32xf32>
    %c0_78 = arith.constant 0 : index
    %c0_79 = arith.constant 0 : index
    %c0_80 = arith.constant 0 : index
    %88 = vector.load %arg2[%c0_78, %c0_79, %c0_80] : memref<3x256x1xf32, #tpu.memory_space<vmem>>, vector<1x256x1xf32>
    %89 = vector.shape_cast %88 : vector<1x256x1xf32> to vector<256x1xf32>
    %90 = vector.broadcast %89 : vector<256x1xf32> to vector<256x32xf32>
    %91 = arith.mulf %87, %90 : vector<256x32xf32>
    %c0_81 = arith.constant 0 : index
    %c0_82 = arith.constant 0 : index
    %c0_83 = arith.constant 0 : index
    %92 = vector.load %arg5[%c0_81, %c0_82, %c0_83] : memref<9x32x32xf32, #tpu.memory_space<vmem>>, vector<1x32x32xf32>
    %93 = vector.shape_cast %92 : vector<1x32x32xf32> to vector<32x32xf32>
    %cst_84 = arith.constant dense<0.000000e+00> : vector<256x32xf32>
    %94 = tpu.matmul %91, %93, %cst_84 {dimension_numbers = #tpu.dot_dimension_numbers<[1], [0], [0], [1], [0, 0, 1, 1], [], []>} : vector<256x32xf32>, vector<32x32xf32>, vector<256x32xf32> -> vector<256x32xf32>
    %c1_85 = arith.constant 1 : index
    %c0_86 = arith.constant 0 : index
    %95 = vector.load %arg8[%c1_85, %c0_86] : memref<290x32xf32, #tpu.memory_space<vmem>>, vector<256x32xf32>
    %c1_87 = arith.constant 1 : index
    %c0_88 = arith.constant 0 : index
    %c0_89 = arith.constant 0 : index
    %96 = vector.load %arg5[%c1_87, %c0_88, %c0_89] : memref<9x32x32xf32, #tpu.memory_space<vmem>>, vector<1x32x32xf32>
    %97 = vector.shape_cast %96 : vector<1x32x32xf32> to vector<32x32xf32>
    %cst_90 = arith.constant dense<0.000000e+00> : vector<256x32xf32>
    %98 = tpu.matmul %95, %97, %cst_90 {dimension_numbers = #tpu.dot_dimension_numbers<[1], [0], [0], [1], [0, 0, 1, 1], [], []>} : vector<256x32xf32>, vector<32x32xf32>, vector<256x32xf32> -> vector<256x32xf32>
    %99 = arith.addf %94, %98 : vector<256x32xf32>
    %c2_91 = arith.constant 2 : index
    %c0_92 = arith.constant 0 : index
    %100 = vector.load %arg8[%c2_91, %c0_92] : memref<290x32xf32, #tpu.memory_space<vmem>>, vector<256x32xf32>
    %c2_93 = arith.constant 2 : index
    %c0_94 = arith.constant 0 : index
    %c0_95 = arith.constant 0 : index
    %101 = vector.load %arg2[%c2_93, %c0_94, %c0_95] : memref<3x256x1xf32, #tpu.memory_space<vmem>>, vector<1x256x1xf32>
    %102 = vector.shape_cast %101 : vector<1x256x1xf32> to vector<256x1xf32>
    %103 = vector.broadcast %102 : vector<256x1xf32> to vector<256x32xf32>
    %104 = arith.mulf %100, %103 : vector<256x32xf32>
    %c2_96 = arith.constant 2 : index
    %c0_97 = arith.constant 0 : index
    %c0_98 = arith.constant 0 : index
    %105 = vector.load %arg5[%c2_96, %c0_97, %c0_98] : memref<9x32x32xf32, #tpu.memory_space<vmem>>, vector<1x32x32xf32>
    %106 = vector.shape_cast %105 : vector<1x32x32xf32> to vector<32x32xf32>
    %cst_99 = arith.constant dense<0.000000e+00> : vector<256x32xf32>
    %107 = tpu.matmul %104, %106, %cst_99 {dimension_numbers = #tpu.dot_dimension_numbers<[1], [0], [0], [1], [0, 0, 1, 1], [], []>} : vector<256x32xf32>, vector<32x32xf32>, vector<256x32xf32> -> vector<256x32xf32>
    %108 = arith.addf %99, %107 : vector<256x32xf32>
    %c16_100 = arith.constant 16 : index
    %c0_101 = arith.constant 0 : index
    %109 = vector.load %arg8[%c16_100, %c0_101] : memref<290x32xf32, #tpu.memory_space<vmem>>, vector<256x32xf32>
    %c0_102 = arith.constant 0 : index
    %c0_103 = arith.constant 0 : index
    %c0_104 = arith.constant 0 : index
    %110 = vector.load %arg2[%c0_102, %c0_103, %c0_104] : memref<3x256x1xf32, #tpu.memory_space<vmem>>, vector<1x256x1xf32>
    %111 = vector.shape_cast %110 : vector<1x256x1xf32> to vector<256x1xf32>
    %112 = vector.broadcast %111 : vector<256x1xf32> to vector<256x32xf32>
    %113 = arith.mulf %109, %112 : vector<256x32xf32>
    %c3_105 = arith.constant 3 : index
    %c0_106 = arith.constant 0 : index
    %c0_107 = arith.constant 0 : index
    %114 = vector.load %arg5[%c3_105, %c0_106, %c0_107] : memref<9x32x32xf32, #tpu.memory_space<vmem>>, vector<1x32x32xf32>
    %115 = vector.shape_cast %114 : vector<1x32x32xf32> to vector<32x32xf32>
    %cst_108 = arith.constant dense<0.000000e+00> : vector<256x32xf32>
    %116 = tpu.matmul %113, %115, %cst_108 {dimension_numbers = #tpu.dot_dimension_numbers<[1], [0], [0], [1], [0, 0, 1, 1], [], []>} : vector<256x32xf32>, vector<32x32xf32>, vector<256x32xf32> -> vector<256x32xf32>
    %117 = arith.addf %108, %116 : vector<256x32xf32>
    %c17_109 = arith.constant 17 : index
    %c0_110 = arith.constant 0 : index
    %118 = vector.load %arg8[%c17_109, %c0_110] : memref<290x32xf32, #tpu.memory_space<vmem>>, vector<256x32xf32>
    %c4_111 = arith.constant 4 : index
    %c0_112 = arith.constant 0 : index
    %c0_113 = arith.constant 0 : index
    %119 = vector.load %arg5[%c4_111, %c0_112, %c0_113] : memref<9x32x32xf32, #tpu.memory_space<vmem>>, vector<1x32x32xf32>
    %120 = vector.shape_cast %119 : vector<1x32x32xf32> to vector<32x32xf32>
    %cst_114 = arith.constant dense<0.000000e+00> : vector<256x32xf32>
    %121 = tpu.matmul %118, %120, %cst_114 {dimension_numbers = #tpu.dot_dimension_numbers<[1], [0], [0], [1], [0, 0, 1, 1], [], []>} : vector<256x32xf32>, vector<32x32xf32>, vector<256x32xf32> -> vector<256x32xf32>
    %122 = arith.addf %117, %121 : vector<256x32xf32>
    %c18_115 = arith.constant 18 : index
    %c0_116 = arith.constant 0 : index
    %123 = vector.load %arg8[%c18_115, %c0_116] : memref<290x32xf32, #tpu.memory_space<vmem>>, vector<256x32xf32>
    %c2_117 = arith.constant 2 : index
    %c0_118 = arith.constant 0 : index
    %c0_119 = arith.constant 0 : index
    %124 = vector.load %arg2[%c2_117, %c0_118, %c0_119] : memref<3x256x1xf32, #tpu.memory_space<vmem>>, vector<1x256x1xf32>
    %125 = vector.shape_cast %124 : vector<1x256x1xf32> to vector<256x1xf32>
    %126 = vector.broadcast %125 : vector<256x1xf32> to vector<256x32xf32>
    %127 = arith.mulf %123, %126 : vector<256x32xf32>
    %c5_120 = arith.constant 5 : index
    %c0_121 = arith.constant 0 : index
    %c0_122 = arith.constant 0 : index
    %128 = vector.load %arg5[%c5_120, %c0_121, %c0_122] : memref<9x32x32xf32, #tpu.memory_space<vmem>>, vector<1x32x32xf32>
    %129 = vector.shape_cast %128 : vector<1x32x32xf32> to vector<32x32xf32>
    %cst_123 = arith.constant dense<0.000000e+00> : vector<256x32xf32>
    %130 = tpu.matmul %127, %129, %cst_123 {dimension_numbers = #tpu.dot_dimension_numbers<[1], [0], [0], [1], [0, 0, 1, 1], [], []>} : vector<256x32xf32>, vector<32x32xf32>, vector<256x32xf32> -> vector<256x32xf32>
    %131 = arith.addf %122, %130 : vector<256x32xf32>
    %c32_124 = arith.constant 32 : index
    %c0_125 = arith.constant 0 : index
    %132 = vector.load %arg8[%c32_124, %c0_125] : memref<290x32xf32, #tpu.memory_space<vmem>>, vector<256x32xf32>
    %c0_126 = arith.constant 0 : index
    %c0_127 = arith.constant 0 : index
    %c0_128 = arith.constant 0 : index
    %133 = vector.load %arg2[%c0_126, %c0_127, %c0_128] : memref<3x256x1xf32, #tpu.memory_space<vmem>>, vector<1x256x1xf32>
    %134 = vector.shape_cast %133 : vector<1x256x1xf32> to vector<256x1xf32>
    %135 = vector.broadcast %134 : vector<256x1xf32> to vector<256x32xf32>
    %136 = arith.mulf %132, %135 : vector<256x32xf32>
    %c6_129 = arith.constant 6 : index
    %c0_130 = arith.constant 0 : index
    %c0_131 = arith.constant 0 : index
    %137 = vector.load %arg5[%c6_129, %c0_130, %c0_131] : memref<9x32x32xf32, #tpu.memory_space<vmem>>, vector<1x32x32xf32>
    %138 = vector.shape_cast %137 : vector<1x32x32xf32> to vector<32x32xf32>
    %cst_132 = arith.constant dense<0.000000e+00> : vector<256x32xf32>
    %139 = tpu.matmul %136, %138, %cst_132 {dimension_numbers = #tpu.dot_dimension_numbers<[1], [0], [0], [1], [0, 0, 1, 1], [], []>} : vector<256x32xf32>, vector<32x32xf32>, vector<256x32xf32> -> vector<256x32xf32>
    %140 = arith.addf %131, %139 : vector<256x32xf32>
    %c33_133 = arith.constant 33 : index
    %c0_134 = arith.constant 0 : index
    %141 = vector.load %arg8[%c33_133, %c0_134] : memref<290x32xf32, #tpu.memory_space<vmem>>, vector<256x32xf32>
    %c7_135 = arith.constant 7 : index
    %c0_136 = arith.constant 0 : index
    %c0_137 = arith.constant 0 : index
    %142 = vector.load %arg5[%c7_135, %c0_136, %c0_137] : memref<9x32x32xf32, #tpu.memory_space<vmem>>, vector<1x32x32xf32>
    %143 = vector.shape_cast %142 : vector<1x32x32xf32> to vector<32x32xf32>
    %cst_138 = arith.constant dense<0.000000e+00> : vector<256x32xf32>
    %144 = tpu.matmul %141, %143, %cst_138 {dimension_numbers = #tpu.dot_dimension_numbers<[1], [0], [0], [1], [0, 0, 1, 1], [], []>} : vector<256x32xf32>, vector<32x32xf32>, vector<256x32xf32> -> vector<256x32xf32>
    %145 = arith.addf %140, %144 : vector<256x32xf32>
    %c34_139 = arith.constant 34 : index
    %c0_140 = arith.constant 0 : index
    %146 = vector.load %arg8[%c34_139, %c0_140] : memref<290x32xf32, #tpu.memory_space<vmem>>, vector<256x32xf32>
    %c2_141 = arith.constant 2 : index
    %c0_142 = arith.constant 0 : index
    %c0_143 = arith.constant 0 : index
    %147 = vector.load %arg2[%c2_141, %c0_142, %c0_143] : memref<3x256x1xf32, #tpu.memory_space<vmem>>, vector<1x256x1xf32>
    %148 = vector.shape_cast %147 : vector<1x256x1xf32> to vector<256x1xf32>
    %149 = vector.broadcast %148 : vector<256x1xf32> to vector<256x32xf32>
    %150 = arith.mulf %146, %149 : vector<256x32xf32>
    %c8_144 = arith.constant 8 : index
    %c0_145 = arith.constant 0 : index
    %c0_146 = arith.constant 0 : index
    %151 = vector.load %arg5[%c8_144, %c0_145, %c0_146] : memref<9x32x32xf32, #tpu.memory_space<vmem>>, vector<1x32x32xf32>
    %152 = vector.shape_cast %151 : vector<1x32x32xf32> to vector<32x32xf32>
    %cst_147 = arith.constant dense<0.000000e+00> : vector<256x32xf32>
    %153 = tpu.matmul %150, %152, %cst_147 {dimension_numbers = #tpu.dot_dimension_numbers<[1], [0], [0], [1], [0, 0, 1, 1], [], []>} : vector<256x32xf32>, vector<32x32xf32>, vector<256x32xf32> -> vector<256x32xf32>
    %154 = arith.addf %145, %153 : vector<256x32xf32>
    %c0_148 = arith.constant 0 : index
    %c0_149 = arith.constant 0 : index
    %155 = vector.load %arg6[%c0_148, %c0_149] : memref<1x32xf32, #tpu.memory_space<vmem>>, vector<1x32xf32>
    %156 = vector.broadcast %155 : vector<1x32xf32> to vector<256x32xf32>
    %157 = arith.addf %154, %156 : vector<256x32xf32>
    %158 = arith.addf %157, %86 : vector<256x32xf32>
    %cst_150 = arith.constant 0.000000e+00 : f32
    %159 = vector.broadcast %cst_150 : f32 to vector<256x32xf32>
    %160 = arith.maximumf %158, %159 : vector<256x32xf32>
    %c0_151 = arith.constant 0 : index
    %c0_152 = arith.constant 0 : index
    %c0_153 = arith.constant 0 : index
    %161 = vector.load %arg7[%c0_151, %c0_152, %c0_153] : memref<1x256x32xf32, #tpu.memory_space<vmem>>, vector<1x256x32xf32>
    %162 = vector.shape_cast %161 : vector<1x256x32xf32> to vector<256x32xf32>
    %163 = vector.shape_cast %160 : vector<256x32xf32> to vector<1x256x32xf32>
    tpu.vector_store %arg7[%c0_151, %c0_152, %c0_153], %163 {strides = array<i32>} : memref<1x256x32xf32, #tpu.memory_space<vmem>>, vector<1x256x32xf32>,
    return
  }
  func.func @transform_0(%arg0: i32) -> (i32, i32, i32) {
    %c0_i32 = arith.constant 0 : i32
    %c0_i32_0 = arith.constant 0 : i32
    %c0_i32_1 = arith.constant 0 : i32
    return %arg0, %c0_i32, %c0_i32_0 : i32, i32, i32
  }
  func.func @transform_1(%arg0: i32) -> (i32, i32, i32) {
    %c0_i32 = arith.constant 0 : i32
    %c0_i32_0 = arith.constant 0 : i32
    %c0_i32_1 = arith.constant 0 : i32
    %c0_i32_2 = arith.constant 0 : i32
    return %c0_i32, %c0_i32_0, %c0_i32_1 : i32, i32, i32
  }
  func.func @transform_2(%arg0: i32) -> (i32, i32, i32) {
    %c0_i32 = arith.constant 0 : i32
    %c0_i32_0 = arith.constant 0 : i32
    %c0_i32_1 = arith.constant 0 : i32
    %c0_i32_2 = arith.constant 0 : i32
    return %c0_i32, %c0_i32_0, %c0_i32_1 : i32, i32, i32
  }
  func.func @transform_3(%arg0: i32) -> (i32, i32) {
    %c0_i32 = arith.constant 0 : i32
    %c0_i32_0 = arith.constant 0 : i32
    %c0_i32_1 = arith.constant 0 : i32
    return %c0_i32, %c0_i32_0 : i32, i32
  }
  func.func @transform_4(%arg0: i32) -> (i32, i32, i32) {
    %c0_i32 = arith.constant 0 : i32
    %c0_i32_0 = arith.constant 0 : i32
    %c0_i32_1 = arith.constant 0 : i32
    %c0_i32_2 = arith.constant 0 : i32
    return %c0_i32, %c0_i32_0, %c0_i32_1 : i32, i32, i32
  }
  func.func @transform_5(%arg0: i32) -> (i32, i32) {
    %c0_i32 = arith.constant 0 : i32
    %c0_i32_0 = arith.constant 0 : i32
    %c0_i32_1 = arith.constant 0 : i32
    return %c0_i32, %c0_i32_0 : i32, i32
  }
  func.func @transform_6(%arg0: i32) -> (i32, i32, i32) {
    %c0_i32 = arith.constant 0 : i32
    %c0_i32_0 = arith.constant 0 : i32
    %c0_i32_1 = arith.constant 0 : i32
    return %arg0, %c0_i32, %c0_i32_0 : i32, i32, i32
  }
}

</mosaic_0001>

<bundles_post_ra>
// kernel: basic_block_forward.1
= control target key start
LH: loop header
LB: loop body
LE: loop exit
PB: predicated region body
PF: predicated region fallthrough
CT: control target
= control target key end

     0   :  { %11 = vsyncpa [#allocation4], 0  ;;  %s15038_s0 = inlined_call_operand.vmem [shape: f32[2,290,32], index: 0, kind: input, shape index: {}]   ;;  %s15039_s1 = inlined_call_operand.vmem [shape: f32[3,256,1], index: 1, kind: input, shape index: {}]   ;;  %s15040_s2 = inlined_call_operand.vmem [shape: f32[9,32,32], index: 2, kind: input, shape index: {}]   ;;  %s15041_s3 = inlined_call_operand.vmem [shape: f32[1,32], index: 3, kind: input, shape index: {}]   ;;  %s15042_s4 = inlined_call_operand.vmem [shape: f32[9,32,32], index: 4, kind: input, shape index: {}]   ;;  %s15043_s5 = inlined_call_operand.vmem [shape: f32[1,32], index: 5, kind: input, shape index: {}]   ;;  %s15044_s6 = inlined_call_operand.hbm [shape: f32[2,256,32], index: 6, kind: output, shape index: {}]  }
   0x1   :  { %13 = vsyncpa [#allocation4 + $0x1], 0  ;;  %s11888_s21 = smov 0   ;;  %s11890_s22 = smov 0  }
   0x2   :  { %s11892_s23 = smov 0   ;;  %s11894_s24 = smov 0  }
   0x3 LB: > { %s11909_s25 = sadd.s32 4294967295, %s11846_s24   ;;  %s8678_s26 = sadd.s32 4294967294, %s11846_s24   ;;  %s11846_s24 = sphi %s11894_s24, %s15708_s24   ;;  %s11842_s23 = sphi %s11892_s23, %s15707_s23   ;;  %s11838_s22 = sphi %s11890_s22, %s15706_s22   ;;  %s11834_s21 = sphi %s11888_s21, %s15705_s21  }
   0x4   : > { %s11913_s27 = sadd.s32 1, %s11846_s24   ;;  %s157_s28 = sadd.s32 1, %s11842_s23 }
   0x5   : > { %s154_s29 = ssub.s32 %s11846_s24, %s11913_s27  ;;  %p167_p0 = scmp.ne.s32.totalorder %s11842_s23, %s11838_s22 }
   0x6   : > { %p155_p1 = scmp.eq.s32.totalorder %s154_s29, 0  ;;  %p168_p2 = scmp.eq.s32.totalorder %s11909_s25, 1 }
   0x7   : > { %p173_p3 = scmp.ne.s32.totalorder %s11838_s22, %s11834_s21  ;;  %p174_p4 = scmp.eq.s32.totalorder %s8678_s26, 1 }
   0x8   : > { %s11924_s30 = scalar_select %p155_p1, %s11842_s23, %s157_s28  }
   0x9   : > { %p11926_p5 = por %p168_p2, %p167_p0  ;;  %p11930_p6 = por %p174_p4, %p173_p3 }
   0xa   : > { %p8681_p7 = scmp.ge.s32.totalorder %s11846_s24, 1  ;;  %p215_p8 = scmp.lt.s32.totalorder %s11846_s24, 3 }
   0xc   : > { %p216_p9 = pnand %p8681_p7, %p215_p8 }
   0xe   : > { %219 = sbr.rel (%p216_p9) target bundleno = 1633 (0x661), region = 44 }
  0x15   : > { %v11939_v0 = vld [vmem:[%s15039_s1 + $0x10] sm:$0xff]  ;;  %v11944_v1 = vld [vmem:[%s15039_s1] sm:$0xff]  ;;  %p245_p10 = scmp.lt.s32.totalorder %s11909_s25, 1  ;;  %v11848_v2 = vmov 0   ;;  %v11953_v3 = vld [vmem:[%s15039_s1 + $0x18] sm:$0xff]  ;;  %vm547_vm0 = vcmask 261120  }
  0x16   : > { %11753 = vset.pattern.permute.xlu1 %v11848_v2  ;;  %11752 = vset.pattern.permute.xlu0 %v11848_v2  ;;  %v11958_v4 = vld [vmem:[%s15039_s1 + $0x8] sm:$0xff]  ;;  %v11970_v6 = vld [vmem:[%s15039_s1 + $0x20] sm:$0xff]  ;;  %v11985_v8 = vld [vmem:[%s15039_s1 + $0x38] sm:$0xff]  ;;  %vm4380_vm1 = vcmask 254976   ;;  %s242_s17 = sand.u32 1, %s11838_s22   ;;  %s9395_s28 = sshll.u32 %s11909_s25, 12 }
  0x17   : > { %326 = vperm.xlu1 %11753, %v11939_v0   ;;  %316 = vperm.xlu0 %11752, %v11944_v1   ;;  %s246_s13 = scalar_select %p245_p10, %s11909_s25, 1  ;;  %v11965_v5 = vld [vmem:[%s15039_s1 + $0x28] sm:$0xff]  ;;  %v8684_v7 = vld [vmem:[%s15040_s2 + $0x20] sm:$0xff]  ;;  %v11990_v9 = vld [vmem:[%s15039_s1 + $0x30] sm:$0xff] }
  0x18   : > { %v8685_v10 = vld [vmem:[%s15040_s2 + $0x28] sm:$0xff]  ;;  %v8686_v12 = vld [vmem:[%s15040_s2 + $0x30] sm:$0xff]  ;;  %v8687_v13 = vld [vmem:[%s15040_s2 + $0x38] sm:$0xff]  ;;  %s8682_s26 = sshll.u32 %s242_s17, 8  ;;  %s14987_s11 = scalar_lea.hbm %s15044_s6, %s9395_s28 }
  0x19   : > { %s11708_s18 = smul.u32 296, %s246_s13  ;;  %v11052_v11 = vpack.c.bf16 %v8685_v10, %v8684_v7  ;;  %v11056_v14 = vpack.c.bf16 %v8687_v13, %v8686_v12  ;;  %v506_v16 = vld [vmem:[%s15040_s2] sm:$0xff]  ;;  %v507_v17 = vld [vmem:[%s15040_s2 + $0x8] sm:$0xff]  ;;  %v12026_v21 = vld [vmem:[%s15039_s1 + $0x58] sm:$0xff]  ;;  %s14997_s25 = scalar_lea.sflag [#allocation4], %s242_s17 }
  0x1a   : > { %v12013_v18 = vld [vmem:[%s15039_s1 + $0x48] sm:$0xff]  ;;  %v12018_v19 = vld [vmem:[%s15039_s1 + $0x40] sm:$0xff]  ;;  %v11060_v20 = vpack.c.bf16 %v507_v17, %v506_v16  ;;  %v12031_v22 = vld [vmem:[%s15039_s1 + $0x50] sm:$0xff]  ;;  %s11850_s13 = smov [#allocation3]  }
  0x1b   : > { %331 = vperm.xlu1 %11753, %v11953_v3   ;;  %321 = vperm.xlu0 %11752, %v11958_v4   ;;  %s11980_s12 = scalar_lea.vmem %s15038_s0, %s11708_s18  ;;  %v12040_v25 = vld [vmem:[%s15039_s1 + $0x68] sm:$0xff]  ;;  %v12045_v26 = vld [vmem:[%s15039_s1 + $0x60] sm:$0xff]  ;;  %v508_v29 = vld [vmem:[%s15040_s2 + $0x10] sm:$0xff]  ;;  %s14864_s18 = scalar_lea.vmem [#allocation3], %s8682_s26 }
  0x1c   : > { %v510_v15 = vld [vmem:[%s11980_s12 + $0x1] sm:$0xff]  ;;  %11053 = vmatprep.subr.bf16.mxu0 %v11052_v11  ;;  %v511_v23 = vld [vmem:[%s11980_s12 + $0x9] sm:$0xff]  ;;  %v512_v24 = vld [vmem:[%s11980_s12 + $0x11] sm:$0xff]  ;;  %s8616_s29 = sshll.u32 %s14864_s18, 4  ;;  %s11788_s14 = sshll.u32 %s11850_s13, 4  ;;  %s14989_s29 = int_to_ptr.vmem [resolvable:$true] %s8616_s29  ;;  %s11789_s14 = int_to_ptr.vmem [resolvable:$false] %s11788_s14 }
  0x1d   : > { %10052 = vmatprep.mubr.msk.f32.mxu0 %vm547_vm0, %v510_v15  ;;  %11055 = vmatpush3.bf16.msra.mxu0 %v11052_v11  ;;  %v513_v27 = vld [vmem:[%s11980_s12 + $0x19] sm:$0xff]  ;;  %v514_v28 = vld [vmem:[%s11980_s12 + $0x21] sm:$0xff]  ;;  %v12067_v33 = vld [vmem:[%s15039_s1 + $0x70] sm:$0xff]  ;;  %s11790_s15 = scalar_lea.vmem %s11789_s14, 8192  ;;  %p11791_p0 = scmp.lt.s32.totalorder %s14989_s29, %s11789_s14 }
  0x1e   : > { %11057 = vmatprep.subr.bf16.mxu0 %v11056_v14  ;;  %v509_v30 = vld [vmem:[%s15040_s2 + $0x18] sm:$0xff]  ;;  %v515_v34 = vld [vmem:[%s11980_s12 + $0x29] sm:$0xff]  ;;  %v12083_v37 = vld [vmem:[%s15039_s1 + $0x80] sm:$0xff] }
  0x1f   : > { %341 = vperm.xlu1 %11753, %v11965_v5   ;;  %336 = vperm.xlu0 %11752, %v11970_v6   ;;  %v11064_v31 = vpack.c.bf16 %v509_v30, %v508_v29  ;;  %v12062_v32 = vld [vmem:[%s15039_s1 + $0x78] sm:$0xff]  ;;  %v12078_v36 = vld [vmem:[%s15039_s1 + $0x88] sm:$0xff]  ;;  %v12099_v41 = vld [vmem:[%s15039_s1 + $0x90] sm:$0xff] }
  0x20   : > { %v516_v35 = vld [vmem:[%s11980_s12 + $0x31] sm:$0xff]  ;;  %v517_v38 = vld [vmem:[%s11980_s12 + $0x39] sm:$0xff]  ;;  %v518_v39 = vld [vmem:[%s11980_s12 + $0x41] sm:$0xff] }
  0x21   : > { %11059 = vmatpush3.bf16.msra.mxu0 %v11056_v14  ;;  %v12094_v40 = vld [vmem:[%s15039_s1 + $0x98] sm:$0xff]  ;;  %v519_v42 = vld [vmem:[%s11980_s12 + $0x49] sm:$0xff]  ;;  %v8784_v44 = vld [vmem:[%s15040_s2 + $0x40] sm:$0xff] }
  0x22   : > { %11061 = vmatprep.subr.bf16.mxu0 %v11060_v20  ;;  %v520_v43 = vld [vmem:[%s11980_s12 + $0x51] sm:$0xff]  ;;  %v8785_v45 = vld [vmem:[%s15040_s2 + $0x48] sm:$0xff]  ;;  %v12123_v48 = vld [vmem:[%s15039_s1 + $0xa0] sm:$0xff] }
  0x23   : > { %351 = vperm.xlu1 %11753, %v11985_v8   ;;  %346 = vperm.xlu0 %11752, %v11990_v9   ;;  %v12113_v46 = vpack.c.bf16 %v8785_v45, %v8784_v44  ;;  %v12118_v47 = vld [vmem:[%s15039_s1 + $0xa8] sm:$0xff]  ;;  %v521_v49 = vld [vmem:[%s11980_s12 + $0x59] sm:$0xff]  ;;  %v12140_v52 = vld [vmem:[%s15039_s1 + $0xb0] sm:$0xff] }
  0x24   : > { %10053 = vmatmul.mubr.msk.f32.vlgmr.msra.gmra.mrb[0].mxu0 %vm547_vm0, %v511_v23  ;;  %v522_v50 = vld [vmem:[%s11980_s12 + $0x61] sm:$0xff]  ;;  %v12135_v51 = vld [vmem:[%s15039_s1 + $0xb8] sm:$0xff]  ;;  %v523_v53 = vld [vmem:[%s11980_s12 + $0x69] sm:$0xff] }
  0x25   : > { %11063 = vmatpush3.bf16.msra.mxu0 %v11060_v20  ;;  %10055 = vmatprep.mubr.msk.f32.mxu0 %vm547_vm0, %v512_v24  ;;  %v524_v54 = vld [vmem:[%s11980_s12 + $0x71] sm:$0xff]  ;;  %v12151_v55 = vld [vmem:[%s15039_s1 + $0xc8] sm:$0xff]  ;;  %v12156_v56 = vld [vmem:[%s15039_s1 + $0xc0] sm:$0xff] }
  0x26   : > { %11065 = vmatprep.subr.bf16.mxu0 %v11064_v31  ;;  %v525_v57 = vld [vmem:[%s11980_s12 + $0x79] sm:$0xff]  ;;  %v526_v58 = vld [vmem:[%s11980_s12 + $0x81] sm:$0xff]  ;;  %v12172_v60 = vld [vmem:[%s15039_s1 + $0xd0] sm:$0xff] }
  0x27   : > { %361 = vperm.xlu1 %11753, %v12013_v18   ;;  %356 = vperm.xlu0 %11752, %v12018_v19   ;;  %v12167_v59 = vld [vmem:[%s15039_s1 + $0xd8] sm:$0xff]  ;;  %v527_v61 = vld [vmem:[%s11980_s12 + $0x89] sm:$0xff]  ;;  %v12188_v2 = vld [vmem:[%s15039_s1 + $0xe0] sm:$0xff] }
  0x28   : > { %10056 = vmatmul.mubr.msk.f32.gmra.mrb[2].mxu0 %vm547_vm0, %v513_v27  ;;  %v528_v62 = vld [vmem:[%s11980_s12 + $0x91] sm:$0xff]  ;;  %v12183_v63 = vld [vmem:[%s15039_s1 + $0xe8] sm:$0xff]  ;;  %v529_v7 = vld [vmem:[%s11980_s12 + $0x99] sm:$0xff] }
  0x29   : > { %10058 = vmatprep.mubr.msk.f32.mxu0 %vm547_vm0, %v514_v28  ;;  %11067 = vmatpush3.bf16.msra.mxu0 %v11064_v31  ;;  %v530_v10 = vld [vmem:[%s11980_s12 + $0xa1] sm:$0xff]  ;;  %v12199_v11 = vld [vmem:[%s15039_s1 + $0xf8] sm:$0xff]  ;;  %v12204_v12 = vld [vmem:[%s15039_s1 + $0xf0] sm:$0xff] }
  0x2a   : > { %11069 = vmatprep.subr.bf16.mxu0 %v12113_v46  ;;  %v531_v13 = vld [vmem:[%s11980_s12 + $0xa9] sm:$0xff]  ;;  %v532_v14 = vld [vmem:[%s11980_s12 + $0xb1] sm:$0xff]  ;;  %v12220_v16 = vld [vmem:[%s15039_s1 + $0x200] sm:$0xff] }
  0x2b   : > { %371 = vperm.xlu1 %11753, %v12026_v21   ;;  %366 = vperm.xlu0 %11752, %v12031_v22   ;;  %v12215_v15 = vld [vmem:[%s15039_s1 + $0x208] sm:$0xff]  ;;  %v533_v17 = vld [vmem:[%s11980_s12 + $0xb9] sm:$0xff]  ;;  %v12236_v24 = vld [vmem:[%s15039_s1 + $0x210] sm:$0xff] }
  0x2c   : > { %10059 = vmatmul.mubr.msk.f32.gmra.mrb[4].mxu0 %vm547_vm0, %v515_v34  ;;  %v534_v20 = vld [vmem:[%s11980_s12 + $0xc1] sm:$0xff]  ;;  %v12231_v23 = vld [vmem:[%s15039_s1 + $0x218] sm:$0xff]  ;;  %v535_v27 = vld [vmem:[%s11980_s12 + $0xc9] sm:$0xff] }
  0x2d   : > { %10061 = vmatprep.mubr.msk.f32.mxu0 %vm547_vm0, %v516_v35  ;;  %v536_v28 = vld [vmem:[%s11980_s12 + $0xd1] sm:$0xff]  ;;  %v12247_v29 = vld [vmem:[%s15039_s1 + $0x228] sm:$0xff]  ;;  %v12252_v30 = vld [vmem:[%s15039_s1 + $0x220] sm:$0xff] }
  0x2e   : > { %v537_v31 = vld [vmem:[%s11980_s12 + $0xd9] sm:$0xff]  ;;  %v538_v34 = vld [vmem:[%s11980_s12 + $0xe1] sm:$0xff] }
  0x2f   : > { %381 = vperm.xlu1 %11753, %v12040_v25   ;;  %376 = vperm.xlu0 %11752, %v12045_v26   ;;  %v8759_v35 = vld [vmem:[%s15039_s1 + $0x238] sm:$0xff]  ;;  %v8760_v44 = vld [vmem:[%s15039_s1 + $0x240] sm:$0xff] }
  0x30   : > { %10062 = vmatmul.mubr.msk.f32.gmra.mrb[6].mxu0 %vm547_vm0, %v517_v38  ;;  %v8758_v38 = vld [vmem:[%s15039_s1 + $0x230] sm:$0xff]  ;;  %v541_v45 = vld [vmem:[%s11980_s12 + $0xf9] sm:$0xff] }
  0x31   : > { %10064 = vmatprep.mubr.msk.f32.mxu0 %vm547_vm0, %v518_v39  ;;  %v539_v39 = vld [vmem:[%s11980_s12 + $0xe9] sm:$0xff] }
  0x33   : > { %391 = vperm.xlu1 %11753, %v12062_v32   ;;  %386 = vperm.xlu0 %11752, %v12067_v33  }
  0x34   : > { %10065 = vmatmul.mubr.msk.f32.gmra.mrb[8].mxu0 %vm547_vm0, %v519_v42  ;;  %v540_v42 = vld [vmem:[%s11980_s12 + $0xf1] sm:$0xff] }
  0x35   : > { %10067 = vmatprep.mubr.msk.f32.mxu0 %vm547_vm0, %v520_v43  ;;  %v8761_v43 = vld [vmem:[%s15039_s1 + $0x248] sm:$0xff] }
  0x37   : > { %401 = vperm.xlu1 %11753, %v12078_v36   ;;  %396 = vperm.xlu0 %11752, %v12083_v37  }
  0x38   : > { %10068 = vmatmul.mubr.msk.f32.gmra.mrb[10].mxu0 %vm547_vm0, %v521_v49  ;;  %v8763_v49 = vld [vmem:[%s15039_s1 + $0x258] sm:$0xff] }
  0x39   : > { %10070 = vmatprep.mubr.msk.f32.mxu0 %vm547_vm0, %v522_v50  ;;  %v8762_v50 = vld [vmem:[%s15039_s1 + $0x250] sm:$0xff] }
  0x3b   : > { %411 = vperm.xlu1 %11753, %v12094_v40   ;;  %406 = vperm.xlu0 %11752, %v12099_v41  }
  0x3c   : > { %10071 = vmatmul.mubr.msk.f32.gmra.mrb[12].mxu0 %vm547_vm0, %v523_v53  ;;  %v8765_v53 = vld [vmem:[%s15039_s1 + $0x268] sm:$0xff] }
  0x3d   : > { %10073 = vmatprep.mubr.msk.f32.mxu0 %vm547_vm0, %v524_v54  ;;  %v8764_v54 = vld [vmem:[%s15039_s1 + $0x260] sm:$0xff] }
  0x3f   : > { %421 = vperm.xlu1 %11753, %v12118_v47   ;;  %416 = vperm.xlu0 %11752, %v12123_v48  }
  0x40   : > { %10074 = vmatmul.mubr.msk.f32.gmra.mrb[14].mxu0 %vm547_vm0, %v525_v57  ;;  %v8767_v57 = vld [vmem:[%s15039_s1 + $0x278] sm:$0xff] }
  0x41   : > { %10076 = vmatprep.mubr.msk.f32.mxu0 %vm547_vm0, %v526_v58  ;;  %v8766_v58 = vld [vmem:[%s15039_s1 + $0x270] sm:$0xff] }
  0x43   : > { %431 = vperm.xlu1 %11753, %v12135_v51   ;;  %426 = vperm.xlu0 %11752, %v12140_v52  }
  0x44   : > { %10077 = vmatmul.mubr.msk.f32.gmra.mrb[16].mxu0 %vm547_vm0, %v527_v61  ;;  %v8769_v61 = vld [vmem:[%s15039_s1 + $0x288] sm:$0xff] }
  0x45   : > { %10079 = vmatprep.mubr.msk.f32.mxu0 %vm547_vm0, %v528_v62  ;;  %v8768_v62 = vld [vmem:[%s15039_s1 + $0x280] sm:$0xff] }
  0x47   : > { %441 = vperm.xlu1 %11753, %v12151_v55   ;;  %436 = vperm.xlu0 %11752, %v12156_v56  }
  0x48   : > { %10080 = vmatmul.mubr.msk.f32.gmra.mrb[18].mxu0 %vm547_vm0, %v529_v7  ;;  %v8771_v7 = vld [vmem:[%s15039_s1 + $0x298] sm:$0xff] }
  0x49   : > { %10082 = vmatprep.mubr.msk.f32.mxu0 %vm547_vm0, %v530_v10  ;;  %v8770_v10 = vld [vmem:[%s15039_s1 + $0x290] sm:$0xff] }
  0x4b   : > { %451 = vperm.xlu1 %11753, %v12167_v59   ;;  %446 = vperm.xlu0 %11752, %v12172_v60  }
  0x4c   : > { %10083 = vmatmul.mubr.msk.f32.gmra.mrb[20].mxu0 %vm547_vm0, %v531_v13  ;;  %v8773_v13 = vld [vmem:[%s15039_s1 + $0x2a8] sm:$0xff] }
  0x4d   : > { %10085 = vmatprep.mubr.msk.f32.mxu0 %vm547_vm0, %v532_v14  ;;  %v8772_v14 = vld [vmem:[%s15039_s1 + $0x2a0] sm:$0xff] }
  0x4f   : > { %461 = vperm.xlu1 %11753, %v12183_v63   ;;  %456 = vperm.xlu0 %11752, %v12188_v2  }
  0x50   : > { %10086 = vmatmul.mubr.msk.f32.gmra.mrb[22].mxu0 %vm547_vm0, %v533_v17  ;;  %v8775_v17 = vld [vmem:[%s15039_s1 + $0x2b8] sm:$0xff] }
  0x51   : > { %10088 = vmatprep.mubr.msk.f32.mxu0 %vm547_vm0, %v534_v20  ;;  %v8774_v20 = vld [vmem:[%s15039_s1 + $0x2b0] sm:$0xff] }
  0x53   : > { %471 = vperm.xlu1 %11753, %v12199_v11   ;;  %466 = vperm.xlu0 %11752, %v12204_v12  }
  0x54   : > { %10089 = vmatmul.mubr.msk.f32.gmra.mrb[24].mxu0 %vm547_vm0, %v535_v27  ;;  %v8777_v27 = vld [vmem:[%s15039_s1 + $0x2c8] sm:$0xff] }
  0x55   : > { %10091 = vmatprep.mubr.msk.f32.mxu0 %vm547_vm0, %v536_v28  ;;  %v8776_v28 = vld [vmem:[%s15039_s1 + $0x2c0] sm:$0xff] }
  0x57   : > { %1262 = vperm.xlu1 %11753, %v12215_v15   ;;  %1257 = vperm.xlu0 %11752, %v12220_v16  }
  0x58   : > { %10092 = vmatmul.mubr.msk.f32.gmra.mrb[26].mxu0 %vm547_vm0, %v537_v31  ;;  %v8779_v31 = vld [vmem:[%s15039_s1 + $0x2d8] sm:$0xff] }
  0x59   : > { %10094 = vmatprep.mubr.msk.f32.mxu0 %vm547_vm0, %v538_v34  ;;  %v8778_v34 = vld [vmem:[%s15039_s1 + $0x2d0] sm:$0xff] }
  0x5b   : > { %1272 = vperm.xlu1 %11753, %v12231_v23   ;;  %1267 = vperm.xlu0 %11752, %v12236_v24  }
  0x5c   : > { %10095 = vmatmul.mubr.msk.f32.gmra.mrb[28].mxu0 %vm547_vm0, %v539_v39  ;;  %v8783_v39 = vld [vmem:[%s15039_s1 + $0x2f8] sm:$0xff] }
  0x5d   : > { %10097 = vmatprep.mubr.msk.f32.mxu0 %vm547_vm0, %v540_v42  ;;  %v8782_v42 = vld [vmem:[%s15039_s1 + $0x2f0] sm:$0xff] }
  0x5f   : > { %1282 = vperm.xlu1 %11753, %v12247_v29   ;;  %1277 = vperm.xlu0 %11752, %v12252_v30  }
  0x60   : > { %10098 = vmatmul.mubr.msk.f32.gmra.mrb[30].mxu0 %vm547_vm0, %v541_v45 }
  0x63   : > { %1292 = vperm.xlu1 %11753, %v8759_v35   ;;  %1287 = vperm.xlu0 %11752, %v8758_v38   ;;  %v8781_v35 = vld [vmem:[%s15039_s1 + $0x2e8] sm:$0xff]  ;;  %v8780_v38 = vld [vmem:[%s15039_s1 + $0x2e0] sm:$0xff] }
  0x67   : > { %1302 = vperm.xlu1 %11753, %v8761_v43   ;;  %1297 = vperm.xlu0 %11752, %v8760_v44   ;;  %v15045_v43 = vmov 0.0   ;;  %v250_v44 = vld [vmem:[%s11980_s12] sm:$0xff] }
  0x68   : > { %4345 = vst.msk [vmem:[#allocation2 + $0x8] sm:$0xff] %vm547_vm0, %v15045_v43  ;;  %4344 = vst.msk [vmem:[#allocation2] sm:$0xff] %vm547_vm0, %v15045_v43 }
  0x69   : > { %4346 = vst.msk [vmem:[#allocation2 + $0x10] sm:$0xff] %vm547_vm0, %v15045_v43  ;;  %4347 = vst.msk [vmem:[#allocation2 + $0x18] sm:$0xff] %vm547_vm0, %v15045_v43 }
  0x6a   : > { %4348 = vst.msk [vmem:[#allocation2 + $0x20] sm:$0xff] %vm547_vm0, %v15045_v43  ;;  %4349 = vst.msk [vmem:[#allocation2 + $0x28] sm:$0xff] %vm547_vm0, %v15045_v43 }
  0x6b   : > { %1312 = vperm.xlu1 %11753, %v8763_v49   ;;  %1307 = vperm.xlu0 %11752, %v8762_v50   ;;  %4350 = vst.msk [vmem:[#allocation2 + $0x30] sm:$0xff] %vm547_vm0, %v15045_v43  ;;  %4351 = vst.msk [vmem:[#allocation2 + $0x38] sm:$0xff] %vm547_vm0, %v15045_v43 }
  0x6c   : > { %4352 = vst.msk [vmem:[#allocation2 + $0x40] sm:$0xff] %vm547_vm0, %v15045_v43  ;;  %4353 = vst.msk [vmem:[#allocation2 + $0x48] sm:$0xff] %vm547_vm0, %v15045_v43 }
  0x6d   : > { %4354 = vst.msk [vmem:[#allocation2 + $0x50] sm:$0xff] %vm547_vm0, %v15045_v43  ;;  %4355 = vst.msk [vmem:[#allocation2 + $0x58] sm:$0xff] %vm547_vm0, %v15045_v43 }
  0x6e   : > { %4356 = vst.msk [vmem:[#allocation2 + $0x60] sm:$0xff] %vm547_vm0, %v15045_v43  ;;  %4357 = vst.msk [vmem:[#allocation2 + $0x68] sm:$0xff] %vm547_vm0, %v15045_v43 }
  0x6f   : > { %1322 = vperm.xlu1 %11753, %v8765_v53   ;;  %1317 = vperm.xlu0 %11752, %v8764_v54   ;;  %4358 = vst.msk [vmem:[#allocation2 + $0x70] sm:$0xff] %vm547_vm0, %v15045_v43  ;;  %4359 = vst.msk [vmem:[#allocation2 + $0x78] sm:$0xff] %vm547_vm0, %v15045_v43  ;;  %v251_v53 = vld [vmem:[%s11980_s12 + $0x8] sm:$0xff]  ;;  %v12428_v54 = vld [vmem:[%s11980_s12 + $0x10] sm:$0xff] }
  0x70   : > { %4360 = vst.msk [vmem:[#allocation2 + $0x80] sm:$0xff] %vm547_vm0, %v15045_v43  ;;  %4361 = vst.msk [vmem:[#allocation2 + $0x88] sm:$0xff] %vm547_vm0, %v15045_v43 }
  0x71   : > { %4362 = vst.msk [vmem:[#allocation2 + $0x90] sm:$0xff] %vm547_vm0, %v15045_v43  ;;  %4363 = vst.msk [vmem:[#allocation2 + $0x98] sm:$0xff] %vm547_vm0, %v15045_v43 }
  0x72   : > { %4364 = vst.msk [vmem:[#allocation2 + $0xa0] sm:$0xff] %vm547_vm0, %v15045_v43  ;;  %4365 = vst.msk [vmem:[#allocation2 + $0xa8] sm:$0xff] %vm547_vm0, %v15045_v43 }
  0x73   : > { %1332 = vperm.xlu1 %11753, %v8767_v57   ;;  %1327 = vperm.xlu0 %11752, %v8766_v58   ;;  %4366 = vst.msk [vmem:[#allocation2 + $0xb0] sm:$0xff] %vm547_vm0, %v15045_v43  ;;  %4367 = vst.msk [vmem:[#allocation2 + $0xb8] sm:$0xff] %vm547_vm0, %v15045_v43  ;;  %v8786_v57 = vld [vmem:[%s15040_s2 + $0x50] sm:$0xff]  ;;  %v8787_v58 = vld [vmem:[%s15040_s2 + $0x58] sm:$0xff] }
  0x74   : > { %4368 = vst.msk [vmem:[#allocation2 + $0xc0] sm:$0xff] %vm547_vm0, %v15045_v43  ;;  %4369 = vst.msk [vmem:[#allocation2 + $0xc8] sm:$0xff] %vm547_vm0, %v15045_v43 }
  0x75   : > { %4370 = vst.msk [vmem:[#allocation2 + $0xd0] sm:$0xff] %vm547_vm0, %v15045_v43  ;;  %4371 = vst.msk [vmem:[#allocation2 + $0xd8] sm:$0xff] %vm547_vm0, %v15045_v43 }
  0x76   : > { %4372 = vst.msk [vmem:[#allocation2 + $0xe0] sm:$0xff] %vm547_vm0, %v15045_v43  ;;  %4373 = vst.msk [vmem:[#allocation2 + $0xe8] sm:$0xff] %vm547_vm0, %v15045_v43 }
  0x77   : > { %1342 = vperm.xlu1 %11753, %v8769_v61   ;;  %1337 = vperm.xlu0 %11752, %v8768_v62   ;;  %4374 = vst.msk [vmem:[#allocation2 + $0xf0] sm:$0xff] %vm547_vm0, %v15045_v43  ;;  %4375 = vst.msk [vmem:[#allocation2 + $0xf8] sm:$0xff] %vm547_vm0, %v15045_v43 }
  0x78   : > { %4376 = vst.msk [vmem:[#allocation2 + $0x100] sm:$0xff] %vm547_vm0, %v15045_v43  ;;  %4377 = vst.msk [vmem:[#allocation2 + $0x108] sm:$0xff] %vm547_vm0, %v15045_v43 }
  0x79   : > { %4378 = vst.msk [vmem:[#allocation2 + $0x110] sm:$0xff] %vm547_vm0, %v15045_v43  ;;  %4379 = vst.msk [vmem:[#allocation2 + $0x118] sm:$0xff] %vm547_vm0, %v15045_v43 }
  0x7b   : > { %1352 = vperm.xlu1 %11753, %v8771_v7   ;;  %1347 = vperm.xlu0 %11752, %v8770_v10   ;;  %v12446_v7 = vld [vmem:[%s11980_s12 + $0x18] sm:$0xff]  ;;  %v11072_v10 = vpack.c.bf16 %v8787_v58, %v8786_v57 }
  0x7f   : > { %1362 = vperm.xlu1 %11753, %v8773_v13   ;;  %1357 = vperm.xlu0 %11752, %v8772_v14   ;;  %v8820_v13 = vld [vmem:[%s15040_s2 + $0x60] sm:$0xff]  ;;  %v8821_v14 = vld [vmem:[%s15040_s2 + $0x68] sm:$0xff] }
  0x83   : > { %1372 = vperm.xlu1 %11753, %v8775_v17   ;;  %1367 = vperm.xlu0 %11752, %v8774_v20   ;;  %v12457_v17 = vld [vmem:[%s11980_s12 + $0x20] sm:$0xff] }
  0x87   : > { %1382 = vperm.xlu1 %11753, %v8777_v27   ;;  %1377 = vperm.xlu0 %11752, %v8776_v28   ;;  %v12475_v28 = vld [vmem:[%s11980_s12 + $0x30] sm:$0xff] }
  0x8b   : > { %1392 = vperm.xlu1 %11753, %v8779_v31   ;;  %1387 = vperm.xlu0 %11752, %v8778_v34   ;;  %v12478_v31 = vld [vmem:[%s11980_s12 + $0x28] sm:$0xff] }
  0x8f   : > { %1402 = vperm.xlu1 %11753, %v8781_v35   ;;  %1397 = vperm.xlu0 %11752, %v8780_v38   ;;  %v12494_v38 = vld [vmem:[%s11980_s12 + $0x38] sm:$0xff] }
  0x93   : > { %1412 = vperm.xlu1 %11753, %v8783_v39   ;;  %1407 = vperm.xlu0 %11752, %v8782_v42   ;;  %v12497_v39 = vld [vmem:[%s11980_s12 + $0x40] sm:$0xff] }
  0x96   : > { %v12419_v45 = vpop.permute.xlu1 %326  ;;  %v12421_v49 = vpop.permute.xlu0 %316 }
  0x97   : > { %v474_v50 = vmul.f32 %v12421_v49, %v250_v44  ;;  %4517 = vperm.xlu1 %11753, %v11958_v4   ;;  %4512 = vperm.xlu0 %11752, %v11944_v1   ;;  %v476_v61 = vmul.f32 %v12419_v45, %v12428_v54 }
  0x99   : > { %10108 = vmatprep.mubr.msk.f32.mxu0 %vm547_vm0, %v474_v50  ;;  %v12512_v50 = vld [vmem:[%s11980_s12 + $0x48] sm:$0xff] }
  0x9a   : > { %v12439_v4 = vpop.permute.xlu1 %331  ;;  %v12441_v1 = vpop.permute.xlu0 %321 }
  0x9b   : > { %v475_v62 = vmul.f32 %v12441_v1, %v251_v53  ;;  %4527 = vperm.xlu1 %11753, %v11953_v3   ;;  %4522 = vperm.xlu0 %11752, %v11939_v0   ;;  %v477_v20 = vmul.f32 %v12439_v4, %v12446_v7  ;;  %v12515_v53 = vld [vmem:[%s11980_s12 + $0x50] sm:$0xff] }
  0x9d   : > { %10109 = vmatmul.mubr.msk.f32.vlgmr.msra.gmra.mrb[0].mxu0 %vm547_vm0, %v475_v62  ;;  %v12533_v62 = vld [vmem:[%s11980_s12 + $0x60] sm:$0xff] }
  0x9e   : > { %11071 = vmatpush3.bf16.msra.mxu0 %v12113_v46  ;;  %v12460_v3 = vpop.permute.xlu1 %341  ;;  %v12462_v0 = vpop.permute.xlu0 %336  ;;  %10111 = vmatprep.mubr.msk.f32.mxu0 %vm547_vm0, %v476_v61  ;;  %v12471_v46 = vpack.c.bf16 %v8821_v14, %v8820_v13 }
  0x9f   : > { %v478_v27 = vmul.f32 %v12457_v17, %v12462_v0  ;;  %4537 = vperm.xlu1 %11753, %v11965_v5   ;;  %4532 = vperm.xlu0 %11752, %v11970_v6   ;;  %v479_v5 = vmul.f32 %v12478_v31, %v12460_v3 }
  0xa0   : > { %11073 = vmatprep.subr.bf16.mxu0 %v11072_v10 }
  0xa1   : > { %10112 = vmatmul.mubr.msk.f32.gmra.mrb[2].mxu0 %vm547_vm0, %v477_v20  ;;  %v12551_v20 = vld [vmem:[%s11980_s12 + $0x70] sm:$0xff] }
  0xa2   : > { %v12480_v34 = vpop.permute.xlu1 %351  ;;  %v12482_v35 = vpop.permute.xlu0 %346  ;;  %10114 = vmatprep.mubr.msk.f32.mxu0 %vm547_vm0, %v478_v27  ;;  %11075 = vmatpush3.bf16.msra.mxu0 %v11072_v10 }
  0xa3   : > { %v480_v6 = vmul.f32 %v12475_v28, %v12482_v35  ;;  %4547 = vperm.xlu1 %11753, %v11985_v8   ;;  %4542 = vperm.xlu0 %11752, %v11990_v9   ;;  %v481_v8 = vmul.f32 %v12494_v38, %v12480_v34 }
  0xa4   : > { %11077 = vmatprep.subr.bf16.mxu0 %v12471_v46 }
  0xa5   : > { %10115 = vmatmul.mubr.msk.f32.gmra.mrb[4].mxu0 %vm547_vm0, %v479_v5 }
  0xa6   : > { %v12499_v42 = vpop.permute.xlu1 %361  ;;  %v12501_v44 = vpop.permute.xlu0 %356  ;;  %10117 = vmatprep.mubr.msk.f32.mxu0 %vm547_vm0, %v480_v6 }
  0xa7   : > { %v482_v9 = vmul.f32 %v12497_v39, %v12501_v44  ;;  %4557 = vperm.xlu1 %11753, %v12013_v18   ;;  %4552 = vperm.xlu0 %11752, %v12018_v19   ;;  %v483_v61 = vmul.f32 %v12512_v50, %v12499_v42  ;;  %v12530_v19 = vld [vmem:[%s11980_s12 + $0x58] sm:$0xff] }
  0xa9   : > { %10118 = vmatmul.mubr.msk.f32.gmra.mrb[6].mxu0 %vm547_vm0, %v481_v8  ;;  %v12569_v8 = vld [vmem:[%s11980_s12 + $0x80] sm:$0xff] }
  0xaa   : > { %v12517_v57 = vpop.permute.xlu1 %371  ;;  %v12519_v58 = vpop.permute.xlu0 %366  ;;  %10120 = vmatprep.mubr.msk.f32.mxu0 %vm547_vm0, %v482_v9 }
  0xab   : > { %v484_v18 = vmul.f32 %v12515_v53, %v12519_v58  ;;  %4567 = vperm.xlu1 %11753, %v12026_v21   ;;  %4562 = vperm.xlu0 %11752, %v12031_v22   ;;  %v485_v14 = vmul.f32 %v12530_v19, %v12517_v57  ;;  %v12548_v22 = vld [vmem:[%s11980_s12 + $0x68] sm:$0xff] }
  0xad   : > { %10121 = vmatmul.mubr.msk.f32.gmra.mrb[8].mxu0 %vm547_vm0, %v483_v61 }
  0xae   : > { %v12535_v10 = vpop.permute.xlu1 %381  ;;  %v12537_v13 = vpop.permute.xlu0 %376  ;;  %10123 = vmatprep.mubr.msk.f32.mxu0 %vm547_vm0, %v484_v18 }
  0xaf   : > { %v486_v21 = vmul.f32 %v12533_v62, %v12537_v13  ;;  %4577 = vperm.xlu1 %11753, %v12040_v25   ;;  %4572 = vperm.xlu0 %11752, %v12045_v26   ;;  %v487_v6 = vmul.f32 %v12548_v22, %v12535_v10  ;;  %v12566_v26 = vld [vmem:[%s11980_s12 + $0x78] sm:$0xff] }
  0xb1   : > { %10124 = vmatmul.mubr.msk.f32.gmra.mrb[10].mxu0 %vm547_vm0, %v485_v14  ;;  %v12587_v14 = vld [vmem:[%s11980_s12 + $0x90] sm:$0xff] }
  0xb2   : > { %v12553_v27 = vpop.permute.xlu1 %391  ;;  %v12555_v5 = vpop.permute.xlu0 %386  ;;  %10126 = vmatprep.mubr.msk.f32.mxu0 %vm547_vm0, %v486_v21 }
  0xb3   : > { %v488_v25 = vmul.f32 %v12551_v20, %v12555_v5  ;;  %4587 = vperm.xlu1 %11753, %v12062_v32   ;;  %4582 = vperm.xlu0 %11752, %v12067_v33   ;;  %v489_v18 = vmul.f32 %v12566_v26, %v12553_v27  ;;  %v12584_v33 = vld [vmem:[%s11980_s12 + $0x88] sm:$0xff] }
  0xb5   : > { %10127 = vmatmul.mubr.msk.f32.gmra.mrb[12].mxu0 %vm547_vm0, %v487_v6 }
  0xb6   : > { %v12571_v9 = vpop.permute.xlu1 %401  ;;  %v12573_v61 = vpop.permute.xlu0 %396  ;;  %10129 = vmatprep.mubr.msk.f32.mxu0 %vm547_vm0, %v488_v25 }
  0xb7   : > { %15266 = vst [vmem:[#allocation6_spill] sm:$0xff] %v12571_v9  ;;  %v490_v32 = vmul.f32 %v12569_v8, %v12573_v61  ;;  %4597 = vperm.xlu1 %11753, %v12078_v36   ;;  %4592 = vperm.xlu0 %11752, %v12083_v37   ;;  %v491_v25 = vmul.f32 %v12584_v33, %v12571_v9  ;;  %v12602_v37 = vld [vmem:[%s11980_s12 + $0x98] sm:$0xff] }
  0xb9   : > { %10130 = vmatmul.mubr.msk.f32.gmra.mrb[14].mxu0 %vm547_vm0, %v489_v18  ;;  %v12605_v18 = vld [vmem:[%s11980_s12 + $0xa0] sm:$0xff] }
  0xba   : > { %v12589_v21 = vpop.permute.xlu1 %411  ;;  %v12591_v6 = vpop.permute.xlu0 %406  ;;  %10132 = vmatprep.mubr.msk.f32.mxu0 %vm547_vm0, %v490_v32 }
  0xbb   : > { %15267 = vst [vmem:[#allocation7_spill] sm:$0xff] %v12589_v21  ;;  %15268 = vst [vmem:[#allocation8_spill] sm:$0xff] %v12591_v6  ;;  %v492_v36 = vmul.f32 %v12587_v14, %v12591_v6  ;;  %4607 = vperm.xlu1 %11753, %v12094_v40   ;;  %4602 = vperm.xlu0 %11752, %v12099_v41   ;;  %v493_v6 = vmul.f32 %v12602_v37, %v12589_v21  ;;  %v12620_v41 = vld [vmem:[%s11980_s12 + $0xa8] sm:$0xff] }
  0xbd   : > { %10133 = vmatmul.mubr.msk.f32.gmra.mrb[16].mxu0 %vm547_vm0, %v491_v25  ;;  %v12623_v25 = vld [vmem:[%s11980_s12 + $0xb0] sm:$0xff] }
  0xbe   : > { %v12607_v43 = vpop.permute.xlu1 %421  ;;  %v12609_v32 = vpop.permute.xlu0 %416  ;;  %10135 = vmatprep.mubr.msk.f32.mxu0 %vm547_vm0, %v492_v36 }
  0xbf   : > { %15269 = vst [vmem:[#allocation9_spill] sm:$0xff] %v12607_v43  ;;  %15270 = vst [vmem:[#allocation10_spill] sm:$0xff] %v12609_v32  ;;  %v494_v40 = vmul.f32 %v12605_v18, %v12609_v32  ;;  %4617 = vperm.xlu1 %11753, %v12118_v47   ;;  %4612 = vperm.xlu0 %11752, %v12123_v48   ;;  %v495_v32 = vmul.f32 %v12620_v41, %v12607_v43  ;;  %v12638_v48 = vld [vmem:[%s11980_s12 + $0xb8] sm:$0xff] }
  0xc0   : > { %15273 = vst [vmem:[#allocation13_spill] sm:$0xff] %v12638_v48 }
  0xc1   : > { %10136 = vmatmul.mubr.msk.f32.gmra.mrb[18].mxu0 %vm547_vm0, %v493_v6  ;;  %v12641_v6 = vld [vmem:[%s11980_s12 + $0xc0] sm:$0xff] }
  0xc2   : > { %v12625_v9 = vpop.permute.xlu1 %431  ;;  %v12627_v36 = vpop.permute.xlu0 %426  ;;  %10138 = vmatprep.mubr.msk.f32.mxu0 %vm547_vm0, %v494_v40  ;;  %15274 = vst [vmem:[#allocation14_spill] sm:$0xff] %v12641_v6 }
  0xc3   : > { %15271 = vst [vmem:[#allocation11_spill] sm:$0xff] %v12625_v9  ;;  %15272 = vst [vmem:[#allocation12_spill] sm:$0xff] %v12627_v36  ;;  %v496_v47 = vmul.f32 %v12623_v25, %v12627_v36  ;;  %4627 = vperm.xlu1 %11753, %v12135_v51   ;;  %4622 = vperm.xlu0 %11752, %v12140_v52   ;;  %v497_v36 = vmul.f32 %v12638_v48, %v12625_v9  ;;  %v12656_v52 = vld [vmem:[%s11980_s12 + $0xc8] sm:$0xff] }
  0xc4   : > { %15277 = vst [vmem:[#allocation17_spill] sm:$0xff] %v12656_v52 }
  0xc5   : > { %10139 = vmatmul.mubr.msk.f32.gmra.mrb[20].mxu0 %vm547_vm0, %v495_v32  ;;  %v12659_v32 = vld [vmem:[%s11980_s12 + $0xd0] sm:$0xff] }
  0xc6   : > { %v12643_v21 = vpop.permute.xlu1 %441  ;;  %v12645_v40 = vpop.permute.xlu0 %436  ;;  %10141 = vmatprep.mubr.msk.f32.mxu0 %vm547_vm0, %v496_v47  ;;  %15278 = vst [vmem:[#allocation18_spill] sm:$0xff] %v12659_v32 }
  0xc7   : > { %15275 = vst [vmem:[#allocation15_spill] sm:$0xff] %v12643_v21  ;;  %15276 = vst [vmem:[#allocation16_spill] sm:$0xff] %v12645_v40  ;;  %v498_v51 = vmul.f32 %v12641_v6, %v12645_v40  ;;  %4637 = vperm.xlu1 %11753, %v12151_v55   ;;  %4632 = vperm.xlu0 %11752, %v12156_v56   ;;  %v499_v40 = vmul.f32 %v12656_v52, %v12643_v21  ;;  %v12674_v56 = vld [vmem:[%s11980_s12 + $0xd8] sm:$0xff] }
  0xc8   : > { %15281 = vst [vmem:[#allocation21_spill] sm:$0xff] %v12674_v56  ;;  %v12717_v21 = vld [vmem:[%s11980_s12 + $0xf8] sm:$0xff] }
  0xc9   : > { %10142 = vmatmul.mubr.msk.f32.gmra.mrb[22].mxu0 %vm547_vm0, %v497_v36  ;;  %v12677_v36 = vld [vmem:[%s11980_s12 + $0xe0] sm:$0xff]  ;;  %15289 = vst [vmem:[#allocation29_spill] sm:$0xff] %v12717_v21 }
  0xca   : > { %v12661_v43 = vpop.permute.xlu1 %451  ;;  %v12663_v47 = vpop.permute.xlu0 %446  ;;  %10144 = vmatprep.mubr.msk.f32.mxu0 %vm547_vm0, %v498_v51  ;;  %15282 = vst [vmem:[#allocation22_spill] sm:$0xff] %v12677_v36  ;;  %v3854_v6 = vld [vmem:[%s11980_s12 + $0x3a] sm:$0xff] }
  0xcb   : > { %15279 = vst [vmem:[#allocation19_spill] sm:$0xff] %v12661_v43  ;;  %15280 = vst [vmem:[#allocation20_spill] sm:$0xff] %v12663_v47  ;;  %v500_v55 = vmul.f32 %v12659_v32, %v12663_v47  ;;  %4647 = vperm.xlu1 %11753, %v12167_v59   ;;  %4642 = vperm.xlu0 %11752, %v12172_v60   ;;  %v501_v47 = vmul.f32 %v12674_v56, %v12661_v43  ;;  %v12692_v60 = vld [vmem:[%s11980_s12 + $0xe8] sm:$0xff]  ;;  %v2617_v56 = vld [vmem:[%s11980_s12 + $0x12] sm:$0xff] }
  0xcc   : > { %15285 = vst [vmem:[#allocation25_spill] sm:$0xff] %v12692_v60 }
  0xcd   : > { %10145 = vmatmul.mubr.msk.f32.gmra.mrb[24].mxu0 %vm547_vm0, %v499_v40  ;;  %v12695_v40 = vld [vmem:[%s11980_s12 + $0xf0] sm:$0xff] }
  0xce   : > { %v12679_v9 = vpop.permute.xlu1 %461  ;;  %v12681_v51 = vpop.permute.xlu0 %456  ;;  %10147 = vmatprep.mubr.msk.f32.mxu0 %vm547_vm0, %v500_v55  ;;  %15286 = vst [vmem:[#allocation26_spill] sm:$0xff] %v12695_v40 }
  0xcf   : > { %15283 = vst [vmem:[#allocation23_spill] sm:$0xff] %v12679_v9  ;;  %15284 = vst [vmem:[#allocation24_spill] sm:$0xff] %v12681_v51  ;;  %v502_v59 = vmul.f32 %v12677_v36, %v12681_v51  ;;  %4657 = vperm.xlu1 %11753, %v12183_v63   ;;  %4652 = vperm.xlu0 %11752, %v12188_v2   ;;  %v503_v63 = vmul.f32 %v12692_v60, %v12679_v9  ;;  %v12710_v51 = vld [vmem:[%s11980_s12 + $0x2a] sm:$0xff]  ;;  %v1190_v36 = vld [vmem:[%s11980_s12 + $0x2] sm:$0xff] }
  0xd1   : > { %10148 = vmatmul.mubr.msk.f32.gmra.mrb[26].mxu0 %vm547_vm0, %v501_v47  ;;  %v2618_v47 = vld [vmem:[%s11980_s12 + $0x1a] sm:$0xff] }
  0xd2   : > { %v12697_v55 = vpop.permute.xlu1 %471  ;;  %v12699_v43 = vpop.permute.xlu0 %466  ;;  %10150 = vmatprep.mubr.msk.f32.mxu0 %vm547_vm0, %v502_v59  ;;  %v3851_v59 = vld [vmem:[%s11980_s12 + $0x22] sm:$0xff] }
  0xd3   : > { %15287 = vst [vmem:[#allocation27_spill] sm:$0xff] %v12697_v55  ;;  %15288 = vst [vmem:[#allocation28_spill] sm:$0xff] %v12699_v43  ;;  %v504_v2 = vmul.f32 %v12695_v40, %v12699_v43  ;;  %4667 = vperm.xlu1 %11753, %v12199_v11   ;;  %4662 = vperm.xlu0 %11752, %v12204_v12   ;;  %v505_v11 = vmul.f32 %v12717_v21, %v12697_v55  ;;  %v3856_v21 = vld [vmem:[%s11980_s12 + $0x4a] sm:$0xff] }
  0xd5   : > { %10151 = vmatmul.mubr.msk.f32.gmra.mrb[28].mxu0 %vm547_vm0, %v503_v63  ;;  %v1191_v63 = vld [vmem:[%s11980_s12 + $0xa] sm:$0xff] }
  0xd6   : > { %v1263_v9 = vpop.permute.xlu1 %1262  ;;  %v1258_v60 = vpop.permute.xlu0 %1257  ;;  %10153 = vmatprep.mubr.msk.f32.mxu0 %vm547_vm0, %v504_v2  ;;  %v3853_v2 = vld [vmem:[%s11980_s12 + $0x32] sm:$0xff] }
  0xd7   : > { %v12722_v12 = vmul.f32 %v2618_v47, %v1263_v9  ;;  %v12725_v43 = vmul.f32 %v12710_v51, %v1263_v9  ;;  %v1415_v40 = vmul.f32 %v1258_v60, %v1190_v36  ;;  %5456 = vperm.xlu1 %11753, %v12215_v15   ;;  %v12729_v32 = vmul.f32 %v2617_v56, %v1258_v60  ;;  %v8823_v15 = vld [vmem:[%s15040_s2 + $0x78] sm:$0xff] }
  0xd8   : > { %v12731_v52 = vmul.f32 %v3851_v59, %v1258_v60  ;;  %5451 = vperm.xlu0 %11752, %v12220_v16   ;;  %v1416_v60 = vmul.f32 %v1263_v9, %v1191_v63  ;;  %v3855_v9 = vld [vmem:[%s11980_s12 + $0x42] sm:$0xff] }
  0xd9   : > { %15290 = vst [vmem:[#allocation30_spill] sm:$0xff] %v12722_v12  ;;  %15291 = vst [vmem:[#allocation31_spill] sm:$0xff] %v12725_v43  ;;  %10154 = vmatmul.mubr.msk.f32.gmra.mrb[30].mxu0 %vm547_vm0, %v505_v11  ;;  %v8822_v12 = vld [vmem:[%s15040_s2 + $0x70] sm:$0xff] }
  0xda   : > { %15292 = vst [vmem:[#allocation32_spill] sm:$0xff] %v12729_v32  ;;  %15293 = vst [vmem:[#allocation33_spill] sm:$0xff] %v12731_v52  ;;  %v1273_v36 = vpop.permute.xlu1 %1272  ;;  %v1268_v43 = vpop.permute.xlu0 %1267  ;;  %10164 = vmatprep.mubr.msk.f32.mxu0 %vm547_vm0, %v1415_v40  ;;  %v11080_v48 = vpack.c.bf16 %v8823_v15, %v8822_v12  ;;  %v8856_v40 = vld [vmem:[%s15040_s2 + $0x80] sm:$0xff] }
  0xdb   : > { %v12745_v16 = vmul.f32 %v12710_v51, %v1273_v36  ;;  %v12747_v52 = vmul.f32 %v3854_v6, %v1273_v36  ;;  %v1417_v11 = vmul.f32 %v2617_v56, %v1268_v43  ;;  %5466 = vperm.xlu1 %11753, %v12231_v23   ;;  %v12750_v32 = vmul.f32 %v3851_v59, %v1268_v43  ;;  %v8857_v23 = vld [vmem:[%s15040_s2 + $0x88] sm:$0xff] }
  0xdc   : > { %v12752_v55 = vmul.f32 %v3853_v2, %v1268_v43  ;;  %5461 = vperm.xlu0 %11752, %v12236_v24   ;;  %v1418_v24 = vmul.f32 %v2618_v47, %v1273_v36  ;;  %v12780_v47 = vpack.c.bf16 %v8857_v23, %v8856_v40 }
  0xdd   : > { %15294 = vst [vmem:[#allocation34_spill] sm:$0xff] %v12747_v52  ;;  %10165 = vmatmul.mubr.msk.f32.vlgmr.msra.gmra.mrb[0].mxu0 %vm547_vm0, %v1416_v60 }
  0xde   : > { %15295 = vst [vmem:[#allocation35_spill] sm:$0xff] %v12752_v55  ;;  %11079 = vmatpush3.bf16.msra.mxu0 %v12471_v46  ;;  %v1283_v43 = vpop.permute.xlu1 %1282  ;;  %v1278_v56 = vpop.permute.xlu0 %1277  ;;  %10167 = vmatprep.mubr.msk.f32.mxu0 %vm547_vm0, %v1417_v11  ;;  %v3858_v46 = vld [vmem:[%s11980_s12 + $0x5a] sm:$0xff] }
  0xdf   : > { %v12766_v12 = vmul.f32 %v3854_v6, %v1283_v43  ;;  %v12768_v63 = vmul.f32 %v3856_v21, %v1283_v43  ;;  %v1419_v15 = vmul.f32 %v3851_v59, %v1278_v56  ;;  %5476 = vperm.xlu1 %11753, %v12247_v29   ;;  %v12771_v60 = vmul.f32 %v3853_v2, %v1278_v56  ;;  %v9112_v55 = vld [vmem:[%s15039_s1 + $0x238] sm:$0xff]  ;;  %v9111_v29 = vld [vmem:[%s15039_s1 + $0x230] sm:$0xff] }
  0xe0   : > { %v12773_v52 = vmul.f32 %v3855_v9, %v1278_v56  ;;  %5471 = vperm.xlu0 %11752, %v12252_v30   ;;  %11081 = vmatprep.subr.bf16.mxu0 %v11080_v48  ;;  %v3857_v59 = vld [vmem:[%s11980_s12 + $0x52] sm:$0xff]  ;;  %v1420_v30 = vmul.f32 %v12710_v51, %v1283_v43  ;;  %v9113_v51 = vld [vmem:[%s15039_s1 + $0x240] sm:$0xff] }
  0xe1   : > { %15296 = vst [vmem:[#allocation36_spill] sm:$0xff] %v12766_v12  ;;  %15297 = vst [vmem:[#allocation37_spill] sm:$0xff] %v12768_v63  ;;  %10168 = vmatmul.mubr.msk.f32.gmra.mrb[2].mxu0 %vm547_vm0, %v1418_v24  ;;  %v9114_v12 = vld [vmem:[%s15039_s1 + $0x248] sm:$0xff] }
  0xe2   : > { %15298 = vst [vmem:[#allocation38_spill] sm:$0xff] %v12773_v52  ;;  %v1293_v36 = vpop.permute.xlu1 %1292  ;;  %v1288_v11 = vpop.permute.xlu0 %1287  ;;  %10170 = vmatprep.mubr.msk.f32.mxu0 %vm547_vm0, %v1419_v15  ;;  %11083 = vmatpush3.bf16.msra.mxu0 %v11080_v48  ;;  %v3860_v52 = vld [vmem:[%s11980_s12 + $0x6a] sm:$0xff]  ;;  %v3859_v48 = vld [vmem:[%s11980_s12 + $0x62] sm:$0xff] }
  0xe3   : > { %v12789_v56 = vmul.f32 %v3856_v21, %v1293_v36  ;;  %v12791_v40 = vmul.f32 %v3858_v46, %v1293_v36  ;;  %v1421_v23 = vmul.f32 %v3853_v2, %v1288_v11  ;;  %5486 = vperm.xlu1 %11753, %v9112_v55   ;;  %v12793_v24 = vmul.f32 %v3855_v9, %v1288_v11 }
  0xe4   : > { %v12795_v63 = vmul.f32 %v3857_v59, %v1288_v11  ;;  %5481 = vperm.xlu0 %11752, %v9111_v29   ;;  %11085 = vmatprep.subr.bf16.mxu0 %v12780_v47  ;;  %v1422_v43 = vmul.f32 %v3854_v6, %v1293_v36  ;;  %v3861_v6 = vld [vmem:[%s11980_s12 + $0x72] sm:$0xff] }
  0xe5   : > { %15299 = vst [vmem:[#allocation39_spill] sm:$0xff] %v12789_v56  ;;  %15300 = vst [vmem:[#allocation40_spill] sm:$0xff] %v12791_v40  ;;  %10171 = vmatmul.mubr.msk.f32.gmra.mrb[4].mxu0 %vm547_vm0, %v1420_v30  ;;  %v9116_v56 = vld [vmem:[%s15039_s1 + $0x258] sm:$0xff] }
  0xe6   : > { %15301 = vst [vmem:[#allocation41_spill] sm:$0xff] %v12795_v63  ;;  %v1303_v55 = vpop.permute.xlu1 %1302  ;;  %v1298_v2 = vpop.permute.xlu0 %1297  ;;  %10173 = vmatprep.mubr.msk.f32.mxu0 %vm547_vm0, %v1421_v23  ;;  %v3862_v63 = vld [vmem:[%s11980_s12 + $0x7a] sm:$0xff] }
  0xe7   : > { %v12808_v15 = vmul.f32 %v3858_v46, %v1303_v55  ;;  %v12810_v29 = vmul.f32 %v3860_v52, %v1303_v55  ;;  %v1423_v11 = vmul.f32 %v3855_v9, %v1298_v2  ;;  %5496 = vperm.xlu1 %11753, %v9114_v12   ;;  %v12812_v40 = vmul.f32 %v3857_v59, %v1298_v2  ;;  %v9115_v9 = vld [vmem:[%s15039_s1 + $0x250] sm:$0xff] }
  0xe8   : > { %v12814_v30 = vmul.f32 %v3859_v48, %v1298_v2  ;;  %5491 = vperm.xlu0 %11752, %v9113_v51   ;;  %v1424_v23 = vmul.f32 %v3856_v21, %v1303_v55  ;;  %v3863_v21 = vld [vmem:[%s11980_s12 + $0x82] sm:$0xff] }
  0xe9   : > { %15302 = vst [vmem:[#allocation42_spill] sm:$0xff] %v12808_v15  ;;  %15303 = vst [vmem:[#allocation43_spill] sm:$0xff] %v12810_v29  ;;  %10174 = vmatmul.mubr.msk.f32.gmra.mrb[6].mxu0 %vm547_vm0, %v1422_v43  ;;  %v3864_v15 = vld [vmem:[%s11980_s12 + $0x8a] sm:$0xff] }
  0xea   : > { %15304 = vst [vmem:[#allocation44_spill] sm:$0xff] %v12812_v40  ;;  %15305 = vst [vmem:[#allocation45_spill] sm:$0xff] %v12814_v30  ;;  %v1313_v12 = vpop.permute.xlu1 %1312  ;;  %v1308_v36 = vpop.permute.xlu0 %1307  ;;  %10176 = vmatprep.mubr.msk.f32.mxu0 %vm547_vm0, %v1423_v11  ;;  %v9118_v40 = vld [vmem:[%s15039_s1 + $0x268] sm:$0xff] }
  0xeb   : > { %v12826_v51 = vmul.f32 %v3860_v52, %v1313_v12  ;;  %v12828_v2 = vmul.f32 %v3862_v63, %v1313_v12  ;;  %v1425_v29 = vmul.f32 %v3857_v59, %v1308_v36  ;;  %5506 = vperm.xlu1 %11753, %v9116_v56   ;;  %v12830_v30 = vmul.f32 %v3859_v48, %v1308_v36  ;;  %v9117_v59 = vld [vmem:[%s15039_s1 + $0x260] sm:$0xff] }
  0xec   : > { %v12832_v43 = vmul.f32 %v3861_v6, %v1308_v36  ;;  %5501 = vperm.xlu0 %11752, %v9115_v9   ;;  %v1426_v11 = vmul.f32 %v3858_v46, %v1313_v12  ;;  %v3865_v46 = vld [vmem:[%s11980_s12 + $0x92] sm:$0xff] }
  0xed   : > { %15306 = vst [vmem:[#allocation46_spill] sm:$0xff] %v12826_v51  ;;  %15307 = vst [vmem:[#allocation47_spill] sm:$0xff] %v12828_v2  ;;  %10177 = vmatmul.mubr.msk.f32.gmra.mrb[8].mxu0 %vm547_vm0, %v1424_v23  ;;  %v3866_v51 = vld [vmem:[%s11980_s12 + $0x9a] sm:$0xff] }
  0xee   : > { %15308 = vst [vmem:[#allocation48_spill] sm:$0xff] %v12830_v30  ;;  %15309 = vst [vmem:[#allocation49_spill] sm:$0xff] %v12832_v43  ;;  %v1323_v56 = vpop.permute.xlu1 %1322  ;;  %v1318_v55 = vpop.permute.xlu0 %1317  ;;  %10179 = vmatprep.mubr.msk.f32.mxu0 %vm547_vm0, %v1425_v29  ;;  %v9120_v30 = vld [vmem:[%s15039_s1 + $0x278] sm:$0xff] }
  0xef   : > { %v12844_v9 = vmul.f32 %v3862_v63, %v1323_v56  ;;  %v12846_v36 = vmul.f32 %v3864_v15, %v1323_v56  ;;  %v1427_v2 = vmul.f32 %v3859_v48, %v1318_v55  ;;  %5516 = vperm.xlu1 %11753, %v9118_v40   ;;  %v12848_v43 = vmul.f32 %v3861_v6, %v1318_v55  ;;  %v9119_v48 = vld [vmem:[%s15039_s1 + $0x270] sm:$0xff] }
  0xf0   : > { %v12850_v23 = vmul.f32 %v3863_v21, %v1318_v55  ;;  %5511 = vperm.xlu0 %11752, %v9117_v59   ;;  %v1428_v12 = vmul.f32 %v3860_v52, %v1323_v56  ;;  %v3867_v52 = vld [vmem:[%s11980_s12 + $0xa2] sm:$0xff] }
  0xf1   : > { %15310 = vst [vmem:[#allocation50_spill] sm:$0xff] %v12844_v9  ;;  %15311 = vst [vmem:[#allocation51_spill] sm:$0xff] %v12846_v36  ;;  %10180 = vmatmul.mubr.msk.f32.gmra.mrb[10].mxu0 %vm547_vm0, %v1426_v11  ;;  %v3868_v9 = vld [vmem:[%s11980_s12 + $0xaa] sm:$0xff] }
  0xf2   : > { %15312 = vst [vmem:[#allocation52_spill] sm:$0xff] %v12848_v43  ;;  %15313 = vst [vmem:[#allocation53_spill] sm:$0xff] %v12850_v23  ;;  %v1333_v40 = vpop.permute.xlu1 %1332  ;;  %v1328_v29 = vpop.permute.xlu0 %1327  ;;  %10182 = vmatprep.mubr.msk.f32.mxu0 %vm547_vm0, %v1427_v2  ;;  %v9122_v43 = vld [vmem:[%s15039_s1 + $0x288] sm:$0xff] }
  0xf3   : > { %v12862_v59 = vmul.f32 %v3864_v15, %v1333_v40  ;;  %v12864_v55 = vmul.f32 %v3866_v51, %v1333_v40  ;;  %v1429_v36 = vmul.f32 %v3861_v6, %v1328_v29  ;;  %5526 = vperm.xlu1 %11753, %v9120_v30   ;;  %v12866_v23 = vmul.f32 %v3863_v21, %v1328_v29  ;;  %v9121_v6 = vld [vmem:[%s15039_s1 + $0x280] sm:$0xff] }
  0xf4   : > { %v12868_v11 = vmul.f32 %v3865_v46, %v1328_v29  ;;  %5521 = vperm.xlu0 %11752, %v9119_v48   ;;  %v1430_v56 = vmul.f32 %v3862_v63, %v1333_v40  ;;  %v3869_v63 = vld [vmem:[%s11980_s12 + $0xb2] sm:$0xff] }
  0xf5   : > { %15314 = vst [vmem:[#allocation54_spill] sm:$0xff] %v12862_v59  ;;  %15315 = vst [vmem:[#allocation55_spill] sm:$0xff] %v12864_v55  ;;  %10183 = vmatmul.mubr.msk.f32.gmra.mrb[12].mxu0 %vm547_vm0, %v1428_v12  ;;  %v3870_v59 = vld [vmem:[%s11980_s12 + $0xba] sm:$0xff] }
  0xf6   : > { %15316 = vst [vmem:[#allocation56_spill] sm:$0xff] %v12866_v23  ;;  %15317 = vst [vmem:[#allocation57_spill] sm:$0xff] %v12868_v11  ;;  %v1343_v30 = vpop.permute.xlu1 %1342  ;;  %v1338_v2 = vpop.permute.xlu0 %1337  ;;  %10185 = vmatprep.mubr.msk.f32.mxu0 %vm547_vm0, %v1429_v36  ;;  %v9124_v23 = vld [vmem:[%s15039_s1 + $0x298] sm:$0xff] }
  0xf7   : > { %v12880_v48 = vmul.f32 %v3866_v51, %v1343_v30  ;;  %v12882_v29 = vmul.f32 %v3868_v9, %v1343_v30  ;;  %v1431_v55 = vmul.f32 %v3863_v21, %v1338_v2  ;;  %5536 = vperm.xlu1 %11753, %v9122_v43   ;;  %v12884_v11 = vmul.f32 %v3865_v46, %v1338_v2  ;;  %v9123_v21 = vld [vmem:[%s15039_s1 + $0x290] sm:$0xff] }
  0xf8   : > { %v12886_v12 = vmul.f32 %v3867_v52, %v1338_v2  ;;  %5531 = vperm.xlu0 %11752, %v9121_v6   ;;  %v1432_v40 = vmul.f32 %v3864_v15, %v1343_v30  ;;  %v3871_v15 = vld [vmem:[%s11980_s12 + $0xc2] sm:$0xff] }
  0xf9   : > { %15318 = vst [vmem:[#allocation58_spill] sm:$0xff] %v12880_v48  ;;  %15319 = vst [vmem:[#allocation59_spill] sm:$0xff] %v12882_v29  ;;  %10186 = vmatmul.mubr.msk.f32.gmra.mrb[14].mxu0 %vm547_vm0, %v1430_v56  ;;  %v3872_v48 = vld [vmem:[%s11980_s12 + $0xca] sm:$0xff] }
  0xfa   : > { %15320 = vst [vmem:[#allocation60_spill] sm:$0xff] %v12884_v11  ;;  %15321 = vst [vmem:[#allocation61_spill] sm:$0xff] %v12886_v12  ;;  %v1353_v43 = vpop.permute.xlu1 %1352  ;;  %v1348_v36 = vpop.permute.xlu0 %1347  ;;  %10188 = vmatprep.mubr.msk.f32.mxu0 %vm547_vm0, %v1431_v55  ;;  %v9126_v11 = vld [vmem:[%s15039_s1 + $0x2a8] sm:$0xff] }
  0xfb   : > { %v12898_v6 = vmul.f32 %v3868_v9, %v1353_v43  ;;  %v12900_v2 = vmul.f32 %v3870_v59, %v1353_v43  ;;  %v1433_v29 = vmul.f32 %v3865_v46, %v1348_v36  ;;  %5546 = vperm.xlu1 %11753, %v9124_v23   ;;  %v12902_v12 = vmul.f32 %v3867_v52, %v1348_v36  ;;  %v9125_v46 = vld [vmem:[%s15039_s1 + $0x2a0] sm:$0xff] }
  0xfc   : > { %v12904_v56 = vmul.f32 %v3869_v63, %v1348_v36  ;;  %5541 = vperm.xlu0 %11752, %v9123_v21   ;;  %v1434_v30 = vmul.f32 %v3866_v51, %v1353_v43  ;;  %v3873_v51 = vld [vmem:[%s11980_s12 + $0xd2] sm:$0xff] }
  0xfd   : > { %15322 = vst [vmem:[#allocation62_spill] sm:$0xff] %v12898_v6  ;;  %15323 = vst [vmem:[#allocation63_spill] sm:$0xff] %v12900_v2  ;;  %10189 = vmatmul.mubr.msk.f32.gmra.mrb[16].mxu0 %vm547_vm0, %v1432_v40  ;;  %v3874_v6 = vld [vmem:[%s11980_s12 + $0xda] sm:$0xff] }
  0xfe   : > { %15324 = vst [vmem:[#allocation64_spill] sm:$0xff] %v12902_v12  ;;  %15325 = vst [vmem:[#allocation65_spill] sm:$0xff] %v12904_v56  ;;  %v1363_v23 = vpop.permute.xlu1 %1362  ;;  %v1358_v55 = vpop.permute.xlu0 %1357  ;;  %10191 = vmatprep.mubr.msk.f32.mxu0 %vm547_vm0, %v1433_v29  ;;  %v9128_v12 = vld [vmem:[%s15039_s1 + $0x2b8] sm:$0xff] }
  0xff   : > { %v12916_v21 = vmul.f32 %v3870_v59, %v1363_v23  ;;  %v12918_v36 = vmul.f32 %v3872_v48, %v1363_v23  ;;  %v1435_v2 = vmul.f32 %v3867_v52, %v1358_v55  ;;  %5556 = vperm.xlu1 %11753, %v9126_v11   ;;  %v12920_v56 = vmul.f32 %v3869_v63, %v1358_v55  ;;  %v9127_v52 = vld [vmem:[%s15039_s1 + $0x2b0] sm:$0xff] }
 0x100   : > { %v12922_v40 = vmul.f32 %v3871_v15, %v1358_v55  ;;  %5551 = vperm.xlu0 %11752, %v9125_v46   ;;  %v1436_v43 = vmul.f32 %v3868_v9, %v1363_v23  ;;  %v3875_v9 = vld [vmem:[%s11980_s12 + $0xe2] sm:$0xff] }
 0x101   : > { %15326 = vst [vmem:[#allocation66_spill] sm:$0xff] %v12916_v21  ;;  %15327 = vst [vmem:[#allocation67_spill] sm:$0xff] %v12918_v36  ;;  %10192 = vmatmul.mubr.msk.f32.gmra.mrb[18].mxu0 %vm547_vm0, %v1434_v30  ;;  %v3876_v21 = vld [vmem:[%s11980_s12 + $0xea] sm:$0xff] }
 0x102   : > { %15328 = vst [vmem:[#allocation68_spill] sm:$0xff] %v12920_v56  ;;  %15329 = vst [vmem:[#allocation69_spill] sm:$0xff] %v12922_v40  ;;  %v1373_v11 = vpop.permute.xlu1 %1372  ;;  %v1368_v29 = vpop.permute.xlu0 %1367  ;;  %10194 = vmatprep.mubr.msk.f32.mxu0 %vm547_vm0, %v1435_v2  ;;  %v9130_v56 = vld [vmem:[%s15039_s1 + $0x2c8] sm:$0xff] }
 0x103   : > { %v12934_v46 = vmul.f32 %v3872_v48, %v1373_v11  ;;  %v12936_v55 = vmul.f32 %v3874_v6, %v1373_v11  ;;  %v1437_v36 = vmul.f32 %v3869_v63, %v1368_v29  ;;  %5566 = vperm.xlu1 %11753, %v9128_v12   ;;  %v12938_v40 = vmul.f32 %v3871_v15, %v1368_v29  ;;  %v9129_v63 = vld [vmem:[%s15039_s1 + $0x2c0] sm:$0xff] }
 0x104   : > { %v12940_v30 = vmul.f32 %v3873_v51, %v1368_v29  ;;  %5561 = vperm.xlu0 %11752, %v9127_v52   ;;  %v1438_v23 = vmul.f32 %v3870_v59, %v1373_v11  ;;  %v3877_v59 = vld [vmem:[%s11980_s12 + $0xf2] sm:$0xff] }
 0x105   : > { %15330 = vst [vmem:[#allocation70_spill] sm:$0xff] %v12934_v46  ;;  %15331 = vst [vmem:[#allocation71_spill] sm:$0xff] %v12936_v55  ;;  %10195 = vmatmul.mubr.msk.f32.gmra.mrb[20].mxu0 %vm547_vm0, %v1436_v43  ;;  %v3878_v46 = vld [vmem:[%s11980_s12 + $0xfa] sm:$0xff] }
 0x106   : > { %15332 = vst [vmem:[#allocation72_spill] sm:$0xff] %v12938_v40  ;;  %15333 = vst [vmem:[#allocation73_spill] sm:$0xff] %v12940_v30  ;;  %v1383_v12 = vpop.permute.xlu1 %1382  ;;  %v1378_v2 = vpop.permute.xlu0 %1377  ;;  %10197 = vmatprep.mubr.msk.f32.mxu0 %vm547_vm0, %v1437_v36  ;;  %v9132_v40 = vld [vmem:[%s15039_s1 + $0x2d8] sm:$0xff]  ;;  %v9131_v36 = vld [vmem:[%s15039_s1 + $0x2d0] sm:$0xff] }
 0x107   : > { %v12952_v52 = vmul.f32 %v3874_v6, %v1383_v12  ;;  %v12954_v29 = vmul.f32 %v3876_v21, %v1383_v12  ;;  %v1439_v55 = vmul.f32 %v3871_v15, %v1378_v2  ;;  %5576 = vperm.xlu1 %11753, %v9130_v56   ;;  %v12956_v30 = vmul.f32 %v3873_v51, %v1378_v2 }
 0x108   : > { %v12958_v43 = vmul.f32 %v3875_v9, %v1378_v2  ;;  %5571 = vperm.xlu0 %11752, %v9129_v63   ;;  %v1440_v11 = vmul.f32 %v3872_v48, %v1383_v12  ;;  %v12986_v48 = vld [vmem:[%s11980_s12 + $0x102] sm:$0xff] }
 0x109   : > { %15334 = vst [vmem:[#allocation74_spill] sm:$0xff] %v12952_v52  ;;  %15335 = vst [vmem:[#allocation75_spill] sm:$0xff] %v12954_v29  ;;  %10198 = vmatmul.mubr.msk.f32.gmra.mrb[22].mxu0 %vm547_vm0, %v1438_v23  ;;  %v12979_v52 = vld [vmem:[%s11980_s12 + $0x10a] sm:$0xff] }
 0x10a   : > { %15336 = vst [vmem:[#allocation76_spill] sm:$0xff] %v12956_v30  ;;  %15337 = vst [vmem:[#allocation77_spill] sm:$0xff] %v12958_v43  ;;  %v1393_v56 = vpop.permute.xlu1 %1392  ;;  %v1388_v15 = vpop.permute.xlu0 %1387  ;;  %10200 = vmatprep.mubr.msk.f32.mxu0 %vm547_vm0, %v1439_v55  ;;  %v9134_v30 = vld [vmem:[%s15039_s1 + $0x2e8] sm:$0xff] }
 0x10b   : > { %v12970_v63 = vmul.f32 %v3876_v21, %v1393_v56  ;;  %v12972_v2 = vmul.f32 %v3878_v46, %v1393_v56  ;;  %v1441_v29 = vmul.f32 %v3873_v51, %v1388_v15  ;;  %5586 = vperm.xlu1 %11753, %v9132_v40   ;;  %v12974_v43 = vmul.f32 %v3875_v9, %v1388_v15  ;;  %v9133_v40 = vld [vmem:[%s15039_s1 + $0x2e0] sm:$0xff] }
 0x10c   : > { %v12976_v23 = vmul.f32 %v3877_v59, %v1388_v15  ;;  %5581 = vperm.xlu0 %11752, %v9131_v36   ;;  %v15341_v51 = vmov 0.0   ;;  %v1442_v36 = vmul.f32 %v3874_v6, %v1393_v56  ;;  %v9135_v6 = vld [vmem:[%s15039_s1 + $0x2f0] sm:$0xff] }
 0x10d   : > { %15338 = vst [vmem:[#allocation78_spill] sm:$0xff] %v12970_v63  ;;  %15339 = vst [vmem:[#allocation79_spill] sm:$0xff] %v12972_v2  ;;  %10201 = vmatmul.mubr.msk.f32.gmra.mrb[24].mxu0 %vm547_vm0, %v1440_v11 }
 0x10e   : > { %15340 = vst [vmem:[#allocation80_spill] sm:$0xff] %v12976_v23  ;;  %4381 = vst.msk [vmem:[#allocation2 + $0x120] sm:$0x3] %vm4380_vm1, %v15341_v51  ;;  %v1403_v55 = vpop.permute.xlu1 %1402  ;;  %v1398_v12 = vpop.permute.xlu0 %1397  ;;  %10203 = vmatprep.mubr.msk.f32.mxu0 %vm547_vm0, %v1441_v29  ;;  %v9136_v51 = vld [vmem:[%s15039_s1 + $0x2f8] sm:$0xff] }
 0x10f   : > { %v12993_v15 = vmul.f32 %v3878_v46, %v1403_v55  ;;  %v12996_v2 = vmul.f32 %v12979_v52, %v1403_v55  ;;  %v1443_v23 = vmul.f32 %v3875_v9, %v1398_v12  ;;  %5596 = vperm.xlu1 %11753, %v9134_v30   ;;  %v12998_v11 = vmul.f32 %v3877_v59, %v1398_v12 }
 0x110   : > { %v13001_v63 = vmul.f32 %v12986_v48, %v1398_v12  ;;  %5591 = vperm.xlu0 %11752, %v9133_v40   ;;  %v1444_v30 = vmul.f32 %v3876_v21, %v1403_v55  ;;  %v1837_v12 = vmul.f32 %v12421_v49, %v12428_v54  ;;  %v8859_v21 = vld [vmem:[%s15040_s2 + $0x98] sm:$0xff]  ;;  %v8892_v54 = vld [vmem:[%s15040_s2 + $0xa0] sm:$0xff] }
 0x111   : > { %15342 = vst [vmem:[#allocation81_spill] sm:$0xff] %v12996_v2  ;;  %10204 = vmatmul.mubr.msk.f32.gmra.mrb[26].mxu0 %vm547_vm0, %v1442_v36  ;;  %v8893_v36 = vld [vmem:[%s15040_s2 + $0xa8] sm:$0xff] }
 0x112   : > { %15343 = vst [vmem:[#allocation82_spill] sm:$0xff] %v13001_v63  ;;  %v13010_v29 = vpop.permute.xlu0 %1407  ;;  %10206 = vmatprep.mubr.msk.f32.mxu0 %vm547_vm0, %v1443_v23  ;;  %v13014_v56 = vpop.permute.xlu1 %1412  ;;  %v8858_v23 = vld [vmem:[%s15040_s2 + $0x90] sm:$0xff]  ;;  %v13237_v2 = vld [vmem:[%s11980_s12 + $0xa1] sm:$0xff] }
 0x113   : > { %v1445_v9 = vmul.f32 %v3877_v59, %v13010_v29  ;;  %5606 = vperm.xlu1 %11753, %v9136_v51   ;;  %v1446_v40 = vmul.f32 %v3878_v46, %v13014_v56  ;;  %v1838_v59 = vmul.f32 %v12441_v1, %v12446_v7  ;;  %v11088_v55 = vpack.c.bf16 %v8859_v21, %v8858_v23  ;;  %v15348_v23 = vld [vmem:[#allocation9_spill] sm:$0xff]  ;;  %v13244_v63 = vld [vmem:[%s11980_s12 + $0xa9] sm:$0xff] }
 0x114   : > { %5601 = vperm.xlu0 %11752, %v9135_v6   ;;  %v1839_v46 = vmul.f32 %v12457_v17, %v12419_v45  ;;  %v1840_v7 = vmul.f32 %v12478_v31, %v12439_v4  ;;  %v13044_v51 = vpack.c.bf16 %v8893_v36, %v8892_v54  ;;  %v1841_v17 = vmul.f32 %v12475_v28, %v12462_v0  ;;  %v15349_v21 = vld [vmem:[#allocation13_spill] sm:$0xff]  ;;  %v15354_v36 = vld [vmem:[#allocation16_spill] sm:$0xff] }
 0x115   : > { %10207 = vmatmul.mubr.msk.f32.gmra.mrb[28].mxu0 %vm547_vm0, %v1444_v30  ;;  %v1842_v6 = vmul.f32 %v12494_v38, %v12460_v3  ;;  %v1844_v28 = vmul.f32 %v12512_v50, %v12480_v34  ;;  %v1845_v31 = vmul.f32 %v12515_v53, %v12501_v44  ;;  %v1846_v38 = vmul.f32 %v12530_v19, %v12499_v42  ;;  %v15344_v30 = vld [vmem:[#allocation6_spill] sm:$0xff] }
 0x116   : > { %10209 = vmatprep.mubr.msk.f32.mxu0 %vm547_vm0, %v1445_v9  ;;  %v1848_v50 = vmul.f32 %v12548_v22, %v12517_v57  ;;  %v1849_v53 = vmul.f32 %v12551_v20, %v12537_v13  ;;  %v1850_v19 = vmul.f32 %v12566_v26, %v12535_v10  ;;  %v1852_v22 = vmul.f32 %v12584_v33, %v12553_v27  ;;  %v15345_v9 = vld [vmem:[#allocation8_spill] sm:$0xff] }
 0x117   : > { %v1853_v20 = vmul.f32 %v12587_v14, %v12573_v61  ;;  %v1854_v26 = vmul.f32 %v12602_v37, %v15344_v30  ;;  %v1858_v37 = vmul.f32 %v15349_v21, %v15348_v23 }
 0x119   : > { %10210 = vmatmul.mubr.msk.f32.gmra.mrb[30].mxu0 %vm547_vm0, %v1446_v40  ;;  %v15346_v40 = vld [vmem:[#allocation7_spill] sm:$0xff] }
 0x11a   : > { %10220 = vmatprep.mubr.msk.f32.mxu0 %vm547_vm0, %v1837_v12  ;;  %v1856_v33 = vmul.f32 %v12620_v41, %v15346_v40  ;;  %v15347_v12 = vld [vmem:[#allocation10_spill] sm:$0xff]  ;;  %v15353_v41 = vld [vmem:[#allocation17_spill] sm:$0xff] }
 0x11b   : > { %v1857_v14 = vmul.f32 %v12623_v25, %v15347_v12  ;;  %v15355_v25 = vld [vmem:[#allocation18_spill] sm:$0xff] }
 0x11d   : > { %10221 = vmatmul.mubr.msk.f32.vlgmr.msra.gmra.mrb[0].mxu0 %vm547_vm0, %v1838_v59  ;;  %v15350_v59 = vld [vmem:[#allocation12_spill] sm:$0xff] }
 0x11e   : > { %11087 = vmatpush3.bf16.msra.mxu0 %v12780_v47  ;;  %10223 = vmatprep.mubr.msk.f32.mxu0 %vm547_vm0, %v1839_v46  ;;  %v1843_v47 = vmul.f32 %v12497_v39, %v12482_v35  ;;  %v1847_v39 = vmul.f32 %v12533_v62, %v12519_v58  ;;  %v1851_v62 = vmul.f32 %v12569_v8, %v12555_v5  ;;  %v15352_v46 = vld [vmem:[#allocation11_spill] sm:$0xff] }
 0x11f   : > { %11089 = vmatprep.subr.bf16.mxu0 %v11088_v55  ;;  %v1855_v8 = vmul.f32 %v12605_v18, %v15345_v9  ;;  %v1860_v54 = vmul.f32 %v15353_v41, %v15352_v46  ;;  %v2227_v41 = vld [vmem:[%s11980_s12 + $0x11] sm:$0xff]  ;;  %15374 = vst [vmem:[#allocation12_spill] sm:$0xff] %v13237_v2 }
 0x121   : > { %10224 = vmatmul.mubr.msk.f32.gmra.mrb[2].mxu0 %vm547_vm0, %v1840_v7  ;;  %v1861_v7 = vmul.f32 %v15355_v25, %v15354_v36  ;;  %v8895_v25 = vld [vmem:[%s15040_s2 + $0xb8] sm:$0xff] }
 0x122   : > { %10226 = vmatprep.mubr.msk.f32.mxu0 %vm547_vm0, %v1841_v17  ;;  %11091 = vmatpush3.bf16.msra.mxu0 %v11088_v55  ;;  %v15351_v55 = vld [vmem:[#allocation14_spill] sm:$0xff]  ;;  %v15356_v17 = vld [vmem:[#allocation15_spill] sm:$0xff] }
 0x123   : > { %11093 = vmatprep.subr.bf16.mxu0 %v13044_v51  ;;  %v1859_v18 = vmul.f32 %v15351_v55, %v15350_v59  ;;  %v15367_v55 = vld [vmem:[#allocation27_spill] sm:$0xff]  ;;  %15375 = vst [vmem:[#allocation14_spill] sm:$0xff] %v13244_v63 }
 0x125   : > { %10227 = vmatmul.mubr.msk.f32.gmra.mrb[4].mxu0 %vm547_vm0, %v1842_v6  ;;  %v15357_v6 = vld [vmem:[#allocation21_spill] sm:$0xff] }
 0x126   : > { %10229 = vmatprep.mubr.msk.f32.mxu0 %vm547_vm0, %v1843_v47  ;;  %v1862_v47 = vmul.f32 %v15357_v6, %v15356_v17  ;;  %v13148_v6 = vld [vmem:[%s11980_s12 + $0x21] sm:$0xff] }
 0x129   : > { %10230 = vmatmul.mubr.msk.f32.gmra.mrb[6].mxu0 %vm547_vm0, %v1844_v28  ;;  %v15358_v28 = vld [vmem:[#allocation20_spill] sm:$0xff] }
 0x12a   : > { %10232 = vmatprep.mubr.msk.f32.mxu0 %vm547_vm0, %v1845_v31  ;;  %v15359_v31 = vld [vmem:[#allocation22_spill] sm:$0xff] }
 0x12d   : > { %10233 = vmatmul.mubr.msk.f32.gmra.mrb[8].mxu0 %vm547_vm0, %v1846_v38  ;;  %v1863_v38 = vmul.f32 %v15359_v31, %v15358_v28  ;;  %v8928_v31 = vld [vmem:[%s15040_s2 + $0xc0] sm:$0xff] }
 0x12e   : > { %10235 = vmatprep.mubr.msk.f32.mxu0 %vm547_vm0, %v1847_v39  ;;  %v15360_v39 = vld [vmem:[#allocation19_spill] sm:$0xff] }
 0x131   : > { %10236 = vmatmul.mubr.msk.f32.gmra.mrb[10].mxu0 %vm547_vm0, %v1848_v50  ;;  %v15361_v50 = vld [vmem:[#allocation25_spill] sm:$0xff] }
 0x132   : > { %10238 = vmatprep.mubr.msk.f32.mxu0 %vm547_vm0, %v1849_v53  ;;  %v1864_v53 = vmul.f32 %v15361_v50, %v15360_v39  ;;  %v13161_v50 = vld [vmem:[%s11980_s12 + $0x29] sm:$0xff] }
 0x135   : > { %10239 = vmatmul.mubr.msk.f32.gmra.mrb[12].mxu0 %vm547_vm0, %v1850_v19  ;;  %v15362_v19 = vld [vmem:[#allocation24_spill] sm:$0xff] }
 0x136   : > { %10241 = vmatprep.mubr.msk.f32.mxu0 %vm547_vm0, %v1851_v62  ;;  %v15363_v62 = vld [vmem:[#allocation26_spill] sm:$0xff] }
 0x139   : > { %10242 = vmatmul.mubr.msk.f32.gmra.mrb[14].mxu0 %vm547_vm0, %v1852_v22  ;;  %v1865_v22 = vmul.f32 %v15363_v62, %v15362_v19 }
 0x13a   : > { %10244 = vmatprep.mubr.msk.f32.mxu0 %vm547_vm0, %v1853_v20  ;;  %v15364_v20 = vld [vmem:[#allocation23_spill] sm:$0xff] }
 0x13d   : > { %10245 = vmatmul.mubr.msk.f32.gmra.mrb[16].mxu0 %vm547_vm0, %v1854_v26  ;;  %v15365_v26 = vld [vmem:[#allocation29_spill] sm:$0xff] }
 0x13e   : > { %10247 = vmatprep.mubr.msk.f32.mxu0 %vm547_vm0, %v1855_v8  ;;  %v1866_v8 = vmul.f32 %v15365_v26, %v15364_v20  ;;  %v13184_v26 = vld [vmem:[%s11980_s12 + $0x49] sm:$0xff] }
 0x141   : > { %10248 = vmatmul.mubr.msk.f32.gmra.mrb[18].mxu0 %vm547_vm0, %v1856_v33  ;;  %v13126_v33 = vld [vmem:[%s11980_s12 + $0x100] sm:$0xff] }
 0x142   : > { %10250 = vmatprep.mubr.msk.f32.mxu0 %vm547_vm0, %v1857_v14  ;;  %v15366_v14 = vld [vmem:[#allocation28_spill] sm:$0xff] }
 0x143   : > { %v1867_v21 = vmul.f32 %v13126_v33, %v15366_v14 }
 0x145   : > { %10251 = vmatmul.mubr.msk.f32.gmra.mrb[20].mxu0 %vm547_vm0, %v1858_v37  ;;  %v13132_v37 = vld [vmem:[%s11980_s12 + $0x108] sm:$0xff] }
 0x146   : > { %10253 = vmatprep.mubr.msk.f32.mxu0 %vm547_vm0, %v1859_v18  ;;  %v1868_v18 = vmul.f32 %v13132_v37, %v15367_v55 }
 0x149   : > { %10254 = vmatmul.mubr.msk.f32.gmra.mrb[22].mxu0 %vm547_vm0, %v1860_v54  ;;  %v8894_v54 = vld [vmem:[%s15040_s2 + $0xb0] sm:$0xff] }
 0x14a   : > { %10256 = vmatprep.mubr.msk.f32.mxu0 %vm547_vm0, %v1861_v7  ;;  %v2228_v7 = vld [vmem:[%s11980_s12 + $0x19] sm:$0xff] }
 0x14d   : > { %10257 = vmatmul.mubr.msk.f32.gmra.mrb[24].mxu0 %vm547_vm0, %v1862_v47  ;;  %v11096_v47 = vpack.c.bf16 %v8895_v25, %v8894_v54  ;;  %v13207_v54 = vld [vmem:[%s11980_s12 + $0x71] sm:$0xff]  ;;  %v13214_v25 = vld [vmem:[%s11980_s12 + $0x79] sm:$0xff] }
 0x14e   : > { %10259 = vmatprep.mubr.msk.f32.mxu0 %vm547_vm0, %v1863_v38  ;;  %v8929_v38 = vld [vmem:[%s15040_s2 + $0xc8] sm:$0xff]  ;;  %15368 = vst [vmem:[#allocation6_spill] sm:$0xff] %v13207_v54  ;;  %15369 = vst [vmem:[#allocation8_spill] sm:$0xff] %v13214_v25 }
 0x14f   : > { %v13166_v62 = vpack.c.bf16 %v8929_v38, %v8928_v31  ;;  %v13227_v31 = vld [vmem:[%s11980_s12 + $0x91] sm:$0xff]  ;;  %v13234_v38 = vld [vmem:[%s11980_s12 + $0x99] sm:$0xff] }
 0x150   : > { %15372 = vst [vmem:[#allocation9_spill] sm:$0xff] %v13227_v31  ;;  %15373 = vst [vmem:[#allocation13_spill] sm:$0xff] %v13234_v38 }
 0x151   : > { %10260 = vmatmul.mubr.msk.f32.gmra.mrb[26].mxu0 %vm547_vm0, %v1864_v53  ;;  %v13164_v53 = vld [vmem:[%s11980_s12 + $0x31] sm:$0xff] }
 0x152   : > { %10262 = vmatprep.mubr.msk.f32.mxu0 %vm547_vm0, %v1865_v22  ;;  %v13176_v22 = vld [vmem:[%s11980_s12 + $0x41] sm:$0xff] }
 0x155   : > { %10263 = vmatmul.mubr.msk.f32.gmra.mrb[28].mxu0 %vm547_vm0, %v1866_v8  ;;  %v13187_v8 = vld [vmem:[%s11980_s12 + $0x51] sm:$0xff] }
 0x156   : > { %10265 = vmatprep.mubr.msk.f32.mxu0 %vm547_vm0, %v1867_v21  ;;  %v13194_v21 = vld [vmem:[%s11980_s12 + $0x59] sm:$0xff] }
 0x159   : > { %10266 = vmatmul.mubr.msk.f32.gmra.mrb[30].mxu0 %vm547_vm0, %v1868_v18  ;;  %v13197_v18 = vld [vmem:[%s11980_s12 + $0x61] sm:$0xff] }
 0x15a   : > { %10276 = vmatprep.mubr.msk.f32.mxu0 %vm547_vm0, %v2227_v41  ;;  %v13204_v41 = vld [vmem:[%s11980_s12 + $0x69] sm:$0xff] }
 0x15d   : > { %10277 = vmatmul.mubr.msk.f32.vlgmr.msra.gmra.mrb[0].mxu0 %vm547_vm0, %v2228_v7  ;;  %v13217_v7 = vld [vmem:[%s11980_s12 + $0x81] sm:$0xff] }
 0x15e   : > { %11095 = vmatpush3.bf16.msra.mxu0 %v13044_v51  ;;  %10279 = vmatprep.mubr.msk.f32.mxu0 %vm547_vm0, %v13148_v6  ;;  %v13173_v51 = vld [vmem:[%s11980_s12 + $0x39] sm:$0xff]  ;;  %15370 = vst [vmem:[#allocation7_spill] sm:$0xff] %v13217_v7 }
 0x15f   : > { %11097 = vmatprep.subr.bf16.mxu0 %v11096_v47 }
 0x161   : > { %10280 = vmatmul.mubr.msk.f32.gmra.mrb[2].mxu0 %vm547_vm0, %v13161_v50 }
 0x162   : > { %10282 = vmatprep.mubr.msk.f32.mxu0 %vm547_vm0, %v13164_v53  ;;  %11099 = vmatpush3.bf16.msra.mxu0 %v11096_v47  ;;  %v13224_v47 = vld [vmem:[%s11980_s12 + $0x89] sm:$0xff] }
 0x163   : > { %11101 = vmatprep.subr.bf16.mxu0 %v13166_v62  ;;  %15371 = vst [vmem:[#allocation10_spill] sm:$0xff] %v13224_v47 }
 0x165   : > { %10283 = vmatmul.mubr.msk.f32.gmra.mrb[4].mxu0 %vm547_vm0, %v13173_v51 }
 0x166   : > { %10285 = vmatprep.mubr.msk.f32.mxu0 %vm547_vm0, %v13176_v22 }
 0x169   : > { %10286 = vmatmul.mubr.msk.f32.gmra.mrb[6].mxu0 %vm547_vm0, %v13184_v26 }
 0x16a   : > { %10288 = vmatprep.mubr.msk.f32.mxu0 %vm547_vm0, %v13187_v8 }
 0x16d   : > { %10289 = vmatmul.mubr.msk.f32.gmra.mrb[8].mxu0 %vm547_vm0, %v13194_v21 }
 0x16e   : > { %10291 = vmatprep.mubr.msk.f32.mxu0 %vm547_vm0, %v13197_v18 }
 0x171   : > { %10292 = vmatmul.mubr.msk.f32.gmra.mrb[10].mxu0 %vm547_vm0, %v13204_v41 }
 0x172   : > { %10294 = vmatprep.mubr.msk.f32.mxu0 %vm547_vm0, %v13207_v54  ;;  %v15389_v54 = vld [vmem:[#allocation30_spill] sm:$0xff] }
 0x175   : > { %10295 = vmatmul.mubr.msk.f32.gmra.mrb[12].mxu0 %vm547_vm0, %v13214_v25  ;;  %v8965_v25 = vld [vmem:[%s15040_s2 + $0xe8] sm:$0xff] }
 0x176   : > { %10297 = vmatprep.mubr.msk.f32.mxu0 %vm547_vm0, %v13217_v7  ;;  %v13247_v7 = vld [vmem:[%s11980_s12 + $0xb1] sm:$0xff] }
 0x177   : > { %15376 = vst [vmem:[#allocation11_spill] sm:$0xff] %v13247_v7 }
 0x179   : > { %10298 = vmatmul.mubr.msk.f32.gmra.mrb[14].mxu0 %vm547_vm0, %v13224_v47  ;;  %v13257_v47 = vld [vmem:[%s11980_s12 + $0xc1] sm:$0xff] }
 0x17a   : > { %10300 = vmatprep.mubr.msk.f32.mxu0 %vm547_vm0, %v13227_v31  ;;  %v13254_v31 = vld [vmem:[%s11980_s12 + $0xb9] sm:$0xff]  ;;  %15378 = vst [vmem:[#allocation16_spill] sm:$0xff] %v13257_v47 }
 0x17b   : > { %15377 = vst [vmem:[#allocation17_spill] sm:$0xff] %v13254_v31 }
 0x17d   : > { %10301 = vmatmul.mubr.msk.f32.gmra.mrb[16].mxu0 %vm547_vm0, %v13234_v38  ;;  %v13267_v38 = vld [vmem:[%s11980_s12 + $0xd1] sm:$0xff] }
 0x17e   : > { %10303 = vmatprep.mubr.msk.f32.mxu0 %vm547_vm0, %v13237_v2  ;;  %v13264_v2 = vld [vmem:[%s11980_s12 + $0xc9] sm:$0xff]  ;;  %15380 = vst [vmem:[#allocation15_spill] sm:$0xff] %v13267_v38 }
 0x17f   : > { %15379 = vst [vmem:[#allocation18_spill] sm:$0xff] %v13264_v2 }
 0x181   : > { %10304 = vmatmul.mubr.msk.f32.gmra.mrb[18].mxu0 %vm547_vm0, %v13244_v63  ;;  %v13277_v63 = vld [vmem:[%s11980_s12 + $0xe1] sm:$0xff] }
 0x182   : > { %10306 = vmatprep.mubr.msk.f32.mxu0 %vm547_vm0, %v13247_v7  ;;  %v13274_v7 = vld [vmem:[%s11980_s12 + $0xd9] sm:$0xff]  ;;  %15382 = vst [vmem:[#allocation20_spill] sm:$0xff] %v13277_v63 }
 0x183   : > { %15381 = vst [vmem:[#allocation21_spill] sm:$0xff] %v13274_v7 }
 0x185   : > { %10307 = vmatmul.mubr.msk.f32.gmra.mrb[20].mxu0 %vm547_vm0, %v13254_v31  ;;  %v13287_v31 = vld [vmem:[%s11980_s12 + $0xf1] sm:$0xff] }
 0x186   : > { %10309 = vmatprep.mubr.msk.f32.mxu0 %vm547_vm0, %v13257_v47  ;;  %v13284_v47 = vld [vmem:[%s11980_s12 + $0xe9] sm:$0xff]  ;;  %15384 = vst [vmem:[#allocation19_spill] sm:$0xff] %v13287_v31 }
 0x187   : > { %15383 = vst [vmem:[#allocation22_spill] sm:$0xff] %v13284_v47 }
 0x189   : > { %10310 = vmatmul.mubr.msk.f32.gmra.mrb[22].mxu0 %vm547_vm0, %v13264_v2  ;;  %v13297_v2 = vld [vmem:[%s11980_s12 + $0x101] sm:$0xff] }
 0x18a   : > { %10312 = vmatprep.mubr.msk.f32.mxu0 %vm547_vm0, %v13267_v38  ;;  %v13294_v38 = vld [vmem:[%s11980_s12 + $0xf9] sm:$0xff]  ;;  %15386 = vst [vmem:[#allocation24_spill] sm:$0xff] %v13297_v2 }
 0x18b   : > { %15385 = vst [vmem:[#allocation25_spill] sm:$0xff] %v13294_v38 }
 0x18d   : > { %10313 = vmatmul.mubr.msk.f32.gmra.mrb[24].mxu0 %vm547_vm0, %v13274_v7  ;;  %v8930_v7 = vld [vmem:[%s15040_s2 + $0xd0] sm:$0xff] }
 0x18e   : > { %10315 = vmatprep.mubr.msk.f32.mxu0 %vm547_vm0, %v13277_v63  ;;  %v13304_v63 = vld [vmem:[%s11980_s12 + $0x109] sm:$0xff] }
 0x18f   : > { %15387 = vst [vmem:[#allocation26_spill] sm:$0xff] %v13304_v63 }
 0x191   : > { %10316 = vmatmul.mubr.msk.f32.gmra.mrb[26].mxu0 %vm547_vm0, %v13284_v47  ;;  %v15388_v47 = vld [vmem:[#allocation32_spill] sm:$0xff] }
 0x192   : > { %10318 = vmatprep.mubr.msk.f32.mxu0 %vm547_vm0, %v13287_v31  ;;  %v8931_v31 = vld [vmem:[%s15040_s2 + $0xd8] sm:$0xff] }
 0x195   : > { %10319 = vmatmul.mubr.msk.f32.gmra.mrb[28].mxu0 %vm547_vm0, %v13294_v38  ;;  %v11104_v38 = vpack.c.bf16 %v8931_v31, %v8930_v7  ;;  %v15390_v7 = vld [vmem:[#allocation36_spill] sm:$0xff] }
 0x196   : > { %10321 = vmatprep.mubr.msk.f32.mxu0 %vm547_vm0, %v13297_v2  ;;  %v8964_v2 = vld [vmem:[%s15040_s2 + $0xe0] sm:$0xff]  ;;  %v15400_v31 = vld [vmem:[#allocation60_spill] sm:$0xff] }
 0x199   : > { %10322 = vmatmul.mubr.msk.f32.gmra.mrb[30].mxu0 %vm547_vm0, %v13304_v63  ;;  %v11108_v63 = vpack.c.bf16 %v8965_v25, %v8964_v2  ;;  %v15393_v2 = vld [vmem:[#allocation42_spill] sm:$0xff] }
 0x19a   : > { %10332 = vmatprep.mubr.msk.f32.mxu0 %vm547_vm0, %v15388_v47  ;;  %v15397_v25 = vld [vmem:[#allocation50_spill] sm:$0xff] }
 0x19b   : > { %v15399_v47 = vld [vmem:[#allocation54_spill] sm:$0xff] }
 0x19d   : > { %10333 = vmatmul.mubr.msk.f32.vlgmr.msra.gmra.mrb[0].mxu0 %vm547_vm0, %v15389_v54  ;;  %v15396_v54 = vld [vmem:[#allocation52_spill] sm:$0xff] }
 0x19e   : > { %11103 = vmatpush3.bf16.msra.mxu0 %v13166_v62  ;;  %10335 = vmatprep.mubr.msk.f32.mxu0 %vm547_vm0, %v12750_v32  ;;  %v15391_v62 = vld [vmem:[#allocation39_spill] sm:$0xff]  ;;  %v15392_v32 = vld [vmem:[#allocation44_spill] sm:$0xff] }
 0x19f   : > { %11105 = vmatprep.subr.bf16.mxu0 %v11104_v38 }
 0x1a1   : > { %10336 = vmatmul.mubr.msk.f32.gmra.mrb[2].mxu0 %vm547_vm0, %v12745_v16  ;;  %v15394_v16 = vld [vmem:[#allocation48_spill] sm:$0xff] }
 0x1a2   : > { %10338 = vmatprep.mubr.msk.f32.mxu0 %vm547_vm0, %v12771_v60  ;;  %11107 = vmatpush3.bf16.msra.mxu0 %v11104_v38  ;;  %v15395_v60 = vld [vmem:[#allocation46_spill] sm:$0xff] }
 0x1a3   : > { %11109 = vmatprep.subr.bf16.mxu0 %v11108_v63  ;;  %v15401_v38 = vld [vmem:[#allocation58_spill] sm:$0xff] }
 0x1a5   : > { %10339 = vmatmul.mubr.msk.f32.gmra.mrb[4].mxu0 %vm547_vm0, %v15390_v7  ;;  %v15402_v7 = vld [vmem:[#allocation64_spill] sm:$0xff] }
 0x1a6   : > { %10341 = vmatprep.mubr.msk.f32.mxu0 %vm547_vm0, %v12793_v24  ;;  %v15398_v24 = vld [vmem:[#allocation56_spill] sm:$0xff] }
 0x1a9   : > { %10342 = vmatmul.mubr.msk.f32.gmra.mrb[6].mxu0 %vm547_vm0, %v15391_v62  ;;  %v15403_v62 = vld [vmem:[#allocation62_spill] sm:$0xff] }
 0x1aa   : > { %10344 = vmatprep.mubr.msk.f32.mxu0 %vm547_vm0, %v15392_v32  ;;  %v15404_v32 = vld [vmem:[#allocation68_spill] sm:$0xff] }
 0x1ad   : > { %10345 = vmatmul.mubr.msk.f32.gmra.mrb[8].mxu0 %vm547_vm0, %v15393_v2  ;;  %v15405_v2 = vld [vmem:[#allocation66_spill] sm:$0xff] }
 0x1ae   : > { %10347 = vmatprep.mubr.msk.f32.mxu0 %vm547_vm0, %v15394_v16  ;;  %v15406_v16 = vld [vmem:[#allocation72_spill] sm:$0xff] }
 0x1b1   : > { %10348 = vmatmul.mubr.msk.f32.gmra.mrb[10].mxu0 %vm547_vm0, %v15395_v60  ;;  %v15407_v60 = vld [vmem:[#allocation70_spill] sm:$0xff] }
 0x1b2   : > { %10350 = vmatprep.mubr.msk.f32.mxu0 %vm547_vm0, %v15396_v54  ;;  %v15408_v54 = vld [vmem:[#allocation76_spill] sm:$0xff] }
 0x1b5   : > { %10351 = vmatmul.mubr.msk.f32.gmra.mrb[12].mxu0 %vm547_vm0, %v15397_v25  ;;  %v15409_v25 = vld [vmem:[#allocation74_spill] sm:$0xff] }
 0x1b6   : > { %10353 = vmatprep.mubr.msk.f32.mxu0 %vm547_vm0, %v15398_v24  ;;  %v15410_v24 = vld [vmem:[#allocation78_spill] sm:$0xff] }
 0x1b9   : > { %10354 = vmatmul.mubr.msk.f32.gmra.mrb[14].mxu0 %vm547_vm0, %v15399_v47  ;;  %v2679_v47 = vmul.f32 %v12986_v48, %v13010_v29  ;;  %v8967_v48 = vld [vmem:[%s15040_s2 + $0xf8] sm:$0xff] }
 0x1ba   : > { %10356 = vmatprep.mubr.msk.f32.mxu0 %vm547_vm0, %v15400_v31  ;;  %v2680_v31 = vmul.f32 %v12979_v52, %v13014_v56 }
 0x1bd   : > { %10357 = vmatmul.mubr.msk.f32.gmra.mrb[16].mxu0 %vm547_vm0, %v15401_v38  ;;  %v11754_v38 = vld [vmem:[%s11980_s12 + $0x20] sm:$0xff] }
 0x1be   : > { %10359 = vmatprep.mubr.msk.f32.mxu0 %vm547_vm0, %v15402_v7  ;;  %v8966_v7 = vld [vmem:[%s15040_s2 + $0xf0] sm:$0xff] }
 0x1c1   : > { %10360 = vmatmul.mubr.msk.f32.gmra.mrb[18].mxu0 %vm547_vm0, %v15403_v62  ;;  %v11756_v62 = vld [vmem:[%s11980_s12 + $0x30] sm:$0xff] }
 0x1c2   : > { %10362 = vmatprep.mubr.msk.f32.mxu0 %vm547_vm0, %v15404_v32  ;;  %v9000_v32 = vld [vmem:[%s15040_s2 + $0x100] sm:$0xff] }
 0x1c5   : > { %10363 = vmatmul.mubr.msk.f32.gmra.mrb[20].mxu0 %vm547_vm0, %v15405_v2  ;;  %v9001_v2 = vld [vmem:[%s15040_s2 + $0x108] sm:$0xff] }
 0x1c6   : > { %10365 = vmatprep.mubr.msk.f32.mxu0 %vm547_vm0, %v15406_v16 }
 0x1c9   : > { %10366 = vmatmul.mubr.msk.f32.gmra.mrb[22].mxu0 %vm547_vm0, %v15407_v60  ;;  %v11758_v60 = vld [vmem:[%s11980_s12 + $0x40] sm:$0xff] }
 0x1ca   : > { %10368 = vmatprep.mubr.msk.f32.mxu0 %vm547_vm0, %v15408_v54  ;;  %v3075_v54 = vmul.f32 %v11758_v60, %v12462_v0  ;;  %v11761_v0 = vld [vmem:[%s11980_s12 + $0x58] sm:$0xff]  ;;  %v11776_v60 = vld [vmem:[%s11980_s12 + $0xd0] sm:$0xff] }
 0x1cd   : > { %10369 = vmatmul.mubr.msk.f32.gmra.mrb[24].mxu0 %vm547_vm0, %v15409_v25 }
 0x1ce   : > { %10371 = vmatprep.mubr.msk.f32.mxu0 %vm547_vm0, %v12974_v43  ;;  %v3071_v43 = vmul.f32 %v11754_v38, %v12421_v49  ;;  %v3073_v49 = vmul.f32 %v11756_v62, %v12419_v45  ;;  %v13410_v45 = vpack.c.bf16 %v9001_v2, %v9000_v32  ;;  %v11770_v62 = vld [vmem:[%s11980_s12 + $0xa0] sm:$0xff]  ;;  %v11772_v32 = vld [vmem:[%s11980_s12 + $0xb0] sm:$0xff] }
 0x1cf   : > { %v3089_v2 = vmul.f32 %v11772_v32, %v15345_v9  ;;  %v15442_v32 = vld [vmem:[#allocation47_spill] sm:$0xff] }
 0x1d1   : > { %10372 = vmatmul.mubr.msk.f32.gmra.mrb[26].mxu0 %vm547_vm0, %v15410_v24 }
 0x1d2   : > { %10374 = vmatprep.mubr.msk.f32.mxu0 %vm547_vm0, %v12998_v11  ;;  %v11112_v11 = vpack.c.bf16 %v8967_v48, %v8966_v7  ;;  %v11766_v48 = vld [vmem:[%s11980_s12 + $0x80] sm:$0xff] }
 0x1d5   : > { %10375 = vmatmul.mubr.msk.f32.gmra.mrb[28].mxu0 %vm547_vm0, %v12993_v15  ;;  %v11755_v15 = vld [vmem:[%s11980_s12 + $0x28] sm:$0xff] }
 0x1d6   : > { %10377 = vmatprep.mubr.msk.f32.mxu0 %vm547_vm0, %v2679_v47  ;;  %v3072_v52 = vmul.f32 %v11755_v15, %v12441_v1  ;;  %v11757_v1 = vld [vmem:[%s11980_s12 + $0x38] sm:$0xff]  ;;  %v3078_v47 = vmul.f32 %v11761_v0, %v12480_v34  ;;  %v3083_v15 = vmul.f32 %v11766_v48, %v12537_v13 }
 0x1d7   : > { %v3074_v16 = vmul.f32 %v11757_v1, %v12439_v4  ;;  %v11760_v4 = vld [vmem:[%s11980_s12 + $0x50] sm:$0xff]  ;;  %v11765_v34 = vld [vmem:[%s11980_s12 + $0x78] sm:$0xff]  ;;  %v11774_v1 = vld [vmem:[%s11980_s12 + $0xc0] sm:$0xff] }
 0x1d8   : > { %v3077_v24 = vmul.f32 %v11760_v4, %v12482_v35  ;;  %v11781_v0 = vld [vmem:[%s11980_s12 + $0xf8] sm:$0xff] }
 0x1d9   : > { %10378 = vmatmul.mubr.msk.f32.gmra.mrb[30].mxu0 %vm547_vm0, %v2680_v31  ;;  %v11762_v31 = vld [vmem:[%s11980_s12 + $0x60] sm:$0xff] }
 0x1da   : > { %10388 = vmatprep.mubr.msk.f32.mxu0 %vm547_vm0, %v3071_v43  ;;  %v3079_v38 = vmul.f32 %v11762_v31, %v12501_v44  ;;  %v11764_v43 = vld [vmem:[%s11980_s12 + $0x70] sm:$0xff]  ;;  %v3082_v44 = vmul.f32 %v11765_v34, %v12517_v57  ;;  %v11769_v57 = vld [vmem:[%s11980_s12 + $0x98] sm:$0xff] }
 0x1db   : > { %v3081_v7 = vmul.f32 %v11764_v43, %v12519_v58  ;;  %v3086_v13 = vmul.f32 %v11769_v57, %v12553_v27  ;;  %v11773_v27 = vld [vmem:[%s11980_s12 + $0xb8] sm:$0xff]  ;;  %v15428_v43 = vld [vmem:[#allocation25_spill] sm:$0xff] }
 0x1dc   : > { %v3070_v31 = vld [vmem:[%s11980_s12 + $0x118] sm:$0xff]  ;;  %v15436_v57 = vld [vmem:[#allocation37_spill] sm:$0xff] }
 0x1dd   : > { %10389 = vmatmul.mubr.msk.f32.vlgmr.msra.gmra.mrb[0].mxu0 %vm547_vm0, %v3072_v52  ;;  %v11768_v52 = vld [vmem:[%s11980_s12 + $0x90] sm:$0xff]  ;;  %v3492_v48 = vld [vmem:[%s11980_s12 + $0x119] sm:$0xff] }
 0x1de   : > { %11111 = vmatpush3.bf16.msra.mxu0 %v11108_v63  ;;  %10391 = vmatprep.mubr.msk.f32.mxu0 %vm547_vm0, %v3073_v49  ;;  %v11759_v63 = vld [vmem:[%s11980_s12 + $0x48] sm:$0xff]  ;;  %v3087_v49 = vmul.f32 %v11770_v62, %v12573_v61  ;;  %v3090_v61 = vmul.f32 %v11773_v27, %v15346_v40  ;;  %v11777_v40 = vld [vmem:[%s11980_s12 + $0xd8] sm:$0xff]  ;;  %v15444_v27 = vld [vmem:[#allocation51_spill] sm:$0xff] }
 0x1df   : > { %11113 = vmatprep.subr.bf16.mxu0 %v11112_v11  ;;  %v3076_v25 = vmul.f32 %v11759_v63, %v12460_v3  ;;  %v11763_v3 = vld [vmem:[%s11980_s12 + $0x68] sm:$0xff]  ;;  %v11778_v63 = vld [vmem:[%s11980_s12 + $0xe0] sm:$0xff]  ;;  %v3491_v34 = vld [vmem:[%s11980_s12 + $0x111] sm:$0xff] }
 0x1e0   : > { %v3080_v35 = vmul.f32 %v11763_v3, %v12499_v42  ;;  %v11767_v42 = vld [vmem:[%s11980_s12 + $0x88] sm:$0xff]  ;;  %v15438_v62 = vld [vmem:[#allocation40_spill] sm:$0xff] }
 0x1e1   : > { %10392 = vmatmul.mubr.msk.f32.gmra.mrb[2].mxu0 %vm547_vm0, %v3074_v16  ;;  %v3084_v58 = vmul.f32 %v11767_v42, %v12535_v10  ;;  %v11771_v10 = vld [vmem:[%s11980_s12 + $0xa8] sm:$0xff]  ;;  %v3091_v16 = vmul.f32 %v11774_v1, %v15347_v12  ;;  %v3094_v12 = vmul.f32 %v11777_v40, %v15352_v46  ;;  %v3098_v46 = vmul.f32 %v11781_v0, %v15360_v39  ;;  %v15432_v42 = vld [vmem:[#allocation31_spill] sm:$0xff] }
 0x1e2   : > { %10394 = vmatprep.mubr.msk.f32.mxu0 %vm547_vm0, %v3075_v54  ;;  %11115 = vmatpush3.bf16.msra.mxu0 %v11112_v11  ;;  %v3085_v11 = vmul.f32 %v11768_v52, %v12555_v5  ;;  %v3088_v5 = vmul.f32 %v11771_v10, %v15344_v30  ;;  %v11775_v30 = vld [vmem:[%s11980_s12 + $0xc8] sm:$0xff]  ;;  %v3093_v54 = vmul.f32 %v11776_v60, %v15350_v59  ;;  %v11780_v59 = vld [vmem:[%s11980_s12 + $0xf0] sm:$0xff] }
 0x1e3   : > { %11117 = vmatprep.subr.bf16.mxu0 %v13410_v45  ;;  %v3092_v9 = vmul.f32 %v11775_v30, %v15348_v23  ;;  %v11779_v23 = vld [vmem:[%s11980_s12 + $0xe8] sm:$0xff]  ;;  %v3102_v39 = vmul.f32 %v3070_v31, %v15367_v55  ;;  %v15413_v55 = vld [vmem:[#allocation7_spill] sm:$0xff]  ;;  %v9037_v31 = vld [vmem:[%s15042_s4 + $0x20] sm:$0xff] }
 0x1e4   : > { %v3096_v4 = vmul.f32 %v11779_v23, %v15356_v17  ;;  %v3100_v17 = vmul.f32 %v13132_v37, %v15364_v20  ;;  %v15412_v37 = vld [vmem:[#allocation8_spill] sm:$0xff]  ;;  %v15426_v3 = vld [vmem:[#allocation22_spill] sm:$0xff]  ;;  %v15440_v10 = vld [vmem:[#allocation43_spill] sm:$0xff] }
 0x1e5   : > { %10395 = vmatmul.mubr.msk.f32.gmra.mrb[4].mxu0 %vm547_vm0, %v3076_v25  ;;  %v3095_v25 = vmul.f32 %v11778_v63, %v15354_v36  ;;  %v3099_v36 = vmul.f32 %v13126_v33, %v15362_v19  ;;  %v9002_v19 = vld [vmem:[%s15040_s2 + $0x110] sm:$0xff]  ;;  %v9003_v33 = vld [vmem:[%s15040_s2 + $0x118] sm:$0xff]  ;;  %v15434_v52 = vld [vmem:[#allocation34_spill] sm:$0xff] }
 0x1e6   : > { %10397 = vmatprep.mubr.msk.f32.mxu0 %vm547_vm0, %v3077_v24  ;;  %v3097_v24 = vmul.f32 %v11780_v59, %v15358_v28  ;;  %v11120_v20 = vpack.c.bf16 %v9003_v33, %v9002_v19  ;;  %v15446_v1 = vld [vmem:[#allocation55_spill] sm:$0xff]  ;;  %v15459_v0 = vld [vmem:[#allocation82_spill] sm:$0xff] }
 0x1e7   : > { %v15448_v30 = vld [vmem:[#allocation59_spill] sm:$0xff]  ;;  %v4706_v33 = vld [vmem:[#allocation2 + $0x1] sm:$0xff] }
 0x1e8   : > { %v15450_v60 = vld [vmem:[#allocation63_spill] sm:$0xff]  ;;  %10556 = vmatprep.mubr.msk.f32.mxu1 %vm547_vm0, %v4706_v33 }
 0x1e9   : > { %10398 = vmatmul.mubr.msk.f32.gmra.mrb[6].mxu0 %vm547_vm0, %v3078_v47  ;;  %v3069_v47 = vld [vmem:[%s11980_s12 + $0x110] sm:$0xff] }
 0x1ea   : > { %10400 = vmatprep.mubr.msk.f32.mxu0 %vm547_vm0, %v3079_v38  ;;  %v3101_v28 = vmul.f32 %v3069_v47, %v15366_v14  ;;  %v15411_v14 = vld [vmem:[#allocation6_spill] sm:$0xff]  ;;  %v15425_v38 = vld [vmem:[#allocation20_spill] sm:$0xff]  ;;  %v15452_v40 = vld [vmem:[#allocation67_spill] sm:$0xff] }
 0x1eb   : > { %v15454_v63 = vld [vmem:[#allocation71_spill] sm:$0xff]  ;;  %v15460_v47 = vld [vmem:[#allocation81_spill] sm:$0xff] }
 0x1ec   : > { %v15456_v23 = vld [vmem:[#allocation75_spill] sm:$0xff] }
 0x1ed   : > { %10401 = vmatmul.mubr.msk.f32.gmra.mrb[8].mxu0 %vm547_vm0, %v3080_v35  ;;  %v15427_v35 = vld [vmem:[#allocation19_spill] sm:$0xff] }
 0x1ee   : > { %10403 = vmatprep.mubr.msk.f32.mxu0 %vm547_vm0, %v3081_v7  ;;  %v15429_v7 = vld [vmem:[#allocation24_spill] sm:$0xff] }
 0x1ef   : > { %v3881_v59 = vld [vmem:[%s11980_s12 + $0x112] sm:$0xff] }
 0x1f1   : > { %10404 = vmatmul.mubr.msk.f32.gmra.mrb[10].mxu0 %vm547_vm0, %v3082_v44  ;;  %v15430_v44 = vld [vmem:[#allocation26_spill] sm:$0xff] }
 0x1f2   : > { %10406 = vmatprep.mubr.msk.f32.mxu0 %vm547_vm0, %v3083_v15  ;;  %v15431_v15 = vld [vmem:[#allocation33_spill] sm:$0xff] }
 0x1f5   : > { %10407 = vmatmul.mubr.msk.f32.gmra.mrb[12].mxu0 %vm547_vm0, %v3084_v58  ;;  %v15433_v58 = vld [vmem:[#allocation35_spill] sm:$0xff] }
 0x1f6   : > { %10409 = vmatprep.mubr.msk.f32.mxu0 %vm547_vm0, %v3085_v11  ;;  %v15435_v11 = vld [vmem:[#allocation38_spill] sm:$0xff] }
 0x1f9   : > { %10410 = vmatmul.mubr.msk.f32.gmra.mrb[14].mxu0 %vm547_vm0, %v3086_v13  ;;  %v15437_v13 = vld [vmem:[#allocation41_spill] sm:$0xff] }
 0x1fa   : > { %10412 = vmatprep.mubr.msk.f32.mxu0 %vm547_vm0, %v3087_v49  ;;  %v15439_v49 = vld [vmem:[#allocation45_spill] sm:$0xff] }
 0x1fd   : > { %10413 = vmatmul.mubr.msk.f32.gmra.mrb[16].mxu0 %vm547_vm0, %v3088_v5  ;;  %v15441_v5 = vld [vmem:[#allocation49_spill] sm:$0xff] }
 0x1fe   : > { %10415 = vmatprep.mubr.msk.f32.mxu0 %vm547_vm0, %v3089_v2  ;;  %v15443_v2 = vld [vmem:[#allocation53_spill] sm:$0xff] }
 0x201   : > { %10416 = vmatmul.mubr.msk.f32.gmra.mrb[18].mxu0 %vm547_vm0, %v3090_v61  ;;  %v15445_v61 = vld [vmem:[#allocation57_spill] sm:$0xff] }
 0x202   : > { %10418 = vmatprep.mubr.msk.f32.mxu0 %vm547_vm0, %v3091_v16  ;;  %v15447_v16 = vld [vmem:[#allocation61_spill] sm:$0xff] }
 0x205   : > { %10419 = vmatmul.mubr.msk.f32.gmra.mrb[20].mxu0 %vm547_vm0, %v3092_v9  ;;  %v15449_v9 = vld [vmem:[#allocation65_spill] sm:$0xff] }
 0x206   : > { %10421 = vmatprep.mubr.msk.f32.mxu0 %vm547_vm0, %v3093_v54  ;;  %v15451_v54 = vld [vmem:[#allocation69_spill] sm:$0xff] }
 0x209   : > { %10422 = vmatmul.mubr.msk.f32.gmra.mrb[22].mxu0 %vm547_vm0, %v3094_v12  ;;  %v15453_v12 = vld [vmem:[#allocation73_spill] sm:$0xff] }
 0x20a   : > { %10424 = vmatprep.mubr.msk.f32.mxu0 %vm547_vm0, %v3095_v25  ;;  %v15455_v25 = vld [vmem:[#allocation77_spill] sm:$0xff] }
 0x20d   : > { %10425 = vmatmul.mubr.msk.f32.gmra.mrb[24].mxu0 %vm547_vm0, %v3096_v4  ;;  %v15457_v4 = vld [vmem:[#allocation80_spill] sm:$0xff] }
 0x20e   : > { %10427 = vmatprep.mubr.msk.f32.mxu0 %vm547_vm0, %v3097_v24  ;;  %v15458_v24 = vld [vmem:[#allocation79_spill] sm:$0xff] }
 0x211   : > { %10428 = vmatmul.mubr.msk.f32.gmra.mrb[26].mxu0 %vm547_vm0, %v3098_v46  ;;  %v3882_v46 = vld [vmem:[%s11980_s12 + $0x11a] sm:$0xff] }
 0x212   : > { %10430 = vmatprep.mubr.msk.f32.mxu0 %vm547_vm0, %v3099_v36  ;;  %v3913_v36 = vmul.f32 %v3881_v59, %v13010_v29  ;;  %v9039_v29 = vld [vmem:[%s15042_s4 + $0x30] sm:$0xff] }
 0x215   : > { %10431 = vmatmul.mubr.msk.f32.gmra.mrb[28].mxu0 %vm547_vm0, %v3100_v17  ;;  %v3914_v17 = vmul.f32 %v3882_v46, %v13014_v56  ;;  %v9040_v56 = vld [vmem:[%s15042_s4 + $0x38] sm:$0xff] }
 0x216   : > { %10433 = vmatprep.mubr.msk.f32.mxu0 %vm547_vm0, %v3101_v28  ;;  %v9038_v28 = vld [vmem:[%s15042_s4 + $0x28] sm:$0xff]  ;;  %v11128_v19 = vpack.c.bf16 %v9040_v56, %v9039_v29 }
 0x219   : > { %10434 = vmatmul.mubr.msk.f32.gmra.mrb[30].mxu0 %vm547_vm0, %v3102_v39  ;;  %v11124_v39 = vpack.c.bf16 %v9038_v28, %v9037_v31 }
 0x21a   : > { %10444 = vmatprep.mubr.msk.f32.mxu0 %vm547_vm0, %v13148_v6  ;;  %v15414_v6 = vld [vmem:[#allocation10_spill] sm:$0xff] }
 0x21b   : > { %11125 = vmatprep.subr.bf16.mxu1 %v11124_v39 }
 0x21c   : > { %11127 = vmatpush3.bf16.msra.mxu1 %v11124_v39 }
 0x21d   : > { %10445 = vmatmul.mubr.msk.f32.vlgmr.msra.gmra.mrb[0].mxu0 %vm547_vm0, %v13161_v50  ;;  %v15415_v50 = vld [vmem:[#allocation9_spill] sm:$0xff]  ;;  %11129 = vmatprep.subr.bf16.mxu1 %v11128_v19 }
 0x21e   : > { %11119 = vmatpush3.bf16.msra.mxu0 %v13410_v45  ;;  %10447 = vmatprep.mubr.msk.f32.mxu0 %vm547_vm0, %v13164_v53  ;;  %v15416_v53 = vld [vmem:[#allocation13_spill] sm:$0xff] }
 0x21f   : > { %11121 = vmatprep.subr.bf16.mxu0 %v11120_v20  ;;  %v15424_v45 = vld [vmem:[#allocation21_spill] sm:$0xff] }
 0x220   : > { %11131 = vmatpush3.bf16.msra.mxu1 %v11128_v19 }
 0x221   : > { %10448 = vmatmul.mubr.msk.f32.gmra.mrb[2].mxu0 %vm547_vm0, %v13173_v51  ;;  %v15417_v51 = vld [vmem:[#allocation12_spill] sm:$0xff] }
 0x222   : > { %10450 = vmatprep.mubr.msk.f32.mxu0 %vm547_vm0, %v13176_v22  ;;  %11123 = vmatpush3.bf16.msra.mxu0 %v11120_v20  ;;  %v15418_v22 = vld [vmem:[#allocation14_spill] sm:$0xff] }
 0x223   : > { %v4707_v20 = vld [vmem:[#allocation2 + $0x9] sm:$0xff] }
 0x224   : > { %10557 = vmatmul.mubr.msk.f32.vlgmr.msra.gmra.mrb[0].mxu1 %vm547_vm0, %v4707_v20 }
 0x225   : > { %10451 = vmatmul.mubr.msk.f32.gmra.mrb[4].mxu0 %vm547_vm0, %v13184_v26  ;;  %v15419_v26 = vld [vmem:[#allocation11_spill] sm:$0xff] }
 0x226   : > { %10453 = vmatprep.mubr.msk.f32.mxu0 %vm547_vm0, %v13187_v8  ;;  %v15420_v8 = vld [vmem:[#allocation17_spill] sm:$0xff] }
 0x229   : > { %10454 = vmatmul.mubr.msk.f32.gmra.mrb[6].mxu0 %vm547_vm0, %v13194_v21  ;;  %v15421_v21 = vld [vmem:[#allocation16_spill] sm:$0xff] }
 0x22a   : > { %10456 = vmatprep.mubr.msk.f32.mxu0 %vm547_vm0, %v13197_v18  ;;  %v15422_v18 = vld [vmem:[#allocation18_spill] sm:$0xff] }
 0x22d   : > { %10457 = vmatmul.mubr.msk.f32.gmra.mrb[8].mxu0 %vm547_vm0, %v13204_v41  ;;  %v15423_v41 = vld [vmem:[#allocation15_spill] sm:$0xff] }
 0x22e   : > { %10459 = vmatprep.mubr.msk.f32.mxu0 %vm547_vm0, %v15411_v14  ;;  %v4702_v14 = vld [vmem:[%s15042_s4] sm:$0xff] }
 0x231   : > { %10460 = vmatmul.mubr.msk.f32.gmra.mrb[10].mxu0 %vm547_vm0, %v15412_v37  ;;  %v4703_v37 = vld [vmem:[%s15042_s4 + $0x8] sm:$0xff] }
 0x232   : > { %10462 = vmatprep.mubr.msk.f32.mxu0 %vm547_vm0, %v15413_v55  ;;  %v11132_v55 = vpack.c.bf16 %v4703_v37, %v4702_v14 }
 0x234   : > { %11133 = vmatprep.subr.bf16.mxu1 %v11132_v55 }
 0x235   : > { %10463 = vmatmul.mubr.msk.f32.gmra.mrb[12].mxu0 %vm547_vm0, %v15414_v6  ;;  %11135 = vmatpush3.bf16.msra.mxu1 %v11132_v55  ;;  %v4704_v6 = vld [vmem:[%s15042_s4 + $0x10] sm:$0xff] }
 0x236   : > { %10465 = vmatprep.mubr.msk.f32.mxu0 %vm547_vm0, %v15415_v50  ;;  %v4705_v50 = vld [vmem:[%s15042_s4 + $0x18] sm:$0xff] }
 0x239   : > { %10466 = vmatmul.mubr.msk.f32.gmra.mrb[14].mxu0 %vm547_vm0, %v15416_v53  ;;  %v11136_v53 = vpack.c.bf16 %v4705_v50, %v4704_v6 }
 0x23a   : > { %10468 = vmatprep.mubr.msk.f32.mxu0 %vm547_vm0, %v15417_v51  ;;  %v9137_v51 = vld [vmem:[%s15042_s4 + $0x40] sm:$0xff] }
 0x23b   : > { %11137 = vmatprep.subr.bf16.mxu1 %v11136_v53 }
 0x23c   : > { %11139 = vmatpush3.bf16.msra.mxu1 %v11136_v53 }
 0x23d   : > { %10469 = vmatmul.mubr.msk.f32.gmra.mrb[16].mxu0 %vm547_vm0, %v15418_v22  ;;  %v9138_v22 = vld [vmem:[%s15042_s4 + $0x48] sm:$0xff] }
 0x23e   : > { %10471 = vmatprep.mubr.msk.f32.mxu0 %vm547_vm0, %v15419_v26  ;;  %v13667_v26 = vpack.c.bf16 %v9138_v22, %v9137_v51 }
 0x240   : > { %11141 = vmatprep.subr.bf16.mxu1 %v13667_v26 }
 0x241   : > { %10472 = vmatmul.mubr.msk.f32.gmra.mrb[18].mxu0 %vm547_vm0, %v15420_v8  ;;  %v13673_v8 = vld [vmem:[%s15041_s3] ss:$0 sm:$0xff] }
 0x242   : > { %10474 = vmatprep.mubr.msk.f32.mxu0 %vm547_vm0, %v15421_v21 }
 0x245   : > { %10475 = vmatmul.mubr.msk.f32.gmra.mrb[20].mxu0 %vm547_vm0, %v15422_v18 }
 0x246   : > { %10477 = vmatprep.mubr.msk.f32.mxu0 %vm547_vm0, %v15423_v41 }
 0x249   : > { %10478 = vmatmul.mubr.msk.f32.gmra.mrb[22].mxu0 %vm547_vm0, %v15424_v45 }
 0x24a   : > { %10480 = vmatprep.mubr.msk.f32.mxu0 %vm547_vm0, %v15425_v38 }
 0x24d   : > { %10481 = vmatmul.mubr.msk.f32.gmra.mrb[24].mxu0 %vm547_vm0, %v15426_v3 }
 0x24e   : > { %10483 = vmatprep.mubr.msk.f32.mxu0 %vm547_vm0, %v15427_v35 }
 0x251   : > { %10484 = vmatmul.mubr.msk.f32.gmra.mrb[26].mxu0 %vm547_vm0, %v15428_v43 }
 0x252   : > { %10486 = vmatprep.mubr.msk.f32.mxu0 %vm547_vm0, %v15429_v7 }
 0x255   : > { %10487 = vmatmul.mubr.msk.f32.gmra.mrb[28].mxu0 %vm547_vm0, %v15430_v44  ;;  %v13681_v44 = vpop.permute.xlu0 %4512 }
 0x256   : > { %10489 = vmatprep.mubr.msk.f32.mxu0 %vm547_vm0, %v3491_v34  ;;  %15461 = vst [vmem:[#allocation23_spill] sm:$0xff] %v13681_v44 }
 0x259   : > { %10490 = vmatmul.mubr.msk.f32.gmra.mrb[30].mxu0 %vm547_vm0, %v3492_v48 }
 0x25a   : > { %10500 = vmatprep.mubr.msk.f32.mxu0 %vm547_vm0, %v15431_v15 }
 0x25d   : > { %10501 = vmatmul.mubr.msk.f32.vlgmr.msra.gmra.mrb[0].mxu0 %vm547_vm0, %v15432_v42 }
 0x25e   : > { %10503 = vmatprep.mubr.msk.f32.mxu0 %vm547_vm0, %v15433_v58 }
 0x261   : > { %10504 = vmatmul.mubr.msk.f32.gmra.mrb[2].mxu0 %vm547_vm0, %v15434_v52 }
 0x262   : > { %10506 = vmatprep.mubr.msk.f32.mxu0 %vm547_vm0, %v15435_v11  ;;  %v13685_v11 = vpop.permute.xlu1 %4517 }
 0x265   : > { %10507 = vmatmul.mubr.msk.f32.gmra.mrb[4].mxu0 %vm547_vm0, %v15436_v57 }
 0x266   : > { %10509 = vmatprep.mubr.msk.f32.mxu0 %vm547_vm0, %v15437_v13 }
 0x269   : > { %10510 = vmatmul.mubr.msk.f32.gmra.mrb[6].mxu0 %vm547_vm0, %v15438_v62 }
 0x26a   : > { %10512 = vmatprep.mubr.msk.f32.mxu0 %vm547_vm0, %v15439_v49 }
 0x26d   : > { %10513 = vmatmul.mubr.msk.f32.gmra.mrb[8].mxu0 %vm547_vm0, %v15440_v10  ;;  %v13689_v10 = vpop.permute.xlu0 %4522 }
 0x26e   : > { %10515 = vmatprep.mubr.msk.f32.mxu0 %vm547_vm0, %v15441_v5 }
 0x271   : > { %10516 = vmatmul.mubr.msk.f32.gmra.mrb[10].mxu0 %vm547_vm0, %v15442_v32 }
 0x272   : > { %10518 = vmatprep.mubr.msk.f32.mxu0 %vm547_vm0, %v15443_v2 }
 0x275   : > { %10519 = vmatmul.mubr.msk.f32.gmra.mrb[12].mxu0 %vm547_vm0, %v15444_v27 }
 0x276   : > { %10521 = vmatprep.mubr.msk.f32.mxu0 %vm547_vm0, %v15445_v61 }
 0x279   : > { %10522 = vmatmul.mubr.msk.f32.gmra.mrb[14].mxu0 %vm547_vm0, %v15446_v1 }
 0x27a   : > { %10524 = vmatprep.mubr.msk.f32.mxu0 %vm547_vm0, %v15447_v16  ;;  %v13697_v16 = vpop.permute.xlu1 %4527 }
 0x27d   : > { %10525 = vmatmul.mubr.msk.f32.gmra.mrb[16].mxu0 %vm547_vm0, %v15448_v30 }
 0x27e   : > { %10527 = vmatprep.mubr.msk.f32.mxu0 %vm547_vm0, %v15449_v9 }
 0x281   : > { %10528 = vmatmul.mubr.msk.f32.gmra.mrb[18].mxu0 %vm547_vm0, %v15450_v60 }
 0x282   : > { %10530 = vmatprep.mubr.msk.f32.mxu0 %vm547_vm0, %v15451_v54 }
 0x285   : > { %10531 = vmatmul.mubr.msk.f32.gmra.mrb[20].mxu0 %vm547_vm0, %v15452_v40 }
 0x286   : > { %10533 = vmatprep.mubr.msk.f32.mxu0 %vm547_vm0, %v15453_v12 }
 0x289   : > { %10534 = vmatmul.mubr.msk.f32.gmra.mrb[22].mxu0 %vm547_vm0, %v15454_v63 }
 0x28a   : > { %10536 = vmatprep.mubr.msk.f32.mxu0 %vm547_vm0, %v15455_v25  ;;  %v13709_v25 = vpop.permute.xlu0 %4532 }
 0x28d   : > { %10537 = vmatmul.mubr.msk.f32.gmra.mrb[24].mxu0 %vm547_vm0, %v15456_v23 }
 0x28e   : > { %10539 = vmatprep.mubr.msk.f32.mxu0 %vm547_vm0, %v15457_v4  ;;  %v13727_v29 = vpop.permute.xlu0 %4542 }
 0x291   : > { %10540 = vmatmul.mubr.msk.f32.gmra.mrb[26].mxu0 %vm547_vm0, %v15458_v24 }
 0x292   : > { %10542 = vmatprep.mubr.msk.f32.mxu0 %vm547_vm0, %v15459_v0 }
 0x295   : > { %10543 = vmatmul.mubr.msk.f32.gmra.mrb[28].mxu0 %vm547_vm0, %v15460_v47 }
 0x296   : > { %10545 = vmatprep.mubr.msk.f32.mxu0 %vm547_vm0, %v3913_v36  ;;  %v13717_v36 = vpop.permute.xlu1 %4537 }
 0x299   : > { %10546 = vmatmul.mubr.msk.f32.gmra.mrb[30].mxu0 %vm547_vm0, %v3914_v17 }
 0x29a   : > { %v13741_v55 = vpop.permute.xlu1 %4547 }
 0x330   : > { %v10502_v21 = vpop.f32.mrb[0].mxu0 }
 0x331   : > { %v4281_v18 = vadd.f32 %v10502_v21, %v13673_v8  ;;  %v4082_v41 = vpop.f32.mrb[1].mxu0 }
 0x332   : > { %v4280_v45 = vadd.f32 %v13673_v8, %v4082_v41  ;;  %v13753_v41 = vpop.permute.xlu0 %4552 }
 0x333   : > { %v4313_v38 = vmax.f32 %v4281_v18, 0.0 }
 0x334   : > { %v4312_v3 = vmax.f32 %v4280_v45, 0.0  ;;  %v10505_v35 = vpop.f32.mrb[2].mxu0 }
 0x335   : > { %4383 = vst.msk [vmem:[#allocation2 + $0x19] sm:$0xff] %vm547_vm0, %v4313_v38  ;;  %v4283_v43 = vadd.f32 %v10505_v35, %v13673_v8  ;;  %v4092_v7 = vpop.f32.mrb[3].mxu0 }
 0x336   : > { %4382 = vst.msk [vmem:[#allocation2 + $0x11] sm:$0xff] %vm547_vm0, %v4312_v3  ;;  %v4282_v34 = vadd.f32 %v13673_v8, %v4092_v7 }
 0x337   : > { %v4315_v48 = vmax.f32 %v4283_v43, 0.0 }
 0x338   : > { %v4314_v15 = vmax.f32 %v4282_v34, 0.0  ;;  %v10508_v42 = vpop.f32.mrb[4].mxu0  ;;  %v13761_v34 = vpop.permute.xlu1 %4557 }
 0x339   : > { %4385 = vst.msk [vmem:[#allocation2 + $0x29] sm:$0xff] %vm547_vm0, %v4315_v48  ;;  %v4285_v58 = vadd.f32 %v10508_v42, %v13673_v8  ;;  %v4102_v52 = vpop.f32.mrb[5].mxu0 }
 0x33a   : > { %4384 = vst.msk [vmem:[#allocation2 + $0x21] sm:$0xff] %vm547_vm0, %v4314_v15  ;;  %v4284_v57 = vadd.f32 %v13673_v8, %v4102_v52 }
 0x33b   : > { %v4317_v13 = vmax.f32 %v4285_v58, 0.0 }
 0x33c   : > { %v4316_v62 = vmax.f32 %v4284_v57, 0.0  ;;  %v10511_v49 = vpop.f32.mrb[6].mxu0  ;;  %v4709_v61 = vld [vmem:[#allocation2 + $0x19] sm:$0xff]  ;;  %v13771_v57 = vpop.permute.xlu0 %4562 }
 0x33d   : > { %4387 = vst.msk [vmem:[#allocation2 + $0x39] sm:$0xff] %vm547_vm0, %v4317_v13  ;;  %v4287_v5 = vadd.f32 %v10511_v49, %v13673_v8  ;;  %v4112_v32 = vpop.f32.mrb[7].mxu0  ;;  %v4708_v2 = vld [vmem:[#allocation2 + $0x11] sm:$0xff] }
 0x33e   : > { %4386 = vst.msk [vmem:[#allocation2 + $0x31] sm:$0xff] %vm547_vm0, %v4316_v62  ;;  %v4286_v27 = vadd.f32 %v13673_v8, %v4112_v32  ;;  %10559 = vmatprep.mubr.msk.f32.mxu1 %vm547_vm0, %v4708_v2 }
 0x33f   : > { %v4319_v1 = vmax.f32 %v4287_v5, 0.0  ;;  %10560 = vmatmul.mubr.msk.f32.gmra.mrb[2].mxu1 %vm547_vm0, %v4709_v61 }
 0x340   : > { %v4318_v30 = vmax.f32 %v4286_v27, 0.0  ;;  %v10514_v9 = vpop.f32.mrb[8].mxu0  ;;  %v13707_v63 = vld [vmem:[#allocation2 + $0x29] sm:$0xff]  ;;  %v13785_v27 = vpop.permute.xlu1 %4567 }
 0x341   : > { %4389 = vst.msk [vmem:[#allocation2 + $0x49] sm:$0xff] %vm547_vm0, %v4319_v1  ;;  %v4289_v60 = vadd.f32 %v10514_v9, %v13673_v8  ;;  %v4122_v54 = vpop.f32.mrb[9].mxu0  ;;  %v13701_v40 = vld [vmem:[#allocation2 + $0x21] sm:$0xff]  ;;  %15463 = vst [vmem:[#allocation28_spill] sm:$0xff] %v13707_v63 }
 0x342   : > { %15462 = vst [vmem:[#allocation29_spill] sm:$0xff] %v13701_v40  ;;  %4388 = vst.msk [vmem:[#allocation2 + $0x41] sm:$0xff] %vm547_vm0, %v4318_v30  ;;  %v4288_v12 = vadd.f32 %v13673_v8, %v4122_v54  ;;  %10562 = vmatprep.mubr.msk.f32.mxu1 %vm547_vm0, %v13701_v40 }
 0x343   : > { %v4321_v23 = vmax.f32 %v4289_v60, 0.0  ;;  %10563 = vmatmul.mubr.msk.f32.gmra.mrb[4].mxu1 %vm547_vm0, %v13707_v63 }
 0x344   : > { %v4320_v4 = vmax.f32 %v4288_v12, 0.0  ;;  %v10517_v59 = vpop.f32.mrb[10].mxu0  ;;  %v13723_v17 = vld [vmem:[#allocation2 + $0x39] sm:$0xff] }
 0x345   : > { %4391 = vst.msk [vmem:[#allocation2 + $0x59] sm:$0xff] %vm547_vm0, %v4321_v23  ;;  %v4291_v24 = vadd.f32 %v10517_v59, %v13673_v8  ;;  %v4132_v0 = vpop.f32.mrb[11].mxu0  ;;  %v13715_v46 = vld [vmem:[#allocation2 + $0x31] sm:$0xff]  ;;  %15465 = vst [vmem:[#allocation32_spill] sm:$0xff] %v13723_v17  ;;  %v13797_v23 = vpop.permute.xlu0 %4572 }
 0x346   : > { %15464 = vst [vmem:[#allocation27_spill] sm:$0xff] %v13715_v46  ;;  %4390 = vst.msk [vmem:[#allocation2 + $0x51] sm:$0xff] %vm547_vm0, %v4320_v4  ;;  %v4290_v47 = vadd.f32 %v13673_v8, %v4132_v0  ;;  %10565 = vmatprep.mubr.msk.f32.mxu1 %vm547_vm0, %v13715_v46 }
 0x347   : > { %v4323_v31 = vmax.f32 %v4291_v24, 0.0  ;;  %10566 = vmatmul.mubr.msk.f32.gmra.mrb[6].mxu1 %vm547_vm0, %v13723_v17 }
 0x348   : > { %v4322_v28 = vmax.f32 %v4290_v47, 0.0  ;;  %v10520_v39 = vpop.f32.mrb[12].mxu0  ;;  %v13737_v14 = vld [vmem:[#allocation2 + $0x49] sm:$0xff] }
 0x349   : > { %4393 = vst.msk [vmem:[#allocation2 + $0x69] sm:$0xff] %vm547_vm0, %v4323_v31  ;;  %v4293_v56 = vadd.f32 %v10520_v39, %v13673_v8  ;;  %v4142_v19 = vpop.f32.mrb[13].mxu0  ;;  %v13731_v33 = vld [vmem:[#allocation2 + $0x41] sm:$0xff]  ;;  %15467 = vst [vmem:[#allocation36_spill] sm:$0xff] %v13737_v14 }
 0x34a   : > { %15466 = vst [vmem:[#allocation30_spill] sm:$0xff] %v13731_v33  ;;  %4392 = vst.msk [vmem:[#allocation2 + $0x61] sm:$0xff] %vm547_vm0, %v4322_v28  ;;  %v4292_v20 = vadd.f32 %v13673_v8, %v4142_v19  ;;  %10568 = vmatprep.mubr.msk.f32.mxu1 %vm547_vm0, %v13731_v33  ;;  %v13805_v28 = vpop.permute.xlu1 %4577 }
 0x34b   : > { %v4325_v37 = vmax.f32 %v4293_v56, 0.0  ;;  %10569 = vmatmul.mubr.msk.f32.gmra.mrb[8].mxu1 %vm547_vm0, %v13737_v14 }
 0x34c   : > { %v4324_v6 = vmax.f32 %v4292_v20, 0.0  ;;  %v10523_v50 = vpop.f32.mrb[14].mxu0  ;;  %v13751_v18 = vld [vmem:[#allocation2 + $0x59] sm:$0xff] }
 0x34d   : > { %4395 = vst.msk [vmem:[#allocation2 + $0x79] sm:$0xff] %vm547_vm0, %v4325_v37  ;;  %v4295_v53 = vadd.f32 %v10523_v50, %v13673_v8  ;;  %v4152_v51 = vpop.f32.mrb[15].mxu0  ;;  %v13745_v22 = vld [vmem:[#allocation2 + $0x51] sm:$0xff]  ;;  %15469 = vst [vmem:[#allocation44_spill] sm:$0xff] %v13751_v18 }
 0x34e   : > { %15468 = vst [vmem:[#allocation39_spill] sm:$0xff] %v13745_v22  ;;  %4394 = vst.msk [vmem:[#allocation2 + $0x71] sm:$0xff] %vm547_vm0, %v4324_v6  ;;  %v4294_v21 = vadd.f32 %v13673_v8, %v4152_v51  ;;  %10571 = vmatprep.mubr.msk.f32.mxu1 %vm547_vm0, %v13745_v22  ;;  %v13815_v6 = vpop.permute.xlu0 %4582 }
 0x34f   : > { %v4327_v45 = vmax.f32 %v4295_v53, 0.0  ;;  %10572 = vmatmul.mubr.msk.f32.gmra.mrb[10].mxu1 %vm547_vm0, %v13751_v18 }
 0x350   : > { %v4326_v38 = vmax.f32 %v4294_v21, 0.0  ;;  %v10526_v3 = vpop.f32.mrb[16].mxu0  ;;  %v13767_v15 = vld [vmem:[#allocation2 + $0x69] sm:$0xff] }
 0x351   : > { %4397 = vst.msk [vmem:[#allocation2 + $0x89] sm:$0xff] %vm547_vm0, %v4327_v45  ;;  %v4297_v35 = vadd.f32 %v10526_v3, %v13673_v8  ;;  %v4162_v43 = vpop.f32.mrb[17].mxu0  ;;  %v13759_v7 = vld [vmem:[#allocation2 + $0x61] sm:$0xff]  ;;  %15471 = vst [vmem:[#allocation48_spill] sm:$0xff] %v13767_v15  ;;  %v13829_v3 = vpop.permute.xlu1 %4587 }
 0x352   : > { %15470 = vst [vmem:[#allocation42_spill] sm:$0xff] %v13759_v7  ;;  %4396 = vst.msk [vmem:[#allocation2 + $0x81] sm:$0xff] %vm547_vm0, %v4326_v38  ;;  %v4296_v48 = vadd.f32 %v13673_v8, %v4162_v43  ;;  %10574 = vmatprep.mubr.msk.f32.mxu1 %vm547_vm0, %v13759_v7 }
 0x353   : > { %v4329_v42 = vmax.f32 %v4297_v35, 0.0  ;;  %10575 = vmatmul.mubr.msk.f32.gmra.mrb[12].mxu1 %vm547_vm0, %v13767_v15 }
 0x354   : > { %v4328_v58 = vmax.f32 %v4296_v48, 0.0  ;;  %v10529_v52 = vpop.f32.mrb[18].mxu0  ;;  %v13781_v32 = vld [vmem:[#allocation2 + $0x79] sm:$0xff] }
 0x355   : > { %4399 = vst.msk [vmem:[#allocation2 + $0x99] sm:$0xff] %vm547_vm0, %v4329_v42  ;;  %v4299_v13 = vadd.f32 %v10529_v52, %v13673_v8  ;;  %v4172_v62 = vpop.f32.mrb[19].mxu0  ;;  %v13775_v49 = vld [vmem:[#allocation2 + $0x71] sm:$0xff]  ;;  %15473 = vst [vmem:[#allocation52_spill] sm:$0xff] %v13781_v32 }
 0x356   : > { %15472 = vst [vmem:[#allocation46_spill] sm:$0xff] %v13775_v49  ;;  %4398 = vst.msk [vmem:[#allocation2 + $0x91] sm:$0xff] %vm547_vm0, %v4328_v58  ;;  %v4298_v5 = vadd.f32 %v13673_v8, %v4172_v62  ;;  %10577 = vmatprep.mubr.msk.f32.mxu1 %vm547_vm0, %v13775_v49  ;;  %v13841_v62 = vpop.permute.xlu0 %4592 }
 0x357   : > { %v4331_v2 = vmax.f32 %v4299_v13, 0.0  ;;  %10578 = vmatmul.mubr.msk.f32.gmra.mrb[14].mxu1 %vm547_vm0, %v13781_v32  ;;  %15482 = vst [vmem:[#allocation66_spill] sm:$0xff] %v13841_v62 }
 0x358   : > { %v4330_v61 = vmax.f32 %v4298_v5, 0.0  ;;  %v10532_v1 = vpop.f32.mrb[20].mxu0  ;;  %v13795_v12 = vld [vmem:[#allocation2 + $0x89] sm:$0xff] }
 0x359   : > { %4401 = vst.msk [vmem:[#allocation2 + $0xa9] sm:$0xff] %vm547_vm0, %v4331_v2  ;;  %v4301_v30 = vadd.f32 %v10532_v1, %v13673_v8  ;;  %v4182_v9 = vpop.f32.mrb[21].mxu0  ;;  %v13789_v60 = vld [vmem:[#allocation2 + $0x81] sm:$0xff]  ;;  %15475 = vst [vmem:[#allocation56_spill] sm:$0xff] %v13795_v12 }
 0x35a   : > { %15474 = vst [vmem:[#allocation50_spill] sm:$0xff] %v13789_v60  ;;  %4400 = vst.msk [vmem:[#allocation2 + $0xa1] sm:$0xff] %vm547_vm0, %v4330_v61  ;;  %v4300_v54 = vadd.f32 %v13673_v8, %v4182_v9  ;;  %10580 = vmatprep.mubr.msk.f32.mxu1 %vm547_vm0, %v13789_v60  ;;  %v14010_v32 = vld [vmem:[#allocation2 + $0x88] sm:$0xff] }
 0x35b   : > { %v4333_v4 = vmax.f32 %v4301_v30, 0.0  ;;  %10581 = vmatmul.mubr.msk.f32.gmra.mrb[16].mxu1 %vm547_vm0, %v13795_v12  ;;  %v14001_v12 = vld [vmem:[#allocation2 + $0x80] sm:$0xff] }
 0x35c   : > { %v4332_v59 = vmax.f32 %v4300_v54, 0.0  ;;  %v10535_v24 = vpop.f32.mrb[22].mxu0  ;;  %v13811_v56 = vld [vmem:[#allocation2 + $0x99] sm:$0xff]  ;;  %v13849_v54 = vpop.permute.xlu1 %4597 }
 0x35d   : > { %4403 = vst.msk [vmem:[#allocation2 + $0xb9] sm:$0xff] %vm547_vm0, %v4333_v4  ;;  %v4303_v0 = vadd.f32 %v10535_v24, %v13673_v8  ;;  %v4192_v47 = vpop.f32.mrb[23].mxu0  ;;  %v13803_v31 = vld [vmem:[#allocation2 + $0x91] sm:$0xff]  ;;  %15477 = vst [vmem:[#allocation60_spill] sm:$0xff] %v13811_v56 }
 0x35e   : > { %15476 = vst [vmem:[#allocation54_spill] sm:$0xff] %v13803_v31  ;;  %4402 = vst.msk [vmem:[#allocation2 + $0xb1] sm:$0xff] %vm547_vm0, %v4332_v59  ;;  %v4302_v39 = vadd.f32 %v13673_v8, %v4192_v47  ;;  %10583 = vmatprep.mubr.msk.f32.mxu1 %vm547_vm0, %v13803_v31  ;;  %v13998_v31 = vld [vmem:[#allocation2 + $0x78] sm:$0xff]  ;;  %v14015_v15 = vld [vmem:[#allocation2 + $0x90] sm:$0xff] }
 0x35f   : > { %v4335_v19 = vmax.f32 %v4303_v0, 0.0  ;;  %10584 = vmatmul.mubr.msk.f32.gmra.mrb[18].mxu1 %vm547_vm0, %v13811_v56  ;;  %15484 = vst [vmem:[#allocation70_spill] sm:$0xff] %v13849_v54  ;;  %v14024_v18 = vld [vmem:[#allocation2 + $0x98] sm:$0xff] }
 0x360   : > { %v4334_v20 = vmax.f32 %v4302_v39, 0.0  ;;  %v10538_v37 = vpop.f32.mrb[24].mxu0  ;;  %v13825_v45 = vld [vmem:[#allocation2 + $0xa9] sm:$0xff]  ;;  %v13859_v39 = vpop.permute.xlu0 %4602 }
 0x361   : > { %4405 = vst.msk [vmem:[#allocation2 + $0xc9] sm:$0xff] %vm547_vm0, %v4335_v19  ;;  %v4305_v50 = vadd.f32 %v10538_v37, %v13673_v8  ;;  %v4202_v53 = vpop.f32.mrb[25].mxu0  ;;  %v13819_v51 = vld [vmem:[#allocation2 + $0xa1] sm:$0xff]  ;;  %15479 = vst [vmem:[#allocation64_spill] sm:$0xff] %v13825_v45  ;;  %v4688_v7 = vmul.f32 %v13859_v39, %v14015_v15 }
 0x362   : > { %15478 = vst [vmem:[#allocation58_spill] sm:$0xff] %v13819_v51  ;;  %4404 = vst.msk [vmem:[#allocation2 + $0xc1] sm:$0xff] %vm547_vm0, %v4334_v20  ;;  %v4304_v21 = vadd.f32 %v13673_v8, %v4202_v53  ;;  %10586 = vmatprep.mubr.msk.f32.mxu1 %vm547_vm0, %v13819_v51  ;;  %v13989_v51 = vld [vmem:[#allocation2 + $0x70] sm:$0xff]  ;;  %v14027_v22 = vld [vmem:[#allocation2 + $0xa0] sm:$0xff] }
 0x363   : > { %v4337_v38 = vmax.f32 %v4305_v50, 0.0  ;;  %10587 = vmatmul.mubr.msk.f32.gmra.mrb[20].mxu1 %vm547_vm0, %v13825_v45  ;;  %15486 = vst [vmem:[#allocation74_spill] sm:$0xff] %v13859_v39  ;;  %v13986_v45 = vld [vmem:[#allocation2 + $0x68] sm:$0xff]  ;;  %v4684_v56 = vmul.f32 %v13815_v6, %v13989_v51 }
 0x364   : > { %v4336_v35 = vmax.f32 %v4304_v21, 0.0  ;;  %v10541_v43 = vpop.f32.mrb[26].mxu0  ;;  %v13839_v13 = vld [vmem:[#allocation2 + $0xb9] sm:$0xff]  ;;  %v14036_v33 = vld [vmem:[#allocation2 + $0xa8] sm:$0xff] }
 0x365   : > { %4407 = vst.msk [vmem:[#allocation2 + $0xd9] sm:$0xff] %vm547_vm0, %v4337_v38  ;;  %v4307_v48 = vadd.f32 %v10541_v43, %v13673_v8  ;;  %v4212_v42 = vpop.f32.mrb[27].mxu0  ;;  %v13833_v58 = vld [vmem:[#allocation2 + $0xb1] sm:$0xff]  ;;  %15481 = vst [vmem:[#allocation68_spill] sm:$0xff] %v13839_v13  ;;  %v13873_v38 = vpop.permute.xlu1 %4607 }
 0x366   : > { %15480 = vst [vmem:[#allocation62_spill] sm:$0xff] %v13833_v58  ;;  %4406 = vst.msk [vmem:[#allocation2 + $0xd1] sm:$0xff] %vm547_vm0, %v4336_v35  ;;  %v4306_v52 = vadd.f32 %v13673_v8, %v4212_v42  ;;  %10589 = vmatprep.mubr.msk.f32.mxu1 %vm547_vm0, %v13833_v58  ;;  %v13883_v42 = vpop.permute.xlu0 %4612  ;;  %v14039_v17 = vld [vmem:[#allocation2 + $0xb0] sm:$0xff]  ;;  %v14048_v63 = vld [vmem:[#allocation2 + $0xb8] sm:$0xff] }
 0x367   : > { %v4339_v5 = vmax.f32 %v4307_v48, 0.0  ;;  %10590 = vmatmul.mubr.msk.f32.gmra.mrb[22].mxu1 %vm547_vm0, %v13839_v13  ;;  %15489 = vst [vmem:[#allocation8_spill] sm:$0xff] %v13873_v38  ;;  %v4446_v48 = vld [vmem:[#allocation2] sm:$0xff]  ;;  %15492 = vst [vmem:[#allocation9_spill] sm:$0xff] %v13883_v42  ;;  %v4690_v14 = vmul.f32 %v13883_v42, %v14027_v22 }
 0x368   : > { %v4338_v2 = vmax.f32 %v4306_v52, 0.0  ;;  %v10544_v61 = vpop.f32.mrb[28].mxu0  ;;  %v13855_v59 = vld [vmem:[#allocation2 + $0xc9] sm:$0xff]  ;;  %v13977_v13 = vld [vmem:[#allocation2 + $0x60] sm:$0xff]  ;;  %15509 = vst [vmem:[#allocation31_spill] sm:$0xff] %v14036_v33  ;;  %15510 = vst [vmem:[#allocation35_spill] sm:$0xff] %v14039_v17 }
 0x369   : > { %4409 = vst.msk [vmem:[#allocation2 + $0xe9] sm:$0xff] %vm547_vm0, %v4339_v5  ;;  %v4309_v1 = vadd.f32 %v10544_v61, %v13673_v8  ;;  %v4222_v30 = vpop.f32.mrb[29].mxu0  ;;  %v13847_v9 = vld [vmem:[#allocation2 + $0xc1] sm:$0xff]  ;;  %15485 = vst [vmem:[#allocation76_spill] sm:$0xff] %v13855_v59  ;;  %v13890_v61 = vpop.permute.xlu1 %4617  ;;  %v4682_v58 = vmul.f32 %v13797_v23, %v13977_v13 }
 0x36a   : > { %15483 = vst [vmem:[#allocation72_spill] sm:$0xff] %v13847_v9  ;;  %4408 = vst.msk [vmem:[#allocation2 + $0xe1] sm:$0xff] %vm547_vm0, %v4338_v2  ;;  %v4308_v4 = vadd.f32 %v13673_v8, %v4222_v30  ;;  %10592 = vmatprep.mubr.msk.f32.mxu1 %vm547_vm0, %v13847_v9  ;;  %v4447_v52 = vld [vmem:[#allocation2 + $0x8] sm:$0xff]  ;;  %v4670_v2 = vmul.f32 %v13681_v44, %v4446_v48  ;;  %v9139_v30 = vld [vmem:[%s15042_s4 + $0x50] sm:$0xff] }
 0x36b   : > { %v4341_v24 = vmax.f32 %v4309_v1, 0.0  ;;  %10593 = vmatmul.mubr.msk.f32.gmra.mrb[24].mxu1 %vm547_vm0, %v13855_v59  ;;  %15494 = vst [vmem:[#allocation12_spill] sm:$0xff] %v13890_v61  ;;  %v13921_v48 = vld [vmem:[#allocation2 + $0x20] sm:$0xff]  ;;  %v13972_v59 = vld [vmem:[#allocation2 + $0x58] sm:$0xff]  ;;  %15512 = vst [vmem:[#allocation38_spill] sm:$0xff] %v14048_v63 }
 0x36c   : > { %v4340_v0 = vmax.f32 %v4308_v4, 0.0  ;;  %v10547_v47 = vpop.f32.mrb[30].mxu0  ;;  %v13869_v53 = vld [vmem:[#allocation2 + $0xd9] sm:$0xff] }
 0x36d   : > { %4411 = vst.msk [vmem:[#allocation2 + $0xf9] sm:$0xff] %vm547_vm0, %v4341_v24  ;;  %v4311_v19 = vadd.f32 %v10547_v47, %v13673_v8  ;;  %v4232_v20 = vpop.f32.mrb[31].mxu0  ;;  %v13863_v37 = vld [vmem:[#allocation2 + $0xd1] sm:$0xff]  ;;  %15488 = vst [vmem:[#allocation6_spill] sm:$0xff] %v13869_v53  ;;  %v13908_v47 = vpop.permute.xlu0 %4622  ;;  %v14053_v42 = vld [vmem:[#allocation2 + $0xc0] sm:$0xff] }
 0x36e   : > { %15487 = vst [vmem:[#allocation78_spill] sm:$0xff] %v13863_v37  ;;  %4410 = vst.msk [vmem:[#allocation2 + $0xf1] sm:$0xff] %vm547_vm0, %v4340_v0  ;;  %v4310_v50 = vadd.f32 %v13673_v8, %v4232_v20  ;;  %10595 = vmatprep.mubr.msk.f32.mxu1 %vm547_vm0, %v13863_v37  ;;  %v9140_v4 = vld [vmem:[%s15042_s4 + $0x58] sm:$0xff]  ;;  %v13904_v24 = vld [vmem:[#allocation2 + $0x10] sm:$0xff]  ;;  %v4671_v0 = vmul.f32 %v13685_v11, %v4447_v52  ;;  %v13923_v52 = vpop.permute.xlu1 %4627 }
 0x36f   : > { %v4343_v21 = vmax.f32 %v4311_v19, 0.0  ;;  %10596 = vmatmul.mubr.msk.f32.gmra.mrb[26].mxu1 %vm547_vm0, %v13869_v53  ;;  %15496 = vst [vmem:[#allocation11_spill] sm:$0xff] %v13908_v47  ;;  %v11144_v19 = vpack.c.bf16 %v9140_v4, %v9139_v30  ;;  %v4672_v20 = vmul.f32 %v13689_v10, %v13904_v24  ;;  %15497 = vst [vmem:[#allocation17_spill] sm:$0xff] %v13923_v52  ;;  %v13963_v53 = vld [vmem:[#allocation2 + $0x50] sm:$0xff] }
 0x370   : > { %v4342_v35 = vmax.f32 %v4310_v50, 0.0  ;;  %v13881_v8 = vld [vmem:[#allocation2 + $0xe9] sm:$0xff]  ;;  %v13912_v50 = vld [vmem:[#allocation2 + $0x18] sm:$0xff]  ;;  %v4674_v4 = vmul.f32 %v13709_v25, %v13921_v48  ;;  %15514 = vst [vmem:[#allocation41_spill] sm:$0xff] %v14053_v42 }
 0x371   : > { %4413 = vst.msk [vmem:[#allocation2 + $0x109] sm:$0xff] %vm547_vm0, %v4343_v21  ;;  %v13876_v43 = vld [vmem:[#allocation2 + $0xe1] sm:$0xff]  ;;  %15491 = vst [vmem:[#allocation10_spill] sm:$0xff] %v13881_v8 }
 0x372   : > { %15490 = vst [vmem:[#allocation7_spill] sm:$0xff] %v13876_v43  ;;  %4412 = vst.msk [vmem:[#allocation2 + $0x101] sm:$0xff] %vm547_vm0, %v4342_v35  ;;  %10598 = vmatprep.mubr.msk.f32.mxu1 %vm547_vm0, %v13876_v43  ;;  %v9173_v21 = vld [vmem:[%s15042_s4 + $0x60] sm:$0xff]  ;;  %v9174_v35 = vld [vmem:[%s15042_s4 + $0x68] sm:$0xff] }
 0x373   : > { %10599 = vmatmul.mubr.msk.f32.gmra.mrb[28].mxu1 %vm547_vm0, %v13881_v8  ;;  %v13929_v30 = vpack.c.bf16 %v9174_v35, %v9173_v21  ;;  %v13948_v35 = vld [vmem:[#allocation2 + $0x38] sm:$0xff]  ;;  %v13960_v43 = vld [vmem:[#allocation2 + $0x48] sm:$0xff] }
 0x374   : > { %v13894_v1 = vld [vmem:[#allocation2 + $0xf9] sm:$0xff] }
 0x375   : > { %v13887_v5 = vld [vmem:[#allocation2 + $0xf1] sm:$0xff]  ;;  %15495 = vst [vmem:[#allocation14_spill] sm:$0xff] %v13894_v1 }
 0x376   : > { %15493 = vst [vmem:[#allocation13_spill] sm:$0xff] %v13887_v5  ;;  %10601 = vmatprep.mubr.msk.f32.mxu1 %vm547_vm0, %v13887_v5  ;;  %v13938_v5 = vld [vmem:[#allocation2 + $0x30] sm:$0xff] }
 0x377   : > { %10602 = vmatmul.mubr.msk.f32.gmra.mrb[30].mxu1 %vm547_vm0, %v13894_v1  ;;  %v13933_v1 = vld [vmem:[#allocation2 + $0x28] sm:$0xff]  ;;  %v4676_v21 = vmul.f32 %v13727_v29, %v13938_v5 }
 0x378   : > { %10612 = vmatprep.mubr.msk.f32.mxu1 %vm547_vm0, %v4670_v2  ;;  %v4673_v2 = vmul.f32 %v13697_v16, %v13912_v50 }
 0x37b   : > { %10613 = vmatmul.mubr.msk.f32.vlgmr.msra.gmra.mrb[0].mxu1 %vm547_vm0, %v4671_v0  ;;  %v13935_v0 = vpop.permute.xlu0 %4632 }
 0x37c   : > { %11143 = vmatpush3.bf16.msra.mxu1 %v13667_v26  ;;  %10615 = vmatprep.mubr.msk.f32.mxu1 %vm547_vm0, %v4672_v20  ;;  %15498 = vst [vmem:[#allocation16_spill] sm:$0xff] %v13935_v0  ;;  %v4675_v26 = vmul.f32 %v13717_v36, %v13933_v1  ;;  %v13944_v20 = vpop.permute.xlu1 %4637 }
 0x37d   : > { %11145 = vmatprep.subr.bf16.mxu1 %v11144_v19  ;;  %15499 = vst [vmem:[#allocation18_spill] sm:$0xff] %v13944_v20 }
 0x37f   : > { %10616 = vmatmul.mubr.msk.f32.gmra.mrb[2].mxu1 %vm547_vm0, %v4673_v2  ;;  %v13951_v2 = vld [vmem:[#allocation2 + $0x40] sm:$0xff] }
 0x380   : > { %10618 = vmatprep.mubr.msk.f32.mxu1 %vm547_vm0, %v4674_v4  ;;  %11147 = vmatpush3.bf16.msra.mxu1 %v11144_v19  ;;  %v13954_v4 = vpop.permute.xlu0 %4642  ;;  %v4677_v19 = vmul.f32 %v13741_v55, %v13948_v35  ;;  %v4678_v8 = vmul.f32 %v13753_v41, %v13951_v2  ;;  %v13965_v37 = vpop.permute.xlu1 %4647 }
 0x381   : > { %11149 = vmatprep.subr.bf16.mxu1 %v13929_v30  ;;  %15500 = vst [vmem:[#allocation15_spill] sm:$0xff] %v13954_v4  ;;  %15501 = vst [vmem:[#allocation21_spill] sm:$0xff] %v13965_v37 }
 0x383   : > { %10619 = vmatmul.mubr.msk.f32.gmra.mrb[4].mxu1 %vm547_vm0, %v4675_v26  ;;  %v4679_v26 = vmul.f32 %v13761_v34, %v13960_v43 }
 0x384   : > { %10621 = vmatprep.mubr.msk.f32.mxu1 %vm547_vm0, %v4676_v21  ;;  %v4680_v21 = vmul.f32 %v13771_v57, %v13963_v53  ;;  %v13974_v9 = vpop.permute.xlu0 %4652 }
 0x385   : > { %15502 = vst [vmem:[#allocation20_spill] sm:$0xff] %v13974_v9 }
 0x387   : > { %10622 = vmatmul.mubr.msk.f32.gmra.mrb[6].mxu1 %vm547_vm0, %v4677_v19  ;;  %v4681_v19 = vmul.f32 %v13785_v27, %v13972_v59 }
 0x388   : > { %10624 = vmatprep.mubr.msk.f32.mxu1 %vm547_vm0, %v4678_v8  ;;  %v13982_v8 = vpop.permute.xlu1 %4657 }
 0x389   : > { %15503 = vst [vmem:[#allocation22_spill] sm:$0xff] %v13982_v8 }
 0x38b   : > { %10625 = vmatmul.mubr.msk.f32.gmra.mrb[8].mxu1 %vm547_vm0, %v4679_v26  ;;  %v13992_v26 = vpop.permute.xlu0 %4662 }
 0x38c   : > { %10627 = vmatprep.mubr.msk.f32.mxu1 %vm547_vm0, %v4680_v21  ;;  %15504 = vst [vmem:[#allocation19_spill] sm:$0xff] %v13992_v26  ;;  %v4683_v21 = vmul.f32 %v13805_v28, %v13986_v45  ;;  %v14003_v60 = vpop.permute.xlu1 %4667 }
 0x38d   : > { %15505 = vst [vmem:[#allocation25_spill] sm:$0xff] %v14003_v60 }
 0x38f   : > { %10628 = vmatmul.mubr.msk.f32.gmra.mrb[10].mxu1 %vm547_vm0, %v4681_v19  ;;  %v4686_v19 = vmul.f32 %v13841_v62, %v14001_v12  ;;  %v14012_v49 = vpop.permute.xlu0 %5451 }
 0x390   : > { %10630 = vmatprep.mubr.msk.f32.mxu1 %vm547_vm0, %v4682_v58  ;;  %v4685_v58 = vmul.f32 %v13829_v3, %v13998_v31  ;;  %15506 = vst [vmem:[#allocation24_spill] sm:$0xff] %v14012_v49 }
 0x393   : > { %10631 = vmatmul.mubr.msk.f32.gmra.mrb[12].mxu1 %vm547_vm0, %v4683_v21  ;;  %v4687_v21 = vmul.f32 %v13849_v54, %v14010_v32 }
 0x394   : > { %10633 = vmatprep.mubr.msk.f32.mxu1 %vm547_vm0, %v4684_v56  ;;  %v14020_v56 = vpop.permute.xlu1 %5456 }
 0x395   : > { %15507 = vst [vmem:[#allocation26_spill] sm:$0xff] %v14020_v56 }
 0x397   : > { %10634 = vmatmul.mubr.msk.f32.gmra.mrb[14].mxu1 %vm547_vm0, %v4685_v58  ;;  %v14030_v58 = vpop.permute.xlu0 %5461 }
 0x398   : > { %10636 = vmatprep.mubr.msk.f32.mxu1 %vm547_vm0, %v4686_v19  ;;  %15508 = vst [vmem:[#allocation33_spill] sm:$0xff] %v14030_v58  ;;  %v4689_v19 = vmul.f32 %v13873_v38, %v14024_v18  ;;  %v14041_v46 = vpop.permute.xlu1 %5466  ;;  %v14062_v38 = vld [vmem:[#allocation2 + $0xc8] sm:$0xff] }
 0x399   : > { %15511 = vst [vmem:[#allocation34_spill] sm:$0xff] %v14041_v46  ;;  %15516 = vst [vmem:[#allocation45_spill] sm:$0xff] %v14062_v38 }
 0x39b   : > { %10637 = vmatmul.mubr.msk.f32.gmra.mrb[16].mxu1 %vm547_vm0, %v4687_v21  ;;  %v4692_v21 = vmul.f32 %v13908_v47, %v14039_v17  ;;  %v14050_v40 = vpop.permute.xlu0 %5471  ;;  %v14065_v47 = vld [vmem:[#allocation2 + $0xd0] sm:$0xff] }
 0x39c   : > { %10639 = vmatprep.mubr.msk.f32.mxu1 %vm547_vm0, %v4688_v7  ;;  %v4691_v7 = vmul.f32 %v13890_v61, %v14036_v33  ;;  %15513 = vst [vmem:[#allocation37_spill] sm:$0xff] %v14050_v40  ;;  %v4694_v61 = vmul.f32 %v13935_v0, %v14053_v42  ;;  %15517 = vst [vmem:[#allocation43_spill] sm:$0xff] %v14065_v47  ;;  %v14077_v0 = vld [vmem:[#allocation2 + $0xe0] sm:$0xff] }
 0x39d   : > { %15520 = vst [vmem:[#allocation53_spill] sm:$0xff] %v14077_v0 }
 0x39f   : > { %10640 = vmatmul.mubr.msk.f32.gmra.mrb[18].mxu1 %vm547_vm0, %v4689_v19  ;;  %v4693_v19 = vmul.f32 %v13923_v52, %v14048_v63  ;;  %v4696_v52 = vmul.f32 %v13954_v4, %v14065_v47  ;;  %v14074_v63 = vld [vmem:[#allocation2 + $0xd8] sm:$0xff]  ;;  %v14091_v4 = vld [vmem:[#allocation2 + $0xf0] sm:$0xff] }
 0x3a0   : > { %10642 = vmatprep.mubr.msk.f32.mxu1 %vm547_vm0, %v4690_v14  ;;  %v14058_v14 = vpop.permute.xlu1 %5476  ;;  %15519 = vst [vmem:[#allocation47_spill] sm:$0xff] %v14074_v63  ;;  %15524 = vst [vmem:[#allocation61_spill] sm:$0xff] %v14091_v4 }
 0x3a1   : > { %15515 = vst [vmem:[#allocation40_spill] sm:$0xff] %v14058_v14 }
 0x3a3   : > { %10643 = vmatmul.mubr.msk.f32.gmra.mrb[20].mxu1 %vm547_vm0, %v4691_v7  ;;  %v14068_v7 = vpop.permute.xlu0 %5481 }
 0x3a4   : > { %10645 = vmatprep.mubr.msk.f32.mxu1 %vm547_vm0, %v4692_v21  ;;  %15518 = vst [vmem:[#allocation49_spill] sm:$0xff] %v14068_v7  ;;  %v4695_v21 = vmul.f32 %v13944_v20, %v14062_v38  ;;  %v14079_v42 = vpop.permute.xlu1 %5486  ;;  %v14086_v20 = vld [vmem:[#allocation2 + $0xe8] sm:$0xff] }
 0x3a5   : > { %15521 = vst [vmem:[#allocation51_spill] sm:$0xff] %v14079_v42  ;;  %15522 = vst [vmem:[#allocation57_spill] sm:$0xff] %v14086_v20 }
 0x3a7   : > { %10646 = vmatmul.mubr.msk.f32.gmra.mrb[22].mxu1 %vm547_vm0, %v4693_v19  ;;  %v4698_v19 = vmul.f32 %v13974_v9, %v14077_v0  ;;  %v14088_v38 = vpop.permute.xlu0 %5491  ;;  %v5385_v9 = vld [vmem:[#allocation2 + $0x2] sm:$0xff] }
 0x3a8   : > { %10648 = vmatprep.mubr.msk.f32.mxu1 %vm547_vm0, %v4694_v61  ;;  %v4697_v61 = vmul.f32 %v13965_v37, %v14074_v63  ;;  %15523 = vst [vmem:[#allocation55_spill] sm:$0xff] %v14088_v38  ;;  %v4700_v37 = vmul.f32 %v13992_v26, %v14091_v4  ;;  %v14100_v63 = vld [vmem:[#allocation2 + $0xf8] sm:$0xff]  ;;  %v5609_v0 = vmul.f32 %v14012_v49, %v5385_v9  ;;  %v9209_v4 = vld [vmem:[%s15042_s4 + $0x80] sm:$0xff] }
 0x3a9   : > { %15526 = vst [vmem:[#allocation65_spill] sm:$0xff] %v14100_v63  ;;  %v9176_v26 = vld [vmem:[%s15042_s4 + $0x78] sm:$0xff] }
 0x3ab   : > { %10649 = vmatmul.mubr.msk.f32.gmra.mrb[24].mxu1 %vm547_vm0, %v4695_v21  ;;  %v4699_v21 = vmul.f32 %v13982_v8, %v14086_v20  ;;  %v5386_v8 = vld [vmem:[#allocation2 + $0xa] sm:$0xff] }
 0x3ac   : > { %10651 = vmatprep.mubr.msk.f32.mxu1 %vm547_vm0, %v4696_v52  ;;  %v14096_v52 = vpop.permute.xlu1 %5496  ;;  %v9175_v20 = vld [vmem:[%s15042_s4 + $0x70] sm:$0xff] }
 0x3ad   : > { %15525 = vst [vmem:[#allocation59_spill] sm:$0xff] %v14096_v52  ;;  %v11152_v9 = vpack.c.bf16 %v9176_v26, %v9175_v20 }
 0x3af   : > { %10652 = vmatmul.mubr.msk.f32.gmra.mrb[26].mxu1 %vm547_vm0, %v4697_v61  ;;  %v14104_v61 = vpop.permute.xlu0 %5501 }
 0x3b0   : > { %10654 = vmatprep.mubr.msk.f32.mxu1 %vm547_vm0, %v4698_v19  ;;  %15527 = vst [vmem:[#allocation63_spill] sm:$0xff] %v14104_v61  ;;  %v4701_v19 = vmul.f32 %v14003_v60, %v14100_v63  ;;  %v5610_v60 = vmul.f32 %v14020_v56, %v5386_v8  ;;  %v14124_v63 = vld [vmem:[#allocation2 + $0x1a] sm:$0xff]  ;;  %v14147_v56 = vld [vmem:[#allocation2 + $0x2a] sm:$0xff] }
 0x3b1   : > { %v5612_v20 = vmul.f32 %v14041_v46, %v14124_v63 }
 0x3b3   : > { %10655 = vmatmul.mubr.msk.f32.gmra.mrb[28].mxu1 %vm547_vm0, %v4699_v21  ;;  %v14116_v21 = vld [vmem:[#allocation2 + $0x12] sm:$0xff]  ;;  %v14132_v47 = vpop.permute.xlu0 %5511 }
 0x3b4   : > { %10657 = vmatprep.mubr.msk.f32.mxu1 %vm547_vm0, %v4700_v37  ;;  %v14118_v37 = vpop.permute.xlu1 %5506  ;;  %v5611_v49 = vmul.f32 %v14030_v58, %v14116_v21  ;;  %15529 = vst [vmem:[#allocation67_spill] sm:$0xff] %v14132_v47 }
 0x3b5   : > { %15528 = vst [vmem:[#allocation69_spill] sm:$0xff] %v14118_v37 }
 0x3b7   : > { %10658 = vmatmul.mubr.msk.f32.gmra.mrb[30].mxu1 %vm547_vm0, %v4701_v19  ;;  %v9210_v19 = vld [vmem:[%s15042_s4 + $0x88] sm:$0xff] }
 0x3b8   : > { %10668 = vmatprep.mubr.msk.f32.mxu1 %vm547_vm0, %v5609_v0  ;;  %v14135_v0 = vld [vmem:[#allocation2 + $0x22] sm:$0xff]  ;;  %v14141_v8 = vpack.c.bf16 %v9210_v19, %v9209_v4  ;;  %v14143_v26 = vpop.permute.xlu1 %5516  ;;  %v14160_v19 = vld [vmem:[#allocation2 + $0x3a] sm:$0xff] }
 0x3b9   : > { %15530 = vst [vmem:[#allocation73_spill] sm:$0xff] %v14143_v26  ;;  %v5613_v58 = vmul.f32 %v14050_v40, %v14135_v0  ;;  %15532 = vst [vmem:[#allocation77_spill] sm:$0xff] %v14160_v19 }
 0x3bb   : > { %10669 = vmatmul.mubr.msk.f32.vlgmr.msra.gmra.mrb[0].mxu1 %vm547_vm0, %v5610_v60  ;;  %v14150_v60 = vld [vmem:[#allocation2 + $0x32] sm:$0xff] }
 0x3bc   : > { %11151 = vmatpush3.bf16.msra.mxu1 %v13929_v30  ;;  %10671 = vmatprep.mubr.msk.f32.mxu1 %vm547_vm0, %v5611_v49  ;;  %v14153_v49 = vpop.permute.xlu0 %5521  ;;  %v5614_v30 = vmul.f32 %v14058_v14, %v14147_v56  ;;  %v5615_v4 = vmul.f32 %v14068_v7, %v14150_v60  ;;  %v14165_v40 = vpop.permute.xlu1 %5526  ;;  %v14172_v14 = vld [vmem:[#allocation2 + $0x4a] sm:$0xff]  ;;  %v14177_v7 = vld [vmem:[#allocation2 + $0x52] sm:$0xff] }
 0x3bd   : > { %11153 = vmatprep.subr.bf16.mxu1 %v11152_v9  ;;  %15531 = vst [vmem:[#allocation71_spill] sm:$0xff] %v14153_v49  ;;  %15533 = vst [vmem:[#allocation75_spill] sm:$0xff] %v14165_v40 }
 0x3be   : > { %15534 = vst [vmem:[#allocation80_spill] sm:$0xff] %v14172_v14  ;;  %15536 = vst [vmem:[#allocation82_spill] sm:$0xff] %v14177_v7 }
 0x3bf   : > { %10672 = vmatmul.mubr.msk.f32.gmra.mrb[2].mxu1 %vm547_vm0, %v5612_v20  ;;  %v14163_v20 = vld [vmem:[#allocation2 + $0x42] sm:$0xff] }
 0x3c0   : > { %10674 = vmatprep.mubr.msk.f32.mxu1 %vm547_vm0, %v5613_v58  ;;  %11155 = vmatpush3.bf16.msra.mxu1 %v11152_v9  ;;  %v5616_v58 = vmul.f32 %v14079_v42, %v14160_v19  ;;  %v5617_v9 = vmul.f32 %v14088_v38, %v14163_v20  ;;  %v14174_v46 = vpop.permute.xlu0 %5531  ;;  %v5619_v42 = vmul.f32 %v14104_v61, %v14177_v7  ;;  %v14186_v19 = vld [vmem:[#allocation2 + $0x5a] sm:$0xff]  ;;  %v14189_v38 = vld [vmem:[#allocation2 + $0x62] sm:$0xff]  ;;  %v14201_v61 = vld [vmem:[#allocation2 + $0x72] sm:$0xff] }
 0x3c1   : > { %11157 = vmatprep.subr.bf16.mxu1 %v14141_v8  ;;  %15535 = vst [vmem:[#allocation79_spill] sm:$0xff] %v14174_v46  ;;  %15538 = vst [vmem:[#allocation83_spill] sm:$0xff] %v14186_v19 }
 0x3c3   : > { %10675 = vmatmul.mubr.msk.f32.gmra.mrb[4].mxu1 %vm547_vm0, %v5614_v30  ;;  %v5618_v30 = vmul.f32 %v14096_v52, %v14172_v14  ;;  %v5621_v52 = vmul.f32 %v14132_v47, %v14189_v38  ;;  %v14198_v14 = vld [vmem:[#allocation2 + $0x6a] sm:$0xff]  ;;  %v14215_v47 = vld [vmem:[#allocation2 + $0x82] sm:$0xff] }
 0x3c4   : > { %10677 = vmatprep.mubr.msk.f32.mxu1 %vm547_vm0, %v5615_v4  ;;  %v14182_v4 = vpop.permute.xlu1 %5536  ;;  %15540 = vst [vmem:[#allocation85_spill] sm:$0xff] %v14198_v14  ;;  %15544 = vst [vmem:[#allocation89_spill] sm:$0xff] %v14215_v47 }
 0x3c5   : > { %15537 = vst [vmem:[#allocation81_spill] sm:$0xff] %v14182_v4 }
 0x3c7   : > { %10678 = vmatmul.mubr.msk.f32.gmra.mrb[6].mxu1 %vm547_vm0, %v5616_v58  ;;  %v14192_v58 = vpop.permute.xlu0 %5541 }
 0x3c8   : > { %10680 = vmatprep.mubr.msk.f32.mxu1 %vm547_vm0, %v5617_v9  ;;  %15539 = vst [vmem:[#allocation84_spill] sm:$0xff] %v14192_v58  ;;  %v5620_v9 = vmul.f32 %v14118_v37, %v14186_v19  ;;  %v14203_v7 = vpop.permute.xlu1 %5546  ;;  %v14210_v37 = vld [vmem:[#allocation2 + $0x7a] sm:$0xff] }
 0x3c9   : > { %15541 = vst [vmem:[#allocation86_spill] sm:$0xff] %v14203_v7  ;;  %15542 = vst [vmem:[#allocation87_spill] sm:$0xff] %v14210_v37 }
 0x3cb   : > { %10681 = vmatmul.mubr.msk.f32.gmra.mrb[8].mxu1 %vm547_vm0, %v5618_v30  ;;  %v5623_v30 = vmul.f32 %v14153_v49, %v14201_v61  ;;  %v14212_v19 = vpop.permute.xlu0 %5551  ;;  %v14227_v49 = vld [vmem:[#allocation2 + $0x92] sm:$0xff] }
 0x3cc   : > { %10683 = vmatprep.mubr.msk.f32.mxu1 %vm547_vm0, %v5619_v42  ;;  %v5622_v42 = vmul.f32 %v14143_v26, %v14198_v14  ;;  %15543 = vst [vmem:[#allocation88_spill] sm:$0xff] %v14212_v19  ;;  %v5625_v26 = vmul.f32 %v14174_v46, %v14215_v47  ;;  %v14224_v14 = vld [vmem:[#allocation2 + $0x8a] sm:$0xff]  ;;  %v14239_v46 = vld [vmem:[#allocation2 + $0xa2] sm:$0xff] }
 0x3cd   : > { %15546 = vst [vmem:[#allocation91_spill] sm:$0xff] %v14224_v14 }
 0x3cf   : > { %10684 = vmatmul.mubr.msk.f32.gmra.mrb[10].mxu1 %vm547_vm0, %v5620_v9  ;;  %v5624_v9 = vmul.f32 %v14165_v40, %v14210_v37  ;;  %v5627_v40 = vmul.f32 %v14192_v58, %v14227_v49  ;;  %v14236_v37 = vld [vmem:[#allocation2 + $0x9a] sm:$0xff]  ;;  %v14253_v58 = vld [vmem:[#allocation2 + $0xb2] sm:$0xff] }
 0x3d0   : > { %10686 = vmatprep.mubr.msk.f32.mxu1 %vm547_vm0, %v5621_v52  ;;  %v14220_v52 = vpop.permute.xlu1 %5556  ;;  %15548 = vst [vmem:[#allocation93_spill] sm:$0xff] %v14236_v37  ;;  %15552 = vst [vmem:[#allocation97_spill] sm:$0xff] %v14253_v58 }
 0x3d1   : > { %15545 = vst [vmem:[#allocation90_spill] sm:$0xff] %v14220_v52 }
 0x3d3   : > { %10687 = vmatmul.mubr.msk.f32.gmra.mrb[12].mxu1 %vm547_vm0, %v5622_v42  ;;  %v14230_v42 = vpop.permute.xlu0 %5561 }
 0x3d4   : > { %10689 = vmatprep.mubr.msk.f32.mxu1 %vm547_vm0, %v5623_v30  ;;  %15547 = vst [vmem:[#allocation92_spill] sm:$0xff] %v14230_v42  ;;  %v5626_v30 = vmul.f32 %v14182_v4, %v14224_v14  ;;  %v14241_v47 = vpop.permute.xlu1 %5566  ;;  %v14248_v4 = vld [vmem:[#allocation2 + $0xaa] sm:$0xff] }
 0x3d5   : > { %15549 = vst [vmem:[#allocation94_spill] sm:$0xff] %v14241_v47  ;;  %15550 = vst [vmem:[#allocation95_spill] sm:$0xff] %v14248_v4 }
 0x3d7   : > { %10690 = vmatmul.mubr.msk.f32.gmra.mrb[14].mxu1 %vm547_vm0, %v5624_v9  ;;  %v5629_v9 = vmul.f32 %v14212_v19, %v14239_v46  ;;  %v14250_v14 = vpop.permute.xlu0 %5571  ;;  %v14265_v19 = vld [vmem:[#allocation2 + $0xc2] sm:$0xff] }
 0x3d8   : > { %10692 = vmatprep.mubr.msk.f32.mxu1 %vm547_vm0, %v5625_v26  ;;  %v5628_v26 = vmul.f32 %v14203_v7, %v14236_v37  ;;  %15551 = vst [vmem:[#allocation96_spill] sm:$0xff] %v14250_v14  ;;  %v5631_v7 = vmul.f32 %v14230_v42, %v14253_v58  ;;  %v14262_v37 = vld [vmem:[#allocation2 + $0xba] sm:$0xff]  ;;  %v14277_v42 = vld [vmem:[#allocation2 + $0xd2] sm:$0xff] }
 0x3d9   : > { %15554 = vst [vmem:[#allocation99_spill] sm:$0xff] %v14262_v37 }
 0x3db   : > { %10693 = vmatmul.mubr.msk.f32.gmra.mrb[16].mxu1 %vm547_vm0, %v5626_v30  ;;  %v5630_v30 = vmul.f32 %v14220_v52, %v14248_v4  ;;  %v5633_v52 = vmul.f32 %v14250_v14, %v14265_v19  ;;  %v14274_v4 = vld [vmem:[#allocation2 + $0xca] sm:$0xff]  ;;  %v14291_v14 = vld [vmem:[#allocation2 + $0xe2] sm:$0xff] }
 0x3dc   : > { %10695 = vmatprep.mubr.msk.f32.mxu1 %vm547_vm0, %v5627_v40  ;;  %v14258_v40 = vpop.permute.xlu1 %5576  ;;  %15556 = vst [vmem:[#allocation101_spill] sm:$0xff] %v14274_v4 }
 0x3dd   : > { %15553 = vst [vmem:[#allocation98_spill] sm:$0xff] %v14258_v40 }
 0x3df   : > { %10696 = vmatmul.mubr.msk.f32.gmra.mrb[18].mxu1 %vm547_vm0, %v5628_v26  ;;  %v14268_v26 = vpop.permute.xlu0 %5581 }
 0x3e0   : > { %10698 = vmatprep.mubr.msk.f32.mxu1 %vm547_vm0, %v5629_v9  ;;  %15555 = vst [vmem:[#allocation100_spill] sm:$0xff] %v14268_v26  ;;  %v5632_v9 = vmul.f32 %v14241_v47, %v14262_v37  ;;  %v14279_v58 = vpop.permute.xlu1 %5586  ;;  %v14286_v47 = vld [vmem:[#allocation2 + $0xda] sm:$0xff] }
 0x3e1   : > { %15557 = vst [vmem:[#allocation102_spill] sm:$0xff] %v14279_v58  ;;  %15558 = vst [vmem:[#allocation103_spill] sm:$0xff] %v14286_v47 }
 0x3e3   : > { %10699 = vmatmul.mubr.msk.f32.gmra.mrb[20].mxu1 %vm547_vm0, %v5630_v30  ;;  %v5635_v30 = vmul.f32 %v14268_v26, %v14277_v42  ;;  %v14288_v37 = vpop.permute.xlu0 %5591  ;;  %v14303_v26 = vld [vmem:[#allocation2 + $0xf2] sm:$0xff] }
 0x3e4   : > { %10701 = vmatprep.mubr.msk.f32.mxu1 %vm547_vm0, %v5631_v7  ;;  %v5634_v7 = vmul.f32 %v14258_v40, %v14274_v4  ;;  %15559 = vst [vmem:[#allocation104_spill] sm:$0xff] %v14288_v37  ;;  %v5637_v40 = vmul.f32 %v14288_v37, %v14291_v14  ;;  %v14300_v4 = vld [vmem:[#allocation2 + $0xea] sm:$0xff] }
 0x3e7   : > { %10702 = vmatmul.mubr.msk.f32.gmra.mrb[22].mxu1 %vm547_vm0, %v5632_v9  ;;  %v5636_v9 = vmul.f32 %v14279_v58, %v14286_v47  ;;  %v14312_v47 = vld [vmem:[#allocation2 + $0xfa] sm:$0xff] }
 0x3e8   : > { %10704 = vmatprep.mubr.msk.f32.mxu1 %vm547_vm0, %v5633_v52  ;;  %v14296_v52 = vpop.permute.xlu1 %5596 }
 0x3e9   : > { %15560 = vst [vmem:[#allocation105_spill] sm:$0xff] %v14296_v52 }
 0x3eb   : > { %10705 = vmatmul.mubr.msk.f32.gmra.mrb[24].mxu1 %vm547_vm0, %v5634_v7  ;;  %v14306_v7 = vpop.permute.xlu0 %5601 }
 0x3ec   : > { %10707 = vmatprep.mubr.msk.f32.mxu1 %vm547_vm0, %v5635_v30  ;;  %15561 = vst [vmem:[#allocation106_spill] sm:$0xff] %v14306_v7  ;;  %v5638_v30 = vmul.f32 %v14296_v52, %v14300_v4  ;;  %v5639_v58 = vmul.f32 %v14306_v7, %v14303_v26  ;;  %v14315_v37 = vpop.permute.xlu1 %5606  ;;  %v9211_v52 = vld [vmem:[%s15042_s4 + $0x90] sm:$0xff]  ;;  %v9212_v7 = vld [vmem:[%s15042_s4 + $0x98] sm:$0xff] }
 0x3ed   : > { %15562 = vst [vmem:[#allocation107_spill] sm:$0xff] %v14315_v37 }
 0x3ef   : > { %10708 = vmatmul.mubr.msk.f32.gmra.mrb[26].mxu1 %vm547_vm0, %v5636_v9  ;;  %v5640_v9 = vmul.f32 %v14315_v37, %v14312_v47  ;;  %v6033_v37 = vmul.f32 %v13689_v10, %v13921_v48 }
 0x3f0   : > { %10710 = vmatprep.mubr.msk.f32.mxu1 %vm547_vm0, %v5637_v40  ;;  %v6031_v40 = vmul.f32 %v13681_v44, %v13904_v24  ;;  %v9245_v24 = vld [vmem:[%s15042_s4 + $0xa0] sm:$0xff]  ;;  %v9246_v44 = vld [vmem:[%s15042_s4 + $0xa8] sm:$0xff] }
 0x3f3   : > { %10711 = vmatmul.mubr.msk.f32.gmra.mrb[28].mxu1 %vm547_vm0, %v5638_v30  ;;  %v11160_v30 = vpack.c.bf16 %v9212_v7, %v9211_v52  ;;  %v14345_v52 = vpack.c.bf16 %v9246_v44, %v9245_v24  ;;  %v6035_v7 = vmul.f32 %v13709_v25, %v13938_v5  ;;  %v6038_v44 = vmul.f32 %v13741_v55, %v13960_v43 }
 0x3f4   : > { %10713 = vmatprep.mubr.msk.f32.mxu1 %vm547_vm0, %v5639_v58  ;;  %v6032_v58 = vmul.f32 %v13685_v11, %v13912_v50  ;;  %v6034_v50 = vmul.f32 %v13697_v16, %v13933_v1  ;;  %v6043_v24 = vmul.f32 %v13797_v23, %v13989_v51 }
 0x3f7   : > { %10714 = vmatmul.mubr.msk.f32.gmra.mrb[30].mxu1 %vm547_vm0, %v5640_v9  ;;  %v6036_v9 = vmul.f32 %v13717_v36, %v13948_v35 }
 0x3f8   : > { %10724 = vmatprep.mubr.msk.f32.mxu1 %vm547_vm0, %v6031_v40  ;;  %v6040_v40 = vmul.f32 %v13761_v34, %v13972_v59 }
 0x3fb   : > { %10725 = vmatmul.mubr.msk.f32.vlgmr.msra.gmra.mrb[0].mxu1 %vm547_vm0, %v6032_v58  ;;  %v6041_v58 = vmul.f32 %v13771_v57, %v13977_v13 }
 0x3fc   : > { %11159 = vmatpush3.bf16.msra.mxu1 %v14141_v8  ;;  %10727 = vmatprep.mubr.msk.f32.mxu1 %vm547_vm0, %v6033_v37  ;;  %v6037_v37 = vmul.f32 %v13727_v29, %v13951_v2  ;;  %v6039_v8 = vmul.f32 %v13753_v41, %v13963_v53 }
 0x3fd   : > { %11161 = vmatprep.subr.bf16.mxu1 %v11160_v30 }
 0x3ff   : > { %10728 = vmatmul.mubr.msk.f32.gmra.mrb[2].mxu1 %vm547_vm0, %v6034_v50  ;;  %v6044_v50 = vmul.f32 %v13805_v28, %v13998_v31 }
 0x400   : > { %10730 = vmatprep.mubr.msk.f32.mxu1 %vm547_vm0, %v6035_v7  ;;  %11163 = vmatpush3.bf16.msra.mxu1 %v11160_v30  ;;  %v6042_v30 = vmul.f32 %v13785_v27, %v13986_v45  ;;  %v6045_v7 = vmul.f32 %v13815_v6, %v14001_v12 }
 0x401   : > { %11165 = vmatprep.subr.bf16.mxu1 %v14345_v52 }
 0x403   : > { %10731 = vmatmul.mubr.msk.f32.gmra.mrb[4].mxu1 %vm547_vm0, %v6036_v9  ;;  %v6046_v9 = vmul.f32 %v13829_v3, %v14010_v32 }
 0x404   : > { %10733 = vmatprep.mubr.msk.f32.mxu1 %vm547_vm0, %v6037_v37  ;;  %v6047_v37 = vmul.f32 %v13841_v62, %v14015_v15  ;;  %v15572_v62 = vld [vmem:[#allocation16_spill] sm:$0xff] }
 0x407   : > { %10734 = vmatmul.mubr.msk.f32.gmra.mrb[6].mxu1 %vm547_vm0, %v6038_v44  ;;  %v6048_v44 = vmul.f32 %v13849_v54, %v14024_v18  ;;  %v15568_v54 = vld [vmem:[#allocation11_spill] sm:$0xff] }
 0x408   : > { %10736 = vmatprep.mubr.msk.f32.mxu1 %vm547_vm0, %v6039_v8  ;;  %v6049_v8 = vmul.f32 %v13859_v39, %v14027_v22 }
 0x40b   : > { %10737 = vmatmul.mubr.msk.f32.gmra.mrb[8].mxu1 %vm547_vm0, %v6040_v40  ;;  %v15563_v40 = vld [vmem:[#allocation8_spill] sm:$0xff] }
 0x40c   : > { %10739 = vmatprep.mubr.msk.f32.mxu1 %vm547_vm0, %v6041_v58  ;;  %v6050_v58 = vmul.f32 %v15563_v40, %v14036_v33  ;;  %v15571_v33 = vld [vmem:[#allocation43_spill] sm:$0xff] }
 0x40f   : > { %10740 = vmatmul.mubr.msk.f32.gmra.mrb[10].mxu1 %vm547_vm0, %v6042_v30  ;;  %v15564_v30 = vld [vmem:[#allocation9_spill] sm:$0xff] }
 0x410   : > { %10742 = vmatprep.mubr.msk.f32.mxu1 %vm547_vm0, %v6043_v24  ;;  %v6051_v24 = vmul.f32 %v15564_v30, %v14039_v17  ;;  %v6055_v30 = vmul.f32 %v15572_v62, %v15571_v33  ;;  %v15576_v17 = vld [vmem:[#allocation15_spill] sm:$0xff] }
 0x413   : > { %10743 = vmatmul.mubr.msk.f32.gmra.mrb[12].mxu1 %vm547_vm0, %v6044_v50  ;;  %v15565_v50 = vld [vmem:[#allocation38_spill] sm:$0xff] }
 0x414   : > { %10745 = vmatprep.mubr.msk.f32.mxu1 %vm547_vm0, %v6045_v7  ;;  %v15566_v7 = vld [vmem:[#allocation12_spill] sm:$0xff] }
 0x417   : > { %10746 = vmatmul.mubr.msk.f32.gmra.mrb[14].mxu1 %vm547_vm0, %v6046_v9  ;;  %v6052_v9 = vmul.f32 %v15566_v7, %v15565_v50  ;;  %v15575_v50 = vld [vmem:[#allocation53_spill] sm:$0xff] }
 0x418   : > { %10748 = vmatprep.mubr.msk.f32.mxu1 %vm547_vm0, %v6047_v37  ;;  %v15567_v37 = vld [vmem:[#allocation41_spill] sm:$0xff] }
 0x419   : > { %v6053_v39 = vmul.f32 %v15568_v54, %v15567_v37  ;;  %v6057_v54 = vmul.f32 %v15576_v17, %v15575_v50  ;;  %v15580_v37 = vld [vmem:[#allocation20_spill] sm:$0xff]  ;;  %v15584_v17 = vld [vmem:[#allocation19_spill] sm:$0xff]  ;;  %v14430_v50 = vld [vmem:[#allocation2 + $0x108] sm:$0xff] }
 0x41b   : > { %10749 = vmatmul.mubr.msk.f32.gmra.mrb[16].mxu1 %vm547_vm0, %v6048_v44  ;;  %v15569_v44 = vld [vmem:[#allocation45_spill] sm:$0xff] }
 0x41c   : > { %10751 = vmatprep.mubr.msk.f32.mxu1 %vm547_vm0, %v6049_v8  ;;  %v15570_v8 = vld [vmem:[#allocation17_spill] sm:$0xff] }
 0x41d   : > { %v6054_v40 = vmul.f32 %v15570_v8, %v15569_v44  ;;  %v15579_v44 = vld [vmem:[#allocation61_spill] sm:$0xff] }
 0x41e   : > { %v6059_v62 = vmul.f32 %v15580_v37, %v15579_v44 }
 0x41f   : > { %10752 = vmatmul.mubr.msk.f32.gmra.mrb[18].mxu1 %vm547_vm0, %v6050_v58  ;;  %v15573_v58 = vld [vmem:[#allocation47_spill] sm:$0xff] }
 0x420   : > { %10754 = vmatprep.mubr.msk.f32.mxu1 %vm547_vm0, %v6051_v24  ;;  %v15574_v24 = vld [vmem:[#allocation18_spill] sm:$0xff] }
 0x421   : > { %v6056_v7 = vmul.f32 %v15574_v24, %v15573_v58  ;;  %v15583_v24 = vld [vmem:[#allocation22_spill] sm:$0xff] }
 0x423   : > { %10755 = vmatmul.mubr.msk.f32.gmra.mrb[20].mxu1 %vm547_vm0, %v6052_v9  ;;  %v15578_v9 = vld [vmem:[#allocation21_spill] sm:$0xff] }
 0x424   : > { %10757 = vmatprep.mubr.msk.f32.mxu1 %vm547_vm0, %v6053_v39  ;;  %v15577_v39 = vld [vmem:[#allocation57_spill] sm:$0xff] }
 0x425   : > { %v6058_v8 = vmul.f32 %v15578_v9, %v15577_v39  ;;  %15585 = vst [vmem:[#allocation57_spill] sm:$0xff] %v14430_v50 }
 0x427   : > { %10758 = vmatmul.mubr.msk.f32.gmra.mrb[22].mxu1 %vm547_vm0, %v6054_v40  ;;  %v14423_v40 = vld [vmem:[#allocation2 + $0x100] sm:$0xff] }
 0x428   : > { %10760 = vmatprep.mubr.msk.f32.mxu1 %vm547_vm0, %v6055_v30  ;;  %15581 = vst [vmem:[#allocation43_spill] sm:$0xff] %v14423_v40  ;;  %v15582_v30 = vld [vmem:[#allocation65_spill] sm:$0xff] }
 0x429   : > { %v6060_v58 = vmul.f32 %v15583_v24, %v15582_v30 }
 0x42b   : > { %10761 = vmatmul.mubr.msk.f32.gmra.mrb[24].mxu1 %vm547_vm0, %v6056_v7  ;;  %v6061_v7 = vmul.f32 %v14423_v40, %v15584_v17  ;;  %v11782_v17 = vld [vmem:[#allocation2 + $0x11] sm:$0xff]  ;;  %v15591_v40 = vld [vmem:[#allocation30_spill] sm:$0xff] }
 0x42c   : > { %10763 = vmatprep.mubr.msk.f32.mxu1 %vm547_vm0, %v6057_v54  ;;  %v15586_v54 = vld [vmem:[#allocation25_spill] sm:$0xff] }
 0x42d   : > { %v6062_v37 = vmul.f32 %v14430_v50, %v15586_v54  ;;  %v11783_v54 = vld [vmem:[#allocation2 + $0x19] sm:$0xff] }
 0x42e   : > { %v15587_v50 = vld [vmem:[#allocation29_spill] sm:$0xff] }
 0x42f   : > { %10764 = vmatmul.mubr.msk.f32.gmra.mrb[26].mxu1 %vm547_vm0, %v6058_v8  ;;  %v9247_v8 = vld [vmem:[%s15042_s4 + $0xb0] sm:$0xff] }
 0x430   : > { %10766 = vmatprep.mubr.msk.f32.mxu1 %vm547_vm0, %v6059_v62  ;;  %v9248_v62 = vld [vmem:[%s15042_s4 + $0xb8] sm:$0xff] }
 0x431   : > { %v11168_v24 = vpack.c.bf16 %v9248_v62, %v9247_v8  ;;  %v15589_v8 = vld [vmem:[#allocation27_spill] sm:$0xff]  ;;  %v15590_v62 = vld [vmem:[#allocation32_spill] sm:$0xff] }
 0x433   : > { %10767 = vmatmul.mubr.msk.f32.gmra.mrb[28].mxu1 %vm547_vm0, %v6060_v58  ;;  %v9281_v58 = vld [vmem:[%s15042_s4 + $0xc0] sm:$0xff] }
 0x434   : > { %10769 = vmatprep.mubr.msk.f32.mxu1 %vm547_vm0, %v6061_v7  ;;  %v9282_v7 = vld [vmem:[%s15042_s4 + $0xc8] sm:$0xff] }
 0x437   : > { %10770 = vmatmul.mubr.msk.f32.gmra.mrb[30].mxu1 %vm547_vm0, %v6062_v37  ;;  %v11172_v37 = vpack.c.bf16 %v9282_v7, %v9281_v58  ;;  %v15595_v58 = vld [vmem:[#allocation42_spill] sm:$0xff] }
 0x438   : > { %10780 = vmatprep.mubr.msk.f32.mxu1 %vm547_vm0, %v11782_v17  ;;  %v15588_v17 = vld [vmem:[#allocation28_spill] sm:$0xff]  ;;  %v15597_v7 = vld [vmem:[#allocation46_spill] sm:$0xff] }
 0x43b   : > { %10781 = vmatmul.mubr.msk.f32.vlgmr.msra.gmra.mrb[0].mxu1 %vm547_vm0, %v11783_v54  ;;  %v15594_v54 = vld [vmem:[#allocation44_spill] sm:$0xff] }
 0x43c   : > { %11167 = vmatpush3.bf16.msra.mxu1 %v14345_v52  ;;  %10783 = vmatprep.mubr.msk.f32.mxu1 %vm547_vm0, %v15587_v50  ;;  %v15592_v52 = vld [vmem:[#allocation36_spill] sm:$0xff]  ;;  %v15593_v50 = vld [vmem:[#allocation39_spill] sm:$0xff] }
 0x43d   : > { %11169 = vmatprep.subr.bf16.mxu1 %v11168_v24 }
 0x43f   : > { %10784 = vmatmul.mubr.msk.f32.gmra.mrb[2].mxu1 %vm547_vm0, %v15588_v17  ;;  %v15598_v17 = vld [vmem:[#allocation52_spill] sm:$0xff] }
 0x440   : > { %10786 = vmatprep.mubr.msk.f32.mxu1 %vm547_vm0, %v15589_v8  ;;  %11171 = vmatpush3.bf16.msra.mxu1 %v11168_v24  ;;  %v15596_v24 = vld [vmem:[#allocation48_spill] sm:$0xff] }
 0x441   : > { %11173 = vmatprep.subr.bf16.mxu1 %v11172_v37  ;;  %v15600_v8 = vld [vmem:[#allocation56_spill] sm:$0xff] }
 0x443   : > { %10787 = vmatmul.mubr.msk.f32.gmra.mrb[4].mxu1 %vm547_vm0, %v15590_v62  ;;  %v15601_v62 = vld [vmem:[#allocation54_spill] sm:$0xff] }
 0x444   : > { %10789 = vmatprep.mubr.msk.f32.mxu1 %vm547_vm0, %v15591_v40  ;;  %v15599_v40 = vld [vmem:[#allocation50_spill] sm:$0xff] }
 0x447   : > { %10790 = vmatmul.mubr.msk.f32.gmra.mrb[6].mxu1 %vm547_vm0, %v15592_v52  ;;  %v15602_v52 = vld [vmem:[#allocation60_spill] sm:$0xff] }
 0x448   : > { %10792 = vmatprep.mubr.msk.f32.mxu1 %vm547_vm0, %v15593_v50  ;;  %v15603_v50 = vld [vmem:[#allocation58_spill] sm:$0xff] }
 0x44b   : > { %10793 = vmatmul.mubr.msk.f32.gmra.mrb[8].mxu1 %vm547_vm0, %v15594_v54  ;;  %v15604_v54 = vld [vmem:[#allocation64_spill] sm:$0xff] }
 0x44c   : > { %10795 = vmatprep.mubr.msk.f32.mxu1 %vm547_vm0, %v15595_v58  ;;  %v15605_v58 = vld [vmem:[#allocation62_spill] sm:$0xff] }
 0x44f   : > { %10796 = vmatmul.mubr.msk.f32.gmra.mrb[10].mxu1 %vm547_vm0, %v15596_v24  ;;  %v15606_v24 = vld [vmem:[#allocation68_spill] sm:$0xff] }
 0x450   : > { %10798 = vmatprep.mubr.msk.f32.mxu1 %vm547_vm0, %v15597_v7  ;;  %v15607_v7 = vld [vmem:[#allocation72_spill] sm:$0xff] }
 0x453   : > { %10799 = vmatmul.mubr.msk.f32.gmra.mrb[12].mxu1 %vm547_vm0, %v15598_v17  ;;  %v15608_v17 = vld [vmem:[#allocation76_spill] sm:$0xff] }
 0x454   : > { %10801 = vmatprep.mubr.msk.f32.mxu1 %vm547_vm0, %v15599_v40  ;;  %v15609_v40 = vld [vmem:[#allocation78_spill] sm:$0xff] }
 0x457   : > { %10802 = vmatmul.mubr.msk.f32.gmra.mrb[14].mxu1 %vm547_vm0, %v15600_v8  ;;  %v15610_v8 = vld [vmem:[#allocation6_spill] sm:$0xff] }
 0x458   : > { %10804 = vmatprep.mubr.msk.f32.mxu1 %vm547_vm0, %v15601_v62  ;;  %v15611_v62 = vld [vmem:[#allocation7_spill] sm:$0xff] }
 0x45b   : > { %10805 = vmatmul.mubr.msk.f32.gmra.mrb[16].mxu1 %vm547_vm0, %v15602_v52  ;;  %v15612_v52 = vld [vmem:[#allocation10_spill] sm:$0xff] }
 0x45c   : > { %10807 = vmatprep.mubr.msk.f32.mxu1 %vm547_vm0, %v15603_v50  ;;  %v15613_v50 = vld [vmem:[#allocation13_spill] sm:$0xff] }
 0x45f   : > { %10808 = vmatmul.mubr.msk.f32.gmra.mrb[18].mxu1 %vm547_vm0, %v15604_v54  ;;  %v15614_v54 = vld [vmem:[#allocation14_spill] sm:$0xff] }
 0x460   : > { %10810 = vmatprep.mubr.msk.f32.mxu1 %vm547_vm0, %v15605_v58  ;;  %v14508_v58 = vld [vmem:[#allocation2 + $0x101] sm:$0xff] }
 0x461   : > { %15615 = vst [vmem:[#allocation21_spill] sm:$0xff] %v14508_v58 }
 0x463   : > { %10811 = vmatmul.mubr.msk.f32.gmra.mrb[20].mxu1 %vm547_vm0, %v15606_v24  ;;  %v14512_v24 = vld [vmem:[#allocation2 + $0x109] sm:$0xff] }
 0x464   : > { %10813 = vmatprep.mubr.msk.f32.mxu1 %vm547_vm0, %v15607_v7  ;;  %v15616_v7 = vld [vmem:[#allocation24_spill] sm:$0xff] }
 0x467   : > { %10814 = vmatmul.mubr.msk.f32.gmra.mrb[22].mxu1 %vm547_vm0, %v15608_v17  ;;  %v6843_v17 = vmul.f32 %v15616_v7, %v14116_v21  ;;  %v9317_v7 = vld [vmem:[%s15042_s4 + $0xe0] sm:$0xff] }
 0x468   : > { %10816 = vmatprep.mubr.msk.f32.mxu1 %vm547_vm0, %v15609_v40  ;;  %v9283_v40 = vld [vmem:[%s15042_s4 + $0xd0] sm:$0xff] }
 0x46b   : > { %10817 = vmatmul.mubr.msk.f32.gmra.mrb[24].mxu1 %vm547_vm0, %v15610_v8  ;;  %v9284_v8 = vld [vmem:[%s15042_s4 + $0xd8] sm:$0xff] }
 0x46c   : > { %10819 = vmatprep.mubr.msk.f32.mxu1 %vm547_vm0, %v15611_v62  ;;  %v15617_v62 = vld [vmem:[#allocation26_spill] sm:$0xff] }
 0x46f   : > { %10820 = vmatmul.mubr.msk.f32.gmra.mrb[26].mxu1 %vm547_vm0, %v15612_v52  ;;  %v6844_v52 = vmul.f32 %v15617_v62, %v14124_v63  ;;  %v15622_v62 = vld [vmem:[#allocation40_spill] sm:$0xff] }
 0x470   : > { %10822 = vmatprep.mubr.msk.f32.mxu1 %vm547_vm0, %v15613_v50  ;;  %v11176_v50 = vpack.c.bf16 %v9284_v8, %v9283_v40 }
 0x473   : > { %10823 = vmatmul.mubr.msk.f32.gmra.mrb[28].mxu1 %vm547_vm0, %v15614_v54  ;;  %v15618_v54 = vld [vmem:[#allocation33_spill] sm:$0xff] }
 0x474   : > { %10825 = vmatprep.mubr.msk.f32.mxu1 %vm547_vm0, %v14508_v58  ;;  %v6845_v21 = vmul.f32 %v15618_v54, %v14135_v0  ;;  %v9318_v58 = vld [vmem:[%s15042_s4 + $0xe8] sm:$0xff]  ;;  %v15620_v0 = vld [vmem:[#allocation37_spill] sm:$0xff] }
 0x475   : > { %v14539_v40 = vpack.c.bf16 %v9318_v58, %v9317_v7  ;;  %v6847_v8 = vmul.f32 %v15620_v0, %v14150_v60  ;;  %v15621_v54 = vld [vmem:[#allocation77_spill] sm:$0xff]  ;;  %v15625_v58 = vld [vmem:[#allocation51_spill] sm:$0xff]  ;;  %v15626_v7 = vld [vmem:[#allocation82_spill] sm:$0xff] }
 0x477   : > { %10826 = vmatmul.mubr.msk.f32.gmra.mrb[30].mxu1 %vm547_vm0, %v14512_v24 }
 0x478   : > { %10836 = vmatprep.mubr.msk.f32.mxu1 %vm547_vm0, %v6843_v17  ;;  %v15619_v17 = vld [vmem:[#allocation34_spill] sm:$0xff] }
 0x479   : > { %v6846_v63 = vmul.f32 %v15619_v17, %v14147_v56  ;;  %v15624_v56 = vld [vmem:[#allocation80_spill] sm:$0xff] }
 0x47a   : > { %v6850_v60 = vmul.f32 %v15625_v58, %v15624_v56  ;;  %v15633_v58 = vld [vmem:[#allocation67_spill] sm:$0xff] }
 0x47b   : > { %10837 = vmatmul.mubr.msk.f32.vlgmr.msra.gmra.mrb[0].mxu1 %vm547_vm0, %v6844_v52  ;;  %v6848_v52 = vmul.f32 %v15622_v62, %v15621_v54  ;;  %v15629_v54 = vld [vmem:[#allocation59_spill] sm:$0xff] }
 0x47c   : > { %11175 = vmatpush3.bf16.msra.mxu1 %v11172_v37  ;;  %10839 = vmatprep.mubr.msk.f32.mxu1 %vm547_vm0, %v6845_v21  ;;  %v15623_v37 = vld [vmem:[#allocation49_spill] sm:$0xff]  ;;  %v15630_v62 = vld [vmem:[#allocation63_spill] sm:$0xff] }
 0x47d   : > { %11177 = vmatprep.subr.bf16.mxu1 %v11176_v50  ;;  %v6849_v21 = vmul.f32 %v15623_v37, %v14163_v20  ;;  %v6853_v20 = vmul.f32 %v15630_v62, %v14189_v38 }
 0x47f   : > { %10840 = vmatmul.mubr.msk.f32.gmra.mrb[2].mxu1 %vm547_vm0, %v6846_v63  ;;  %v15627_v63 = vld [vmem:[#allocation55_spill] sm:$0xff] }
 0x480   : > { %10842 = vmatprep.mubr.msk.f32.mxu1 %vm547_vm0, %v6847_v8  ;;  %11179 = vmatpush3.bf16.msra.mxu1 %v11176_v50  ;;  %v6851_v0 = vmul.f32 %v15627_v63, %v15626_v7  ;;  %v15628_v50 = vld [vmem:[#allocation83_spill] sm:$0xff]  ;;  %v6855_v7 = vmul.f32 %v15633_v58, %v14201_v61 }
 0x481   : > { %11181 = vmatprep.subr.bf16.mxu1 %v14539_v40  ;;  %v6852_v8 = vmul.f32 %v15629_v54, %v15628_v50  ;;  %v15636_v54 = vld [vmem:[#allocation89_spill] sm:$0xff]  ;;  %v15637_v63 = vld [vmem:[#allocation71_spill] sm:$0xff] }
 0x482   : > { %v6857_v38 = vmul.f32 %v15637_v63, %v15636_v54  ;;  %v15647_v63 = vld [vmem:[#allocation88_spill] sm:$0xff] }
 0x483   : > { %10843 = vmatmul.mubr.msk.f32.gmra.mrb[4].mxu1 %vm547_vm0, %v6848_v52  ;;  %v15631_v52 = vld [vmem:[#allocation85_spill] sm:$0xff] }
 0x484   : > { %10845 = vmatprep.mubr.msk.f32.mxu1 %vm547_vm0, %v6849_v21  ;;  %v15632_v21 = vld [vmem:[#allocation69_spill] sm:$0xff] }
 0x485   : > { %v6854_v56 = vmul.f32 %v15632_v21, %v15631_v52  ;;  %v15640_v21 = vld [vmem:[#allocation79_spill] sm:$0xff] }
 0x486   : > { %v6859_v61 = vmul.f32 %v15640_v21, %v14227_v49 }
 0x487   : > { %10846 = vmatmul.mubr.msk.f32.gmra.mrb[6].mxu1 %vm547_vm0, %v6850_v60  ;;  %v15635_v60 = vld [vmem:[#allocation73_spill] sm:$0xff] }
 0x488   : > { %10848 = vmatprep.mubr.msk.f32.mxu1 %vm547_vm0, %v6851_v0  ;;  %v15634_v0 = vld [vmem:[#allocation87_spill] sm:$0xff] }
 0x489   : > { %v6856_v50 = vmul.f32 %v15635_v60, %v15634_v0  ;;  %v15643_v60 = vld [vmem:[#allocation84_spill] sm:$0xff] }
 0x48a   : > { %v6861_v54 = vmul.f32 %v15643_v60, %v14239_v46 }
 0x48b   : > { %10849 = vmatmul.mubr.msk.f32.gmra.mrb[8].mxu1 %vm547_vm0, %v6852_v8  ;;  %v15638_v8 = vld [vmem:[#allocation91_spill] sm:$0xff] }
 0x48c   : > { %10851 = vmatprep.mubr.msk.f32.mxu1 %vm547_vm0, %v6853_v20  ;;  %v15639_v20 = vld [vmem:[#allocation75_spill] sm:$0xff] }
 0x48d   : > { %v6858_v52 = vmul.f32 %v15639_v20, %v15638_v8  ;;  %v15646_v20 = vld [vmem:[#allocation97_spill] sm:$0xff] }
 0x48e   : > { %v6863_v49 = vmul.f32 %v15647_v63, %v15646_v20 }
 0x48f   : > { %10852 = vmatmul.mubr.msk.f32.gmra.mrb[10].mxu1 %vm547_vm0, %v6854_v56  ;;  %v15641_v56 = vld [vmem:[#allocation93_spill] sm:$0xff] }
 0x490   : > { %10854 = vmatprep.mubr.msk.f32.mxu1 %vm547_vm0, %v6855_v7  ;;  %v15642_v7 = vld [vmem:[#allocation81_spill] sm:$0xff] }
 0x491   : > { %v6860_v0 = vmul.f32 %v15642_v7, %v15641_v56  ;;  %v15650_v7 = vld [vmem:[#allocation92_spill] sm:$0xff] }
 0x492   : > { %v6865_v46 = vmul.f32 %v15650_v7, %v14265_v19 }
 0x493   : > { %10855 = vmatmul.mubr.msk.f32.gmra.mrb[12].mxu1 %vm547_vm0, %v6856_v50  ;;  %v15644_v50 = vld [vmem:[#allocation95_spill] sm:$0xff] }
 0x494   : > { %10857 = vmatprep.mubr.msk.f32.mxu1 %vm547_vm0, %v6857_v38  ;;  %v15645_v38 = vld [vmem:[#allocation86_spill] sm:$0xff] }
 0x495   : > { %v6862_v8 = vmul.f32 %v15645_v38, %v15644_v50  ;;  %v15653_v38 = vld [vmem:[#allocation96_spill] sm:$0xff] }
 0x496   : > { %v6867_v20 = vmul.f32 %v15653_v38, %v14277_v42 }
 0x497   : > { %10858 = vmatmul.mubr.msk.f32.gmra.mrb[14].mxu1 %vm547_vm0, %v6858_v52  ;;  %v15648_v52 = vld [vmem:[#allocation99_spill] sm:$0xff] }
 0x498   : > { %10860 = vmatprep.mubr.msk.f32.mxu1 %vm547_vm0, %v6859_v61  ;;  %v15649_v61 = vld [vmem:[#allocation90_spill] sm:$0xff] }
 0x499   : > { %v6864_v56 = vmul.f32 %v15649_v61, %v15648_v52  ;;  %v15656_v61 = vld [vmem:[#allocation100_spill] sm:$0xff] }
 0x49a   : > { %v6869_v19 = vmul.f32 %v15656_v61, %v14291_v14  ;;  %v15660_v14 = vld [vmem:[#allocation106_spill] sm:$0xff] }
 0x49b   : > { %10861 = vmatmul.mubr.msk.f32.gmra.mrb[16].mxu1 %vm547_vm0, %v6860_v0  ;;  %v15651_v0 = vld [vmem:[#allocation101_spill] sm:$0xff]  ;;  %v14624_v61 = vld [vmem:[#allocation2 + $0x10a] sm:$0xff] }
 0x49c   : > { %10863 = vmatprep.mubr.msk.f32.mxu1 %vm547_vm0, %v6861_v54  ;;  %v15652_v54 = vld [vmem:[#allocation94_spill] sm:$0xff] }
 0x49d   : > { %v6866_v50 = vmul.f32 %v15652_v54, %v15651_v0  ;;  %v15658_v0 = vld [vmem:[#allocation104_spill] sm:$0xff] }
 0x49e   : > { %v6871_v42 = vmul.f32 %v15658_v0, %v14303_v26 }
 0x49f   : > { %10864 = vmatmul.mubr.msk.f32.gmra.mrb[18].mxu1 %vm547_vm0, %v6862_v8  ;;  %v15654_v8 = vld [vmem:[#allocation103_spill] sm:$0xff] }
 0x4a0   : > { %10866 = vmatprep.mubr.msk.f32.mxu1 %vm547_vm0, %v6863_v49  ;;  %v15655_v49 = vld [vmem:[#allocation98_spill] sm:$0xff] }
 0x4a1   : > { %v6868_v52 = vmul.f32 %v15655_v49, %v15654_v8 }
 0x4a3   : > { %10867 = vmatmul.mubr.msk.f32.gmra.mrb[20].mxu1 %vm547_vm0, %v6864_v56  ;;  %v15657_v56 = vld [vmem:[#allocation102_spill] sm:$0xff] }
 0x4a4   : > { %10869 = vmatprep.mubr.msk.f32.mxu1 %vm547_vm0, %v6865_v46  ;;  %v6870_v46 = vmul.f32 %v15657_v56, %v14300_v4  ;;  %v15661_v4 = vld [vmem:[#allocation107_spill] sm:$0xff] }
 0x4a5   : > { %v6874_v26 = vmul.f32 %v14624_v61, %v15661_v4  ;;  %v7267_v4 = vmul.f32 %v13689_v10, %v13938_v5  ;;  %v7269_v10 = vmul.f32 %v13709_v25, %v13951_v2  ;;  %v7270_v5 = vmul.f32 %v13717_v36, %v13960_v43  ;;  %v15673_v43 = vld [vmem:[#allocation12_spill] sm:$0xff]  ;;  %v15674_v2 = vld [vmem:[#allocation11_spill] sm:$0xff] }
 0x4a6   : > { %v7273_v25 = vmul.f32 %v13753_v41, %v13977_v13  ;;  %v7274_v36 = vmul.f32 %v13761_v34, %v13986_v45  ;;  %v7277_v41 = vmul.f32 %v13797_v23, %v14001_v12  ;;  %v7278_v34 = vmul.f32 %v13805_v28, %v14010_v32  ;;  %v15664_v23 = vld [vmem:[#allocation31_spill] sm:$0xff]  ;;  %v15667_v45 = vld [vmem:[#allocation74_spill] sm:$0xff]  ;;  %v15669_v13 = vld [vmem:[#allocation8_spill] sm:$0xff] }
 0x4a7   : > { %10870 = vmatmul.mubr.msk.f32.gmra.mrb[22].mxu1 %vm547_vm0, %v6866_v50  ;;  %v14617_v50 = vld [vmem:[#allocation2 + $0x102] sm:$0xff]  ;;  %v15666_v28 = vld [vmem:[#allocation35_spill] sm:$0xff] }
 0x4a8   : > { %10872 = vmatprep.mubr.msk.f32.mxu1 %vm547_vm0, %v6867_v20  ;;  %v15659_v20 = vld [vmem:[#allocation105_spill] sm:$0xff] }
 0x4a9   : > { %v6872_v8 = vmul.f32 %v15659_v20, %v14312_v47  ;;  %v9320_v47 = vld [vmem:[%s15042_s4 + $0xf8] sm:$0xff] }
 0x4ab   : > { %10873 = vmatmul.mubr.msk.f32.gmra.mrb[24].mxu1 %vm547_vm0, %v6868_v52  ;;  %v6873_v52 = vmul.f32 %v14617_v50, %v15660_v14 }
 0x4ac   : > { %10875 = vmatprep.mubr.msk.f32.mxu1 %vm547_vm0, %v6869_v19  ;;  %v15662_v19 = vld [vmem:[#allocation23_spill] sm:$0xff] }
 0x4af   : > { %10876 = vmatmul.mubr.msk.f32.gmra.mrb[26].mxu1 %vm547_vm0, %v6870_v46  ;;  %v7265_v46 = vmul.f32 %v15662_v19, %v13921_v48  ;;  %v9353_v48 = vld [vmem:[%s15042_s4 + $0x100] sm:$0xff]  ;;  %v9354_v19 = vld [vmem:[%s15042_s4 + $0x108] sm:$0xff] }
 0x4b0   : > { %10878 = vmatprep.mubr.msk.f32.mxu1 %vm547_vm0, %v6871_v42  ;;  %v9319_v42 = vld [vmem:[%s15042_s4 + $0xf0] sm:$0xff] }
 0x4b3   : > { %10879 = vmatmul.mubr.msk.f32.gmra.mrb[28].mxu1 %vm547_vm0, %v6872_v8  ;;  %v7266_v8 = vmul.f32 %v13685_v11, %v13933_v1  ;;  %v7268_v11 = vmul.f32 %v13697_v16, %v13948_v35  ;;  %v14655_v1 = vpack.c.bf16 %v9354_v19, %v9353_v48  ;;  %v7272_v16 = vmul.f32 %v13741_v55, %v13972_v59  ;;  %v15671_v59 = vld [vmem:[#allocation9_spill] sm:$0xff]  ;;  %v15679_v48 = vld [vmem:[#allocation18_spill] sm:$0xff] }
 0x4b4   : > { %10881 = vmatprep.mubr.msk.f32.mxu1 %vm547_vm0, %v6873_v52  ;;  %v11184_v52 = vpack.c.bf16 %v9320_v47, %v9319_v42  ;;  %v7276_v55 = vmul.f32 %v13785_v27, %v13998_v31  ;;  %v7280_v27 = vmul.f32 %v13829_v3, %v14024_v18  ;;  %v15663_v31 = vld [vmem:[#allocation66_spill] sm:$0xff]  ;;  %v15670_v3 = vld [vmem:[#allocation41_spill] sm:$0xff]  ;;  %v7290_v19 = vmul.f32 %v15679_v48, %v15577_v39  ;;  %v7681_v48 = vld [vmem:[#allocation2 + $0xf1] sm:$0xff] }
 0x4b5   : > { %v7281_v12 = vmul.f32 %v15663_v31, %v14027_v22  ;;  %v7285_v22 = vmul.f32 %v15671_v59, %v15670_v3  ;;  %v15677_v47 = vld [vmem:[#allocation53_spill] sm:$0xff]  ;;  %v7668_v59 = vld [vmem:[#allocation2 + $0x89] sm:$0xff] }
 0x4b6   : > { %v15684_v39 = vld [vmem:[#allocation57_spill] sm:$0xff] }
 0x4b7   : > { %10882 = vmatmul.mubr.msk.f32.gmra.mrb[30].mxu1 %vm547_vm0, %v6874_v26  ;;  %v15675_v26 = vld [vmem:[#allocation47_spill] sm:$0xff]  ;;  %v7667_v3 = vld [vmem:[#allocation2 + $0x81] sm:$0xff] }
 0x4b8   : > { %10892 = vmatprep.mubr.msk.f32.mxu1 %vm547_vm0, %v7265_v46  ;;  %v15676_v46 = vld [vmem:[#allocation17_spill] sm:$0xff] }
 0x4b9   : > { %v7288_v42 = vmul.f32 %v15676_v46, %v15675_v26  ;;  %v7675_v26 = vld [vmem:[#allocation2 + $0xc1] sm:$0xff]  ;;  %v7676_v46 = vld [vmem:[#allocation2 + $0xc9] sm:$0xff] }
 0x4bb   : > { %10893 = vmatmul.mubr.msk.f32.vlgmr.msra.gmra.mrb[0].mxu1 %vm547_vm0, %v7266_v8  ;;  %v15678_v8 = vld [vmem:[#allocation16_spill] sm:$0xff] }
 0x4bc   : > { %11183 = vmatpush3.bf16.msra.mxu1 %v14539_v40  ;;  %10895 = vmatprep.mubr.msk.f32.mxu1 %vm547_vm0, %v7267_v4  ;;  %v7271_v40 = vmul.f32 %v13727_v29, %v13963_v53  ;;  %v7275_v29 = vmul.f32 %v13771_v57, %v13989_v51  ;;  %v7279_v57 = vmul.f32 %v13815_v6, %v14015_v15  ;;  %v15665_v51 = vld [vmem:[#allocation70_spill] sm:$0xff]  ;;  %v15672_v53 = vld [vmem:[#allocation45_spill] sm:$0xff] }
 0x4bd   : > { %11185 = vmatprep.subr.bf16.mxu1 %v11184_v52  ;;  %v7282_v32 = vmul.f32 %v15665_v51, %v15664_v23  ;;  %v7283_v15 = vmul.f32 %v15667_v45, %v15666_v28  ;;  %v15668_v6 = vld [vmem:[#allocation38_spill] sm:$0xff]  ;;  %v7286_v35 = vmul.f32 %v15673_v43, %v15672_v53  ;;  %v7287_v4 = vmul.f32 %v15674_v2, %v15571_v33  ;;  %v7657_v23 = vld [vmem:[#allocation2 + $0x31] sm:$0xff]  ;;  %v7658_v51 = vld [vmem:[#allocation2 + $0x39] sm:$0xff] }
 0x4be   : > { %v7284_v18 = vmul.f32 %v15669_v13, %v15668_v6  ;;  %v7660_v28 = vld [vmem:[#allocation2 + $0x49] sm:$0xff]  ;;  %v7661_v45 = vld [vmem:[#allocation2 + $0x51] sm:$0xff]  ;;  %v7670_v53 = vld [vmem:[#allocation2 + $0x99] sm:$0xff] }
 0x4bf   : > { %10896 = vmatmul.mubr.msk.f32.gmra.mrb[2].mxu1 %vm547_vm0, %v7268_v11  ;;  %v15680_v11 = vld [vmem:[#allocation15_spill] sm:$0xff]  ;;  %v7671_v43 = vld [vmem:[#allocation2 + $0xa1] sm:$0xff] }
 0x4c0   : > { %10898 = vmatprep.mubr.msk.f32.mxu1 %vm547_vm0, %v7269_v10  ;;  %11187 = vmatpush3.bf16.msra.mxu1 %v11184_v52  ;;  %v7289_v52 = vmul.f32 %v15678_v8, %v15677_v47  ;;  %v7291_v33 = vmul.f32 %v15680_v11, %v15579_v44  ;;  %v7292_v10 = vmul.f32 %v15578_v9, %v15582_v30  ;;  %v15685_v44 = vld [vmem:[#allocation19_spill] sm:$0xff]  ;;  %v7678_v47 = vld [vmem:[#allocation2 + $0xd9] sm:$0xff]  ;;  %v7679_v8 = vld [vmem:[#allocation2 + $0xe1] sm:$0xff] }
 0x4c1   : > { %11189 = vmatprep.subr.bf16.mxu1 %v14655_v1  ;;  %v9355_v30 = vld [vmem:[%s15042_s4 + $0x110] sm:$0xff]  ;;  %v15687_v11 = vld [vmem:[#allocation21_spill] sm:$0xff] }
 0x4c2   : > { %v7664_v6 = vld [vmem:[#allocation2 + $0x69] sm:$0xff]  ;;  %v7665_v13 = vld [vmem:[#allocation2 + $0x71] sm:$0xff] }
 0x4c3   : > { %10899 = vmatmul.mubr.msk.f32.gmra.mrb[4].mxu1 %vm547_vm0, %v7270_v5  ;;  %v15681_v5 = vld [vmem:[#allocation20_spill] sm:$0xff] }
 0x4c4   : > { %10901 = vmatprep.mubr.msk.f32.mxu1 %vm547_vm0, %v7271_v40  ;;  %v15682_v40 = vld [vmem:[#allocation43_spill] sm:$0xff] }
 0x4c5   : > { %v7673_v2 = vld [vmem:[#allocation2 + $0xb1] sm:$0xff] }
 0x4c7   : > { %10902 = vmatmul.mubr.msk.f32.gmra.mrb[6].mxu1 %vm547_vm0, %v7272_v16  ;;  %v7293_v16 = vmul.f32 %v15682_v40, %v15681_v5  ;;  %v7686_v5 = vld [vmem:[#allocation2 + $0x119] sm:$0xff] }
 0x4c8   : > { %10904 = vmatprep.mubr.msk.f32.mxu1 %vm547_vm0, %v7273_v25  ;;  %v7263_v25 = vld [vmem:[#allocation2 + $0x110] sm:$0xff]  ;;  %v15688_v40 = vld [vmem:[#allocation24_spill] sm:$0xff] }
 0x4cb   : > { %10905 = vmatmul.mubr.msk.f32.gmra.mrb[8].mxu1 %vm547_vm0, %v7274_v36  ;;  %v15683_v36 = vld [vmem:[#allocation22_spill] sm:$0xff] }
 0x4cc   : > { %10907 = vmatprep.mubr.msk.f32.mxu1 %vm547_vm0, %v7275_v29  ;;  %v7294_v29 = vmul.f32 %v15684_v39, %v15683_v36  ;;  %v8047_v36 = vld [vmem:[#allocation2 + $0x32] sm:$0xff]  ;;  %v15689_v39 = vld [vmem:[#allocation26_spill] sm:$0xff] }
 0x4cf   : > { %10908 = vmatmul.mubr.msk.f32.gmra.mrb[10].mxu1 %vm547_vm0, %v7276_v55  ;;  %v7264_v55 = vld [vmem:[#allocation2 + $0x118] sm:$0xff] }
 0x4d0   : > { %10910 = vmatprep.mubr.msk.f32.mxu1 %vm547_vm0, %v7277_v41  ;;  %v7295_v41 = vmul.f32 %v7263_v25, %v15685_v44  ;;  %v8046_v25 = vld [vmem:[#allocation2 + $0x2a] sm:$0xff] }
 0x4d3   : > { %10911 = vmatmul.mubr.msk.f32.gmra.mrb[12].mxu1 %vm547_vm0, %v7278_v34  ;;  %v15686_v34 = vld [vmem:[#allocation25_spill] sm:$0xff] }
 0x4d4   : > { %10913 = vmatprep.mubr.msk.f32.mxu1 %vm547_vm0, %v7279_v57  ;;  %v7296_v9 = vmul.f32 %v7264_v55, %v15686_v34  ;;  %v9356_v57 = vld [vmem:[%s15042_s4 + $0x118] sm:$0xff]  ;;  %v15690_v55 = vld [vmem:[#allocation33_spill] sm:$0xff] }
 0x4d5   : > { %v11192_v31 = vpack.c.bf16 %v9356_v57, %v9355_v30  ;;  %v8079_v44 = vmul.f32 %v8047_v36, %v15690_v55  ;;  %v8050_v57 = vld [vmem:[#allocation2 + $0x4a] sm:$0xff] }
 0x4d6   : > { %v8066_v36 = vld [vmem:[#allocation2 + $0xca] sm:$0xff] }
 0x4d7   : > { %10914 = vmatmul.mubr.msk.f32.gmra.mrb[14].mxu1 %vm547_vm0, %v7280_v27  ;;  %v7655_v27 = vld [vmem:[#allocation2 + $0x21] sm:$0xff] }
 0x4d8   : > { %10916 = vmatprep.mubr.msk.f32.mxu1 %vm547_vm0, %v7281_v12  ;;  %v7656_v12 = vld [vmem:[#allocation2 + $0x29] sm:$0xff] }
 0x4db   : > { %10917 = vmatmul.mubr.msk.f32.gmra.mrb[16].mxu1 %vm547_vm0, %v7282_v32  ;;  %v7659_v32 = vld [vmem:[#allocation2 + $0x41] sm:$0xff] }
 0x4dc   : > { %10919 = vmatprep.mubr.msk.f32.mxu1 %vm547_vm0, %v7283_v15  ;;  %v7662_v15 = vld [vmem:[#allocation2 + $0x59] sm:$0xff] }
 0x4df   : > { %10920 = vmatmul.mubr.msk.f32.gmra.mrb[18].mxu1 %vm547_vm0, %v7284_v18  ;;  %v7666_v18 = vld [vmem:[#allocation2 + $0x79] sm:$0xff] }
 0x4e0   : > { %10922 = vmatprep.mubr.msk.f32.mxu1 %vm547_vm0, %v7285_v22  ;;  %v7669_v22 = vld [vmem:[#allocation2 + $0x91] sm:$0xff] }
 0x4e3   : > { %10923 = vmatmul.mubr.msk.f32.gmra.mrb[20].mxu1 %vm547_vm0, %v7286_v35  ;;  %v7672_v35 = vld [vmem:[#allocation2 + $0xa9] sm:$0xff] }
 0x4e4   : > { %10925 = vmatprep.mubr.msk.f32.mxu1 %vm547_vm0, %v7287_v4  ;;  %v7674_v4 = vld [vmem:[#allocation2 + $0xb9] sm:$0xff] }
 0x4e7   : > { %10926 = vmatmul.mubr.msk.f32.gmra.mrb[22].mxu1 %vm547_vm0, %v7288_v42  ;;  %v7677_v42 = vld [vmem:[#allocation2 + $0xd1] sm:$0xff] }
 0x4e8   : > { %10928 = vmatprep.mubr.msk.f32.mxu1 %vm547_vm0, %v7289_v52  ;;  %v7680_v52 = vld [vmem:[#allocation2 + $0xe9] sm:$0xff] }
 0x4eb   : > { %10929 = vmatmul.mubr.msk.f32.gmra.mrb[24].mxu1 %vm547_vm0, %v7290_v19  ;;  %v7682_v19 = vld [vmem:[#allocation2 + $0xf9] sm:$0xff] }
 0x4ec   : > { %10931 = vmatprep.mubr.msk.f32.mxu1 %vm547_vm0, %v7291_v33  ;;  %v7685_v33 = vld [vmem:[#allocation2 + $0x111] sm:$0xff] }
 0x4ef   : > { %10932 = vmatmul.mubr.msk.f32.gmra.mrb[26].mxu1 %vm547_vm0, %v7292_v10  ;;  %v8045_v10 = vld [vmem:[#allocation2 + $0x22] sm:$0xff] }
 0x4f0   : > { %10934 = vmatprep.mubr.msk.f32.mxu1 %vm547_vm0, %v7293_v16  ;;  %v8077_v16 = vmul.f32 %v8045_v10, %v15688_v40  ;;  %v8065_v40 = vld [vmem:[#allocation2 + $0xc2] sm:$0xff] }
 0x4f3   : > { %10935 = vmatmul.mubr.msk.f32.gmra.mrb[28].mxu1 %vm547_vm0, %v7294_v29  ;;  %v8078_v29 = vmul.f32 %v8046_v25, %v15689_v39  ;;  %v8067_v39 = vld [vmem:[#allocation2 + $0xd2] sm:$0xff] }
 0x4f4   : > { %10937 = vmatprep.mubr.msk.f32.mxu1 %vm547_vm0, %v7295_v41  ;;  %v8048_v41 = vld [vmem:[#allocation2 + $0x3a] sm:$0xff] }
 0x4f5   : > { %v8080_v34 = vmul.f32 %v8048_v41, %v15619_v17  ;;  %v8069_v41 = vld [vmem:[#allocation2 + $0xe2] sm:$0xff] }
 0x4f7   : > { %10938 = vmatmul.mubr.msk.f32.gmra.mrb[30].mxu1 %vm547_vm0, %v7296_v9  ;;  %v15691_v9 = vld [vmem:[#allocation37_spill] sm:$0xff] }
 0x4f8   : > { %10948 = vmatprep.mubr.msk.f32.mxu1 %vm547_vm0, %v7655_v27  ;;  %v8051_v27 = vld [vmem:[#allocation2 + $0x52] sm:$0xff] }
 0x4fb   : > { %10949 = vmatmul.mubr.msk.f32.vlgmr.msra.gmra.mrb[0].mxu1 %vm547_vm0, %v7656_v12 }
 0x4fc   : > { %11191 = vmatpush3.bf16.msra.mxu1 %v14655_v1  ;;  %10951 = vmatprep.mubr.msk.f32.mxu1 %vm547_vm0, %v7657_v23  ;;  %v7663_v1 = vld [vmem:[#allocation2 + $0x61] sm:$0xff]  ;;  %v8083_v23 = vmul.f32 %v8051_v27, %v15623_v37 }
 0x4fd   : > { %11193 = vmatprep.subr.bf16.mxu1 %v11192_v31  ;;  %v8072_v27 = vld [vmem:[#allocation2 + $0xfa] sm:$0xff] }
 0x4ff   : > { %10952 = vmatmul.mubr.msk.f32.gmra.mrb[2].mxu1 %vm547_vm0, %v7658_v51  ;;  %v8052_v51 = vld [vmem:[#allocation2 + $0x5a] sm:$0xff] }
 0x500   : > { %10954 = vmatprep.mubr.msk.f32.mxu1 %vm547_vm0, %v7659_v32  ;;  %11195 = vmatpush3.bf16.msra.mxu1 %v11192_v31  ;;  %v15692_v31 = vld [vmem:[#allocation40_spill] sm:$0xff]  ;;  %v8053_v32 = vld [vmem:[#allocation2 + $0x62] sm:$0xff] }
 0x501   : > { %v8082_v12 = vmul.f32 %v8050_v57, %v15692_v31  ;;  %v15703_v57 = vld [vmem:[#allocation100_spill] sm:$0xff] }
 0x502   : > { %v8075_v31 = vld [vmem:[#allocation2 + $0x112] sm:$0xff] }
 0x503   : > { %10955 = vmatmul.mubr.msk.f32.gmra.mrb[4].mxu1 %vm547_vm0, %v7660_v28  ;;  %v15693_v28 = vld [vmem:[#allocation51_spill] sm:$0xff] }
 0x504   : > { %10957 = vmatprep.mubr.msk.f32.mxu1 %vm547_vm0, %v7661_v45  ;;  %v8084_v17 = vmul.f32 %v8052_v51, %v15693_v28  ;;  %v15694_v45 = vld [vmem:[#allocation55_spill] sm:$0xff] }
 0x507   : > { %10958 = vmatmul.mubr.msk.f32.gmra.mrb[6].mxu1 %vm547_vm0, %v7662_v15  ;;  %v8085_v15 = vmul.f32 %v8053_v32, %v15694_v45 }
 0x508   : > { %10960 = vmatprep.mubr.msk.f32.mxu1 %vm547_vm0, %v7663_v1  ;;  %v8054_v1 = vld [vmem:[#allocation2 + $0x6a] sm:$0xff] }
 0x50b   : > { %10961 = vmatmul.mubr.msk.f32.gmra.mrb[8].mxu1 %vm547_vm0, %v7664_v6  ;;  %v8055_v6 = vld [vmem:[#allocation2 + $0x72] sm:$0xff] }
 0x50c   : > { %10963 = vmatprep.mubr.msk.f32.mxu1 %vm547_vm0, %v7665_v13  ;;  %v15695_v13 = vld [vmem:[#allocation59_spill] sm:$0xff]  ;;  %v8087_v37 = vmul.f32 %v8055_v6, %v15630_v62 }
 0x50f   : > { %10964 = vmatmul.mubr.msk.f32.gmra.mrb[10].mxu1 %vm547_vm0, %v7666_v18  ;;  %v8086_v18 = vmul.f32 %v8054_v1, %v15695_v13 }
 0x510   : > { %10966 = vmatprep.mubr.msk.f32.mxu1 %vm547_vm0, %v7667_v3  ;;  %v8056_v3 = vld [vmem:[#allocation2 + $0x7a] sm:$0xff] }
 0x513   : > { %10967 = vmatmul.mubr.msk.f32.gmra.mrb[12].mxu1 %vm547_vm0, %v7668_v59  ;;  %v8057_v59 = vld [vmem:[#allocation2 + $0x82] sm:$0xff] }
 0x514   : > { %10969 = vmatprep.mubr.msk.f32.mxu1 %vm547_vm0, %v7669_v22  ;;  %v15696_v22 = vld [vmem:[#allocation69_spill] sm:$0xff] }
 0x517   : > { %10970 = vmatmul.mubr.msk.f32.gmra.mrb[14].mxu1 %vm547_vm0, %v7670_v53  ;;  %v8088_v53 = vmul.f32 %v8056_v3, %v15696_v22 }
 0x518   : > { %10972 = vmatprep.mubr.msk.f32.mxu1 %vm547_vm0, %v7671_v43  ;;  %v8089_v43 = vmul.f32 %v8057_v59, %v15633_v58 }
 0x51b   : > { %10973 = vmatmul.mubr.msk.f32.gmra.mrb[16].mxu1 %vm547_vm0, %v7672_v35  ;;  %v8058_v35 = vld [vmem:[#allocation2 + $0x8a] sm:$0xff] }
 0x51c   : > { %10975 = vmatprep.mubr.msk.f32.mxu1 %vm547_vm0, %v7673_v2  ;;  %v8059_v2 = vld [vmem:[#allocation2 + $0x92] sm:$0xff] }
 0x51f   : > { %10976 = vmatmul.mubr.msk.f32.gmra.mrb[18].mxu1 %vm547_vm0, %v7674_v4  ;;  %v15697_v4 = vld [vmem:[#allocation73_spill] sm:$0xff] }
 0x520   : > { %10978 = vmatprep.mubr.msk.f32.mxu1 %vm547_vm0, %v7675_v26  ;;  %v8090_v26 = vmul.f32 %v8058_v35, %v15697_v4 }
 0x523   : > { %10979 = vmatmul.mubr.msk.f32.gmra.mrb[20].mxu1 %vm547_vm0, %v7676_v46  ;;  %v15698_v46 = vld [vmem:[#allocation71_spill] sm:$0xff] }
 0x524   : > { %10981 = vmatprep.mubr.msk.f32.mxu1 %vm547_vm0, %v7677_v42  ;;  %v8091_v62 = vmul.f32 %v8059_v2, %v15698_v46  ;;  %v8060_v42 = vld [vmem:[#allocation2 + $0x9a] sm:$0xff] }
 0x527   : > { %10982 = vmatmul.mubr.msk.f32.gmra.mrb[22].mxu1 %vm547_vm0, %v7678_v47  ;;  %v8061_v47 = vld [vmem:[#allocation2 + $0xa2] sm:$0xff] }
 0x528   : > { %10984 = vmatprep.mubr.msk.f32.mxu1 %vm547_vm0, %v7679_v8  ;;  %v15699_v8 = vld [vmem:[#allocation75_spill] sm:$0xff]  ;;  %v8093_v58 = vmul.f32 %v8061_v47, %v15640_v21  ;;  %v8097_v21 = vmul.f32 %v8065_v40, %v15647_v63  ;;  %v8101_v63 = vmul.f32 %v8069_v41, %v15653_v38  ;;  %v8105_v38 = vmul.f32 %v14617_v50, %v15658_v0  ;;  %v14852_v0 = vld [vmem:[%s15043_s5] ss:$0 sm:$0xff] }
 0x52b   : > { %10985 = vmatmul.mubr.msk.f32.gmra.mrb[24].mxu1 %vm547_vm0, %v7680_v52  ;;  %v8092_v52 = vmul.f32 %v8060_v42, %v15699_v8 }
 0x52c   : > { %10987 = vmatprep.mubr.msk.f32.mxu1 %vm547_vm0, %v7681_v48  ;;  %v8062_v48 = vld [vmem:[#allocation2 + $0xaa] sm:$0xff] }
 0x52f   : > { %10988 = vmatmul.mubr.msk.f32.gmra.mrb[26].mxu1 %vm547_vm0, %v7682_v19  ;;  %v8063_v19 = vld [vmem:[#allocation2 + $0xb2] sm:$0xff] }
 0x530   : > { %10990 = vmatprep.mubr.msk.f32.mxu1 %vm547_vm0, %v15687_v11  ;;  %v15700_v11 = vld [vmem:[#allocation81_spill] sm:$0xff]  ;;  %v8095_v10 = vmul.f32 %v8063_v19, %v15643_v60  ;;  %v8099_v60 = vmul.f32 %v8067_v39, %v15650_v7 }
 0x533   : > { %10991 = vmatmul.mubr.msk.f32.gmra.mrb[28].mxu1 %vm547_vm0, %v14512_v24  ;;  %v8049_v24 = vld [vmem:[#allocation2 + $0x42] sm:$0xff] }
 0x534   : > { %10993 = vmatprep.mubr.msk.f32.mxu1 %vm547_vm0, %v7685_v33  ;;  %v8081_v30 = vmul.f32 %v8049_v24, %v15691_v9  ;;  %v8094_v33 = vmul.f32 %v8062_v48, %v15700_v11  ;;  %v8071_v9 = vld [vmem:[#allocation2 + $0xf2] sm:$0xff]  ;;  %v4420_v11 = vld [vmem:[%s11980_s12 + $0x41] sm:$0xff] }
 0x535   : > { %v8103_v7 = vmul.f32 %v8071_v9, %v15703_v57  ;;  %v4424_v57 = vld [vmem:[%s11980_s12 + $0x61] sm:$0xff] }
 0x537   : > { %10994 = vmatmul.mubr.msk.f32.gmra.mrb[30].mxu1 %vm547_vm0, %v7686_v5  ;;  %v8064_v5 = vld [vmem:[#allocation2 + $0xba] sm:$0xff] }
 0x538   : > { %11004 = vmatprep.mubr.msk.f32.mxu1 %vm547_vm0, %v8077_v16  ;;  %v15701_v16 = vld [vmem:[#allocation86_spill] sm:$0xff] }
 0x539   : > { %v8096_v25 = vmul.f32 %v8064_v5, %v15701_v16 }
 0x53b   : > { %11005 = vmatmul.mubr.msk.f32.vlgmr.msra.gmra.mrb[0].mxu1 %vm547_vm0, %v8078_v29  ;;  %v15702_v29 = vld [vmem:[#allocation90_spill] sm:$0xff] }
 0x53c   : > { %11007 = vmatprep.mubr.msk.f32.mxu1 %vm547_vm0, %v8079_v44  ;;  %v8098_v55 = vmul.f32 %v8066_v36, %v15702_v29  ;;  %v8068_v44 = vld [vmem:[#allocation2 + $0xda] sm:$0xff]  ;;  %v4422_v29 = vld [vmem:[%s11980_s12 + $0x51] sm:$0xff] }
 0x53d   : > { %v8100_v24 = vmul.f32 %v8068_v44, %v15652_v54  ;;  %v8104_v54 = vmul.f32 %v8072_v27, %v15657_v56  ;;  %v15704_v56 = vld [vmem:[#allocation107_spill] sm:$0xff] }
 0x53f   : > { %11008 = vmatmul.mubr.msk.f32.gmra.mrb[2].mxu1 %vm547_vm0, %v8080_v34  ;;  %v8070_v34 = vld [vmem:[#allocation2 + $0xea] sm:$0xff] }
 0x540   : > { %11010 = vmatprep.mubr.msk.f32.mxu1 %vm547_vm0, %v8081_v30  ;;  %v8102_v30 = vmul.f32 %v8070_v34, %v15655_v49  ;;  %v8106_v49 = vmul.f32 %v14624_v61, %v15659_v20  ;;  %v4415_v61 = vld [vmem:[%s11980_s12 + $0x19] sm:$0xff] }
 0x543   : > { %11011 = vmatmul.mubr.msk.f32.gmra.mrb[4].mxu1 %vm547_vm0, %v8082_v12  ;;  %v8076_v12 = vld [vmem:[#allocation2 + $0x11a] sm:$0xff] }
 0x544   : > { %11013 = vmatprep.mubr.msk.f32.mxu1 %vm547_vm0, %v8083_v23  ;;  %v8107_v23 = vmul.f32 %v8075_v31, %v15660_v14  ;;  %v8108_v51 = vmul.f32 %v8076_v12, %v15704_v56  ;;  %v4414_v14 = vld [vmem:[%s11980_s12 + $0x11] sm:$0xff] }
 0x547   : > { %11014 = vmatmul.mubr.msk.f32.gmra.mrb[6].mxu1 %vm547_vm0, %v8084_v17 }
 0x548   : > { %11016 = vmatprep.mubr.msk.f32.mxu1 %vm547_vm0, %v8085_v15  ;;  %v4417_v15 = vld [vmem:[%s11980_s12 + $0x29] sm:$0xff] }
 0x54b   : > { %11017 = vmatmul.mubr.msk.f32.gmra.mrb[8].mxu1 %vm547_vm0, %v8086_v18  ;;  %v4416_v18 = vld [vmem:[%s11980_s12 + $0x21] sm:$0xff] }
 0x54c   : > { %11019 = vmatprep.mubr.msk.f32.mxu1 %vm547_vm0, %v8087_v37 }
 0x54f   : > { %11020 = vmatmul.mubr.msk.f32.gmra.mrb[10].mxu1 %vm547_vm0, %v8088_v53 }
 0x550   : > { %11022 = vmatprep.mubr.msk.f32.mxu1 %vm547_vm0, %v8089_v43  ;;  %v4419_v43 = vld [vmem:[%s11980_s12 + $0x39] sm:$0xff] }
 0x553   : > { %11023 = vmatmul.mubr.msk.f32.gmra.mrb[12].mxu1 %vm547_vm0, %v8090_v26  ;;  %v4418_v26 = vld [vmem:[%s11980_s12 + $0x31] sm:$0xff] }
 0x554   : > { %11025 = vmatprep.mubr.msk.f32.mxu1 %vm547_vm0, %v8091_v62 }
 0x557   : > { %11026 = vmatmul.mubr.msk.f32.gmra.mrb[14].mxu1 %vm547_vm0, %v8092_v52  ;;  %v4421_v52 = vld [vmem:[%s11980_s12 + $0x49] sm:$0xff] }
 0x558   : > { %11028 = vmatprep.mubr.msk.f32.mxu1 %vm547_vm0, %v8093_v58 }
 0x55b   : > { %11029 = vmatmul.mubr.msk.f32.gmra.mrb[16].mxu1 %vm547_vm0, %v8094_v33 }
 0x55c   : > { %11031 = vmatprep.mubr.msk.f32.mxu1 %vm547_vm0, %v8095_v10 }
 0x55f   : > { %11032 = vmatmul.mubr.msk.f32.gmra.mrb[18].mxu1 %vm547_vm0, %v8096_v25  ;;  %v4423_v25 = vld [vmem:[%s11980_s12 + $0x59] sm:$0xff] }
 0x560   : > { %11034 = vmatprep.mubr.msk.f32.mxu1 %vm547_vm0, %v8097_v21 }
 0x563   : > { %11035 = vmatmul.mubr.msk.f32.gmra.mrb[20].mxu1 %vm547_vm0, %v8098_v55 }
 0x564   : > { %11037 = vmatprep.mubr.msk.f32.mxu1 %vm547_vm0, %v8099_v60 }
 0x567   : > { %11038 = vmatmul.mubr.msk.f32.gmra.mrb[22].mxu1 %vm547_vm0, %v8100_v24 }
 0x568   : > { %11040 = vmatprep.mubr.msk.f32.mxu1 %vm547_vm0, %v8101_v63  ;;  %v4425_v63 = vld [vmem:[%s11980_s12 + $0x69] sm:$0xff] }
 0x56b   : > { %11041 = vmatmul.mubr.msk.f32.gmra.mrb[24].mxu1 %vm547_vm0, %v8102_v30 }
 0x56c   : > { %11043 = vmatprep.mubr.msk.f32.mxu1 %vm547_vm0, %v8103_v7 }
 0x56f   : > { %11044 = vmatmul.mubr.msk.f32.gmra.mrb[26].mxu1 %vm547_vm0, %v8104_v54 }
 0x570   : > { %11046 = vmatprep.mubr.msk.f32.mxu1 %vm547_vm0, %v8105_v38 }
 0x573   : > { %11047 = vmatmul.mubr.msk.f32.gmra.mrb[28].mxu1 %vm547_vm0, %v8106_v49  ;;  %v4427_v49 = vld [vmem:[%s11980_s12 + $0x79] sm:$0xff] }
 0x574   : > { %11049 = vmatprep.mubr.msk.f32.mxu1 %vm547_vm0, %v8107_v23 }
 0x577   : > { %11050 = vmatmul.mubr.msk.f32.gmra.mrb[30].mxu1 %vm547_vm0, %v8108_v51  ;;  %v4426_v51 = vld [vmem:[%s11980_s12 + $0x71] sm:$0xff] }
 0x60e   : > { %v11006_v50 = vpop.f32.mrb[0].mxu1 }
 0x60f   : > { %v8475_v20 = vadd.f32 %v11006_v50, %v14852_v0  ;;  %v8276_v32 = vpop.f32.mrb[1].mxu1 }
 0x610   : > { %v8474_v28 = vadd.f32 %v14852_v0, %v8276_v32 }
 0x611   : > { %v8507_v17 = vadd.f32 %v8475_v20, %v4415_v61 }
 0x612   : > { %v8506_v45 = vadd.f32 %v8474_v28, %v4414_v14  ;;  %v11009_v1 = vpop.f32.mrb[2].mxu1  ;;  %v4429_v28 = vld [vmem:[%s11980_s12 + $0x89] sm:$0xff] }
 0x613   : > { %v8539_v6 = vmax.f32 %v8507_v17, 0.0  ;;  %v8477_v13 = vadd.f32 %v11009_v1, %v14852_v0  ;;  %v8286_v37 = vpop.f32.mrb[3].mxu1  ;;  %v4428_v1 = vld [vmem:[%s11980_s12 + $0x81] sm:$0xff] }
 0x614   : > { %v8538_v3 = vmax.f32 %v8506_v45, 0.0  ;;  %v8476_v59 = vadd.f32 %v14852_v0, %v8286_v37 }
 0x615   : > { %8571 = vst.msk [vmem:[%s14864_s18 + $0x8] sm:$0xff] %vm547_vm0, %v8539_v6  ;;  %v8509_v22 = vadd.f32 %v8477_v13, %v4417_v15 }
 0x616   : > { %8570 = vst.msk [vmem:[%s14864_s18] sm:$0xff] %vm547_vm0, %v8538_v3  ;;  %v8508_v53 = vadd.f32 %v8476_v59, %v4416_v18  ;;  %v11012_v35 = vpop.f32.mrb[4].mxu1  ;;  %v4431_v59 = vld [vmem:[%s11980_s12 + $0x99] sm:$0xff] }
 0x617   : > { %v8541_v2 = vmax.f32 %v8509_v22, 0.0  ;;  %v8479_v4 = vadd.f32 %v11012_v35, %v14852_v0  ;;  %v8296_v46 = vpop.f32.mrb[5].mxu1  ;;  %v4430_v35 = vld [vmem:[%s11980_s12 + $0x91] sm:$0xff] }
 0x618   : > { %v8540_v62 = vmax.f32 %v8508_v53, 0.0  ;;  %v8478_v42 = vadd.f32 %v14852_v0, %v8296_v46 }
 0x619   : > { %8573 = vst.msk [vmem:[%s14864_s18 + $0x18] sm:$0xff] %vm547_vm0, %v8541_v2  ;;  %v8511_v47 = vadd.f32 %v8479_v4, %v4419_v43 }
 0x61a   : > { %8572 = vst.msk [vmem:[%s14864_s18 + $0x10] sm:$0xff] %vm547_vm0, %v8540_v62  ;;  %v8510_v8 = vadd.f32 %v8478_v42, %v4418_v26  ;;  %v11015_v58 = vpop.f32.mrb[6].mxu1  ;;  %v4433_v42 = vld [vmem:[%s11980_s12 + $0xa9] sm:$0xff] }
 0x61b   : > { %v8543_v48 = vmax.f32 %v8511_v47, 0.0  ;;  %v8481_v19 = vadd.f32 %v11015_v58, %v14852_v0  ;;  %v8306_v33 = vpop.f32.mrb[7].mxu1  ;;  %v4432_v58 = vld [vmem:[%s11980_s12 + $0xa1] sm:$0xff] }
 0x61c   : > { %v8542_v10 = vmax.f32 %v8510_v8, 0.0  ;;  %v8480_v5 = vadd.f32 %v14852_v0, %v8306_v33 }
 0x61d   : > { %8575 = vst.msk [vmem:[%s14864_s18 + $0x28] sm:$0xff] %vm547_vm0, %v8543_v48  ;;  %v8513_v40 = vadd.f32 %v8481_v19, %v4421_v52 }
 0x61e   : > { %8574 = vst.msk [vmem:[%s14864_s18 + $0x20] sm:$0xff] %vm547_vm0, %v8542_v10  ;;  %v8512_v16 = vadd.f32 %v8480_v5, %v4420_v11  ;;  %v11018_v21 = vpop.f32.mrb[8].mxu1  ;;  %v4435_v5 = vld [vmem:[%s11980_s12 + $0xb9] sm:$0xff] }
 0x61f   : > { %v8545_v36 = vmax.f32 %v8513_v40, 0.0  ;;  %v8483_v39 = vadd.f32 %v11018_v21, %v14852_v0  ;;  %v8316_v55 = vpop.f32.mrb[9].mxu1  ;;  %v4434_v21 = vld [vmem:[%s11980_s12 + $0xb1] sm:$0xff] }
 0x620   : > { %v8544_v60 = vmax.f32 %v8512_v16, 0.0  ;;  %v8482_v44 = vadd.f32 %v14852_v0, %v8316_v55 }
 0x621   : > { %8577 = vst.msk [vmem:[%s14864_s18 + $0x38] sm:$0xff] %vm547_vm0, %v8545_v36  ;;  %v8515_v41 = vadd.f32 %v8483_v39, %v4423_v25 }
 0x622   : > { %8576 = vst.msk [vmem:[%s14864_s18 + $0x30] sm:$0xff] %vm547_vm0, %v8544_v60  ;;  %v8514_v24 = vadd.f32 %v8482_v44, %v4422_v29  ;;  %v11021_v34 = vpop.f32.mrb[10].mxu1  ;;  %v4437_v44 = vld [vmem:[%s11980_s12 + $0xc9] sm:$0xff] }
 0x623   : > { %v8547_v9 = vmax.f32 %v8515_v41, 0.0  ;;  %v8485_v30 = vadd.f32 %v11021_v34, %v14852_v0  ;;  %v8326_v7 = vpop.f32.mrb[11].mxu1  ;;  %v4436_v34 = vld [vmem:[%s11980_s12 + $0xc1] sm:$0xff] }
 0x624   : > { %v8546_v27 = vmax.f32 %v8514_v24, 0.0  ;;  %v8484_v54 = vadd.f32 %v14852_v0, %v8326_v7 }
 0x625   : > { %8579 = vst.msk [vmem:[%s14864_s18 + $0x48] sm:$0xff] %vm547_vm0, %v8547_v9  ;;  %v8517_v38 = vadd.f32 %v8485_v30, %v4425_v63 }
 0x626   : > { %8578 = vst.msk [vmem:[%s14864_s18 + $0x40] sm:$0xff] %vm547_vm0, %v8546_v27  ;;  %v8516_v31 = vadd.f32 %v8484_v54, %v4424_v57  ;;  %v11024_v12 = vpop.f32.mrb[12].mxu1  ;;  %v4439_v54 = vld [vmem:[%s11980_s12 + $0xd9] sm:$0xff] }
 0x627   : > { %v8549_v23 = vmax.f32 %v8517_v38, 0.0  ;;  %v8487_v56 = vadd.f32 %v11024_v12, %v14852_v0  ;;  %v8336_v61 = vpop.f32.mrb[13].mxu1  ;;  %v4438_v12 = vld [vmem:[%s11980_s12 + $0xd1] sm:$0xff] }
 0x628   : > { %v8548_v50 = vmax.f32 %v8516_v31, 0.0  ;;  %v8486_v20 = vadd.f32 %v14852_v0, %v8336_v61 }
 0x629   : > { %8581 = vst.msk [vmem:[%s14864_s18 + $0x58] sm:$0xff] %vm547_vm0, %v8549_v23  ;;  %v8519_v14 = vadd.f32 %v8487_v56, %v4427_v49 }
 0x62a   : > { %8580 = vst.msk [vmem:[%s14864_s18 + $0x50] sm:$0xff] %vm547_vm0, %v8548_v50  ;;  %v8518_v32 = vadd.f32 %v8486_v20, %v4426_v51  ;;  %v11027_v17 = vpop.f32.mrb[14].mxu1  ;;  %v4441_v20 = vld [vmem:[%s11980_s12 + $0xe9] sm:$0xff] }
 0x62b   : > { %v8551_v45 = vmax.f32 %v8519_v14, 0.0  ;;  %v8489_v15 = vadd.f32 %v11027_v17, %v14852_v0  ;;  %v8346_v6 = vpop.f32.mrb[15].mxu1  ;;  %v4440_v17 = vld [vmem:[%s11980_s12 + $0xe1] sm:$0xff] }
 0x62c   : > { %v8550_v13 = vmax.f32 %v8518_v32, 0.0  ;;  %v8488_v18 = vadd.f32 %v14852_v0, %v8346_v6 }
 0x62d   : > { %8583 = vst.msk [vmem:[%s14864_s18 + $0x68] sm:$0xff] %vm547_vm0, %v8551_v45  ;;  %v8521_v37 = vadd.f32 %v8489_v15, %v4429_v28 }
 0x62e   : > { %8582 = vst.msk [vmem:[%s14864_s18 + $0x60] sm:$0xff] %vm547_vm0, %v8550_v13  ;;  %v8520_v3 = vadd.f32 %v8488_v18, %v4428_v1  ;;  %v11030_v22 = vpop.f32.mrb[16].mxu1  ;;  %v4443_v18 = vld [vmem:[%s11980_s12 + $0xf9] sm:$0xff] }
 0x62f   : > { %v8553_v53 = vmax.f32 %v8521_v37, 0.0  ;;  %v8491_v43 = vadd.f32 %v11030_v22, %v14852_v0  ;;  %v8356_v2 = vpop.f32.mrb[17].mxu1  ;;  %v4442_v22 = vld [vmem:[%s11980_s12 + $0xf1] sm:$0xff] }
 0x630   : > { %v8552_v4 = vmax.f32 %v8520_v3, 0.0  ;;  %v8490_v26 = vadd.f32 %v14852_v0, %v8356_v2 }
 0x631   : > { %8585 = vst.msk [vmem:[%s14864_s18 + $0x78] sm:$0xff] %vm547_vm0, %v8553_v53  ;;  %v8523_v46 = vadd.f32 %v8491_v43, %v4431_v59 }
 0x632   : > { %8584 = vst.msk [vmem:[%s14864_s18 + $0x70] sm:$0xff] %vm547_vm0, %v8552_v4  ;;  %v8522_v62 = vadd.f32 %v8490_v26, %v4430_v35  ;;  %v11033_v47 = vpop.f32.mrb[18].mxu1  ;;  %v4445_v26 = vld [vmem:[%s11980_s12 + $0x109] sm:$0xff] }
 0x633   : > { %v8555_v8 = vmax.f32 %v8523_v46, 0.0  ;;  %v8493_v52 = vadd.f32 %v11033_v47, %v14852_v0  ;;  %v8366_v48 = vpop.f32.mrb[19].mxu1  ;;  %v4444_v47 = vld [vmem:[%s11980_s12 + $0x101] sm:$0xff]  ;;  %s11784_s12 = scalar_lea.vmem %s14989_s29, 4096 }
 0x634   : > { %v8554_v19 = vmax.f32 %v8522_v62, 0.0  ;;  %v8492_v11 = vadd.f32 %v14852_v0, %v8366_v48  ;;  %p11785_p11 = scmp.ne.s32.totalorder %s14989_s29, %s11784_s12  ;;  %p11792_p1 = scmp.lt.s32.totalorder %s11790_s15, %s11784_s12 }
 0x635   : > { %8587 = vst.msk [vmem:[%s14864_s18 + $0x88] sm:$0xff] %vm547_vm0, %v8555_v8  ;;  %v8525_v33 = vadd.f32 %v8493_v52, %v4433_v42 }
 0x636   : > { %8586 = vst.msk [vmem:[%s14864_s18 + $0x80] sm:$0xff] %vm547_vm0, %v8554_v19  ;;  %v8524_v10 = vadd.f32 %v8492_v11, %v4432_v58  ;;  %v11036_v40 = vpop.f32.mrb[20].mxu1  ;;  %p11786_p12 = pnand %p11785_p11, %p11926_p5  ;;  %p11793_p2 = por %p11792_p1, %p11791_p0 }
 0x637   : > { %v8557_v16 = vmax.f32 %v8525_v33, 0.0  ;;  %v8495_v25 = vadd.f32 %v11036_v40, %v14852_v0  ;;  %v8376_v36 = vpop.f32.mrb[21].mxu1 }
 0x638   : > { %v8556_v39 = vmax.f32 %v8524_v10, 0.0  ;;  %v8494_v29 = vadd.f32 %v14852_v0, %v8376_v36  ;;  %p11787_p13 = pneg %p11786_p12 }
 0x639   : > { %8589 = vst.msk [vmem:[%s14864_s18 + $0x98] sm:$0xff] %vm547_vm0, %v8557_v16  ;;  %v8527_v55 = vadd.f32 %v8495_v25, %v4435_v5 }
 0x63a   : > { %8588 = vst.msk [vmem:[%s14864_s18 + $0x90] sm:$0xff] %vm547_vm0, %v8556_v39  ;;  %v8526_v60 = vadd.f32 %v8494_v29, %v4434_v21  ;;  %v11039_v41 = vpop.f32.mrb[22].mxu1  ;;  %p11794_p3 = pnand %p11793_p2, %p11787_p13 }
 0x63b   : > { %v8559_v24 = vmax.f32 %v8527_v55, 0.0  ;;  %v8497_v63 = vadd.f32 %v11039_v41, %v14852_v0  ;;  %v8386_v9 = vpop.f32.mrb[23].mxu1 }
 0x63c   : > { %v8558_v30 = vmax.f32 %v8526_v60, 0.0  ;;  %v8496_v57 = vadd.f32 %v14852_v0, %v8386_v9 }
 0x63d   : > { %8591 = vst.msk [vmem:[%s14864_s18 + $0xa8] sm:$0xff] %vm547_vm0, %v8559_v24  ;;  %v8529_v7 = vadd.f32 %v8497_v63, %v4437_v44 }
 0x63e   : > { %8590 = vst.msk [vmem:[%s14864_s18 + $0xa0] sm:$0xff] %vm547_vm0, %v8558_v30  ;;  %v8528_v27 = vadd.f32 %v8496_v57, %v4436_v34  ;;  %v11042_v38 = vpop.f32.mrb[24].mxu1 }
 0x63f   : > { %v8561_v31 = vmax.f32 %v8529_v7, 0.0  ;;  %v8499_v49 = vadd.f32 %v11042_v38, %v14852_v0  ;;  %v8396_v23 = vpop.f32.mrb[25].mxu1 }
 0x640   : > { %v8560_v56 = vmax.f32 %v8528_v27, 0.0  ;;  %v8498_v51 = vadd.f32 %v14852_v0, %v8396_v23 }
 0x641   : > { %8593 = vst.msk [vmem:[%s14864_s18 + $0xb8] sm:$0xff] %vm547_vm0, %v8561_v31  ;;  %v8531_v61 = vadd.f32 %v8499_v49, %v4439_v54 }
 0x642   : > { %8592 = vst.msk [vmem:[%s14864_s18 + $0xb0] sm:$0xff] %vm547_vm0, %v8560_v56  ;;  %v8530_v50 = vadd.f32 %v8498_v51, %v4438_v12  ;;  %v11045_v14 = vpop.f32.mrb[26].mxu1 }
 0x643   : > { %v8563_v32 = vmax.f32 %v8531_v61, 0.0  ;;  %v8501_v28 = vadd.f32 %v11045_v14, %v14852_v0  ;;  %v8406_v45 = vpop.f32.mrb[27].mxu1 }
 0x644   : > { %v8562_v15 = vmax.f32 %v8530_v50, 0.0  ;;  %v8500_v1 = vadd.f32 %v14852_v0, %v8406_v45 }
 0x645   : > { %8595 = vst.msk [vmem:[%s14864_s18 + $0xc8] sm:$0xff] %vm547_vm0, %v8563_v32  ;;  %v8533_v6 = vadd.f32 %v8501_v28, %v4441_v20 }
 0x646   : > { %8594 = vst.msk [vmem:[%s14864_s18 + $0xc0] sm:$0xff] %vm547_vm0, %v8562_v15  ;;  %v8532_v13 = vadd.f32 %v8500_v1, %v4440_v17  ;;  %v11048_v37 = vpop.f32.mrb[28].mxu1 }
 0x647   : > { %v8565_v3 = vmax.f32 %v8533_v6, 0.0  ;;  %v8503_v59 = vadd.f32 %v11048_v37, %v14852_v0  ;;  %v8416_v53 = vpop.f32.mrb[29].mxu1 }
 0x648   : > { %v8564_v43 = vmax.f32 %v8532_v13, 0.0  ;;  %v8502_v35 = vadd.f32 %v14852_v0, %v8416_v53 }
 0x649   : > { %8597 = vst.msk [vmem:[%s14864_s18 + $0xd8] sm:$0xff] %vm547_vm0, %v8565_v3  ;;  %v8535_v2 = vadd.f32 %v8503_v59, %v4443_v18 }
 0x64a   : > { %8596 = vst.msk [vmem:[%s14864_s18 + $0xd0] sm:$0xff] %vm547_vm0, %v8564_v43  ;;  %v8534_v4 = vadd.f32 %v8502_v35, %v4442_v22  ;;  %v11051_v46 = vpop.f32.mrb[30].mxu1 }
 0x64b   : > { %v8567_v62 = vmax.f32 %v8535_v2, 0.0  ;;  %v8505_v42 = vadd.f32 %v11051_v46, %v14852_v0  ;;  %v8426_v8 = vpop.f32.mrb[31].mxu1 }
 0x64c   : > { %v8566_v52 = vmax.f32 %v8534_v4, 0.0  ;;  %v8504_v58 = vadd.f32 %v14852_v0, %v8426_v8 }
 0x64d   : > { %8599 = vst.msk [vmem:[%s14864_s18 + $0xe8] sm:$0xff] %vm547_vm0, %v8567_v62  ;;  %v8537_v48 = vadd.f32 %v8505_v42, %v4445_v26 }
 0x64e   : > { %8598 = vst.msk [vmem:[%s14864_s18 + $0xe0] sm:$0xff] %vm547_vm0, %v8566_v52  ;;  %v8536_v19 = vadd.f32 %v8504_v58, %v4444_v47 }
 0x64f   : > { %v8569_v11 = vmax.f32 %v8537_v48, 0.0 }
 0x650   : > { %v8568_v0 = vmax.f32 %v8536_v19, 0.0 }
 0x651   : > { %8601 = vst.msk [vmem:[%s14864_s18 + $0xf8] sm:$0xff] %vm547_vm0, %v8569_v11 }
 0x652   : > { %8600 = vst.msk [vmem:[%s14864_s18 + $0xf0] sm:$0xff] %vm547_vm0, %v8568_v0 }
 0x653   : > { %11797 = shalt.err (!%p11794_p3)
}
 0x654   : > { %s11798_s16 = scalar_lea.hbm %s14987_s11, 4096  ;;  %s11802_s20 = scalar_lea.hbm %s15044_s6, 8192 }
 0x655   : > { %p11799_p4 = scmp.ne.s32.totalorder %s14987_s11, %s11798_s16  ;;  %p11803_p9 = scmp.lt.u32.totalorder %s14987_s11, %s15044_s6 }
 0x656   : > { %p11804_p10 = scmp.lt.u32.totalorder %s11802_s20, %s11798_s16  ;;  %p11806_p12 = scmp.lt.u32.totalorder %s11798_s16, %s14987_s11 }
 0x657   : > { %p11800_p7 = pnand %p11799_p4, %p11926_p5 }
 0x658   : > { %p11805_p11 = por %p11804_p10, %p11803_p9 }
 0x659   : > { %p11801_p8 = pneg %p11800_p7 }
 0x65a   : > { %p11807_p13 = por %p11806_p12, %p11805_p11 }
 0x65c   : > { %p11808_p0 = pnand %p11807_p13, %p11801_p8 }
 0x65e   : > { %11811 = shalt.err (!%p11808_p0)
}
 0x65f   : > { %s11851_s28 = smov 128   ;;  %s11852_s9 = smov 8  }
 0x660   : > { %11709 = dma.vmem_to_hbm [thread:$0]  (%p11926_p5), %s14989_s29, 4096, %s14987_s11, %s14997_s25, %s11851_s28, %s11851_s28, %s11852_s9  }
 0x661 PF: > { %p11715_p1 = scmp.ge.s32.totalorder %s11846_s24, 2  ;;  %s8631_s10 = sand.u32 1, %s11834_s21  }
 0x662   : > { %s8632_s12 = scalar_lea.sflag [#allocation4], %s8631_s10 }
 0x663   : > { %p11712_p2 = pnand %p11715_p1, %p11930_p6 }
 0x665   : > { %11829 = dma.done.wait (!%p11712_p2), %s8632_s12, 4096  }
 0x666   : > { %11831 = vsyncadd (!%p11712_p2), %s8632_s12, 4294963200  ;;  %p16_p3 = scmp.ge.s32.totalorder %s11913_s27, 4   ;;  %s15705_s21 = smov %s11838_s22 }
 0x667   : > { %s15706_s22 = smov %s11842_s23  ;;  %s15707_s23 = smov %s11924_s30 }
 0x668   : > { %s15708_s24 = smov %s11913_s27  ;;  %18 = sbr.rel (!%p16_p3) target bundleno = 3 (0x3), region = 96 }
 0x66f   :  { %8637 = vsyncpa [#allocation4], 1 }
 0x670   :  { %8639 = vsyncpa [#allocation4 + $0x1], 1 }

</bundles_post_ra>
